<compile_context>
chip_gen: v7x
topology: tpu7x:2x2x1
jax: 0.10.0
libtpu: 0.0.40
codegen_flags: <defaults>
</compile_context>

<pallas_src>
import math
from functools import partial

import jax
import jax.numpy as jnp
from jax.experimental import pallas as pl
from jax.experimental.pallas import tpu as pltpu

LN_EPS = 1e-5          # PyTorch LayerNorm default eps
FFN_DIM = 2048         # nn.TransformerEncoderLayer default dim_feedforward

MAX_TM = 256           # row-tile cap
MAX_TN = 512           # output-column tile cap
MAX_TK = 512           # reduction tile cap

# bf16 operands on the MXU (native rate on v5e/v6e/v7x, half the DMA bytes);
# accumulation + epilogues stay f32.
ACT_DTYPE = jnp.bfloat16
WEIGHT_DTYPE = jnp.bfloat16

# TODO(synk): re-derive per chip (v7x has only 64 MiB VMEM/TC; v6e could go
# higher with Buffered(3) weight streams for the 2048-wide FFN).
VMEM_LIMIT = 48 * 1024 * 1024


def _cp(*semantics):
    return pltpu.CompilerParams(dimension_semantics=semantics,
                                vmem_limit_bytes=VMEM_LIMIT)


def _pick_row_tile(dim, cap=MAX_TM):
    """Largest divisor of `dim` <= cap that is a multiple of 8, else full dim."""
    if dim <= cap:
        return dim
    for t in range(cap - cap % 8, 7, -8):
        if dim % t == 0:
            return t
    # TODO(synk): pad the token-row count to a multiple of 8 upstream so an
    # awkward B*S never forces a whole-array block.
    return dim


def _pick_lane_tile(dim, cap):
    """Lane-mapped dims: largest 128-multiple divisor <= cap, else full dim."""
    if dim <= cap:
        return dim
    for t in range(cap - cap % 128, 127, -128):
        if dim % t == 0:
            return t
    return dim


# --------------------------------------------------------------------------
# in-kernel math helpers (all f32)
# --------------------------------------------------------------------------

def _layernorm(z, g, b):
    mu = jnp.mean(z, axis=-1, keepdims=True)
    var = jnp.mean(jnp.square(z - mu), axis=-1, keepdims=True)
    return (z - mu) * jax.lax.rsqrt(var + LN_EPS) * g + b


def _erf(x):
    # Abramowitz & Stegun 7.1.26, |err| < 1.5e-7 (below f32 resolution);
    # built only from exp/div so it fuses into the matmul epilogue.
    sign = jnp.where(x < 0.0, -1.0, 1.0)
    z = jnp.abs(x)
    t = 1.0 / (1.0 + 0.3275911 * z)
    poly = ((((1.061405429 * t - 1.453152027) * t + 1.421413741) * t
             - 0.284496736) * t + 0.254829592) * t
    return sign * (1.0 - poly * jnp.exp(-z * z))


def _gelu_exact(x):
    # PyTorch F.gelu default (exact erf form).
    return 0.5 * x * (1.0 + _erf(x * (1.0 / math.sqrt(2.0))))


# --------------------------------------------------------------------------
# fused QKV projection: q/k/v as three (B*S, E) outputs, N-tiled
# --------------------------------------------------------------------------

def _qkv_kernel(x_ref, wq_ref, wk_ref, wv_ref, bq_ref, bk_ref, bv_ref,
                q_ref, k_ref, v_ref, aq_ref, ak_ref, av_ref):
    kk = pl.program_id(2)

    @pl.when(kk == 0)
    def _():
        aq_ref[...] = jnp.zeros_like(aq_ref)
        ak_ref[...] = jnp.zeros_like(ak_ref)
        av_ref[...] = jnp.zeros_like(av_ref)

    x = x_ref[...]
    aq_ref[...] += jnp.dot(x, wq_ref[...], preferred_element_type=jnp.float32)
    ak_ref[...] += jnp.dot(x, wk_ref[...], preferred_element_type=jnp.float32)
    av_ref[...] += jnp.dot(x, wv_ref[...], preferred_element_type=jnp.float32)

    @pl.when(kk == pl.num_programs(2) - 1)
    def _():
        q_ref[...] = (aq_ref[...] + bq_ref[...]).astype(q_ref.dtype)
        k_ref[...] = (ak_ref[...] + bk_ref[...]).astype(k_ref.dtype)
        v_ref[...] = (av_ref[...] + bv_ref[...]).astype(v_ref.dtype)


def qkv_proj(x, wqT, wkT, wvT, bq, bk, bv):
    n, kdim = x.shape
    e = wqT.shape[1]
    tm = _pick_row_tile(n)
    tn = _pick_lane_tile(e, MAX_TN)
    tk = _pick_lane_tile(kdim, MAX_TK)
    x_spec = pl.BlockSpec((tm, tk), lambda i, j, k: (i, k))
    w_spec = pl.BlockSpec((tk, tn), lambda i, j, k: (k, j))
    b_spec = pl.BlockSpec((1, tn), lambda i, j, k: (0, j))
    o_spec = pl.BlockSpec((tm, tn), lambda i, j, k: (i, j))
    out_sds = jax.ShapeDtypeStruct((n, e), ACT_DTYPE)
    cost = pl.CostEstimate(
        flops=2 * n * kdim * 3 * e,
        transcendentals=0,
        bytes_accessed=int(n * kdim * 2 + 3 * kdim * e * 2 + 3 * n * e * 2))
    return pl.pallas_call(
        _qkv_kernel,
        grid=(n // tm, e // tn, kdim // tk),
        in_specs=[x_spec, w_spec, w_spec, w_spec, b_spec, b_spec, b_spec],
        out_specs=[o_spec, o_spec, o_spec],
        out_shape=[out_sds, out_sds, out_sds],
        scratch_shapes=[pltpu.VMEM((tm, tn), jnp.float32)] * 3,
        compiler_params=_cp("parallel", "parallel", "arbitrary"),
        cost_estimate=cost,
    )(x, wqT, wkT, wvT, bq.reshape(1, e), bk.reshape(1, e), bv.reshape(1, e))


# --------------------------------------------------------------------------
# attention: one batch per grid step; per-head results written straight into
# o_ref lane slices; deferred softmax normalization; bf16 PV matmul
# --------------------------------------------------------------------------

def _attention_kernel(q_ref, k_ref, v_ref, o_ref, *, n_heads, head_dim, scale):
    q = q_ref[...]                                   # (S, E) bf16
    k = k_ref[...]
    v = v_ref[...]
    for h in range(n_heads):                         # static unroll over heads
        lo = h * head_dim
        hi = lo + head_dim
        qh = q[:, lo:hi] * scale                     # (S, hd)
        s = jax.lax.dot_general(qh, k[:, lo:hi], (((1,), (1,)), ((), ())),
                                preferred_element_type=jnp.float32)  # (S, S) f32
        m = jnp.max(s, axis=-1, keepdims=True)
        p = jnp.exp(s - m)                           # unnormalized probs (f32)
        denom = jnp.sum(p, axis=-1, keepdims=True)
        pv = jnp.dot(p.astype(v.dtype), v[:, lo:hi],
                     preferred_element_type=jnp.float32)             # (S, hd)
        o_ref[:, lo:hi] = (pv * pl.reciprocal(denom, approx=True)
                           ).astype(o_ref.dtype)
    # TODO(synk): flash-style tq/tk blocking + head packing to >=128 lanes for
    # long S / small head_dim (needed to stay inside v7x's 64 MiB VMEM).


def attention(q3, k3, v3, n_heads):
    """q3, k3, v3: (B, S, E) -> (B, S, E)."""
    b, s, e = q3.shape
    hd = e // n_heads
    spec = pl.BlockSpec((None, s, e), lambda i: (i, 0, 0))
    return pl.pallas_call(
        partial(_attention_kernel, n_heads=n_heads, head_dim=hd,
                scale=1.0 / math.sqrt(hd)),
        grid=(b,),
        in_specs=[spec, spec, spec],
        out_specs=spec,
        out_shape=jax.ShapeDtypeStruct((b, s, e), q3.dtype),
        compiler_params=_cp("parallel"),
    )(q3, k3, v3)


# --------------------------------------------------------------------------
# fused (matmul + bias + residual + LayerNorm): out_proj / linear2 epilogues
# --------------------------------------------------------------------------

def _linear_add_ln_kernel(x_ref, wT_ref, b_ref, res_ref, g_ref, beta_ref,
                          o_ref, acc_ref):
    kk = pl.program_id(1)

    @pl.when(kk == 0)
    def _():
        acc_ref[...] = jnp.zeros_like(acc_ref)

    acc_ref[...] += jnp.dot(x_ref[...], wT_ref[...],
                            preferred_element_type=jnp.float32)

    @pl.when(kk == pl.num_programs(1) - 1)
    def _():
        z = acc_ref[...] + b_ref[...] + res_ref[...].astype(jnp.float32)
        o_ref[...] = _layernorm(z, g_ref[...], beta_ref[...]).astype(o_ref.dtype)


def linear_add_ln(x, wT, b, res, g, beta):
    """LayerNorm(res + x @ wT + b)  (PyTorch post-norm residual)."""
    n, kdim = x.shape
    e = wT.shape[1]
    tm = _pick_row_tile(n)
    tk = _pick_lane_tile(kdim, MAX_TK)
    row_spec = pl.BlockSpec((tm, e), lambda i, k: (i, 0))
    vec_spec = pl.BlockSpec((1, e), lambda i, k: (0, 0))
    cost = pl.CostEstimate(
        flops=2 * n * kdim * e,
        transcendentals=n,
        bytes_accessed=int(n * kdim * 2 + kdim * e * 2 + 2 * n * e * 2))
    # TODO(synk): pipeline_mode=pl.Buffered(3) on the (tk, E) weight stream for
    # the 2048-wide linear2 reduction on v6e.
    return pl.pallas_call(
        _linear_add_ln_kernel,
        grid=(n // tm, kdim // tk),
        in_specs=[pl.BlockSpec((tm, tk), lambda i, k: (i, k)),
                  pl.BlockSpec((tk, e), lambda i, k: (k, 0)),
                  vec_spec, row_spec, vec_spec, vec_spec],
        out_specs=row_spec,
        out_shape=jax.ShapeDtypeStruct((n, e), ACT_DTYPE),
        scratch_shapes=[pltpu.VMEM((tm, e), jnp.float32)],
        compiler_params=_cp("parallel", "arbitrary"),
        cost_estimate=cost,
    )(x, wT, b.reshape(1, e), res, g.reshape(1, e), beta.reshape(1, e))


# --------------------------------------------------------------------------
# fused (matmul + bias + exact GELU): linear1 of the FFN
# --------------------------------------------------------------------------

def _linear_gelu_kernel(x_ref, wT_ref, b_ref, o_ref, acc_ref):
    kk = pl.program_id(2)

    @pl.when(kk == 0)
    def _():
        acc_ref[...] = jnp.zeros_like(acc_ref)

    acc_ref[...] += jnp.dot(x_ref[...], wT_ref[...],
                            preferred_element_type=jnp.float32)

    @pl.when(kk == pl.num_programs(2) - 1)
    def _():
        o_ref[...] = _gelu_exact(acc_ref[...] + b_ref[...]).astype(o_ref.dtype)


def linear_gelu(x, wT, b):
    n, kdim = x.shape
    f = wT.shape[1]
    tm = _pick_row_tile(n)
    tn = _pick_lane_tile(f, MAX_TN)
    tk = _pick_lane_tile(kdim, MAX_TK)
    cost = pl.CostEstimate(
        flops=2 * n * kdim * f,
        transcendentals=n * f,
        bytes_accessed=int(n * kdim * 2 + kdim * f * 2 + n * f * 2))
    return pl.pallas_call(
        _linear_gelu_kernel,
        grid=(n // tm, f // tn, kdim // tk),
        in_specs=[pl.BlockSpec((tm, tk), lambda i, j, k: (i, k)),
                  pl.BlockSpec((tk, tn), lambda i, j, k: (k, j)),
                  pl.BlockSpec((1, tn), lambda i, j, k: (0, j))],
        out_specs=pl.BlockSpec((tm, tn), lambda i, j, k: (i, j)),
        out_shape=jax.ShapeDtypeStruct((n, f), ACT_DTYPE),
        scratch_shapes=[pltpu.VMEM((tm, tn), jnp.float32)],
        compiler_params=_cp("parallel", "parallel", "arbitrary"),
        cost_estimate=cost,
    )(x, wT, b.reshape(1, f))


# --------------------------------------------------------------------------
# multi-scale conv branch: scale_fusion folded into 7 combined taps (exact);
# tap shifts via pltpu.roll + edge masks (no wrapper pad, no unaligned slices)
# --------------------------------------------------------------------------

def _multiscale_kernel(x_ref, w_ref, b_ref, g_ref, beta_ref, o_ref, *, seq_len):
    x = x_ref[...]                                        # (S, E) f32
    row = jax.lax.broadcasted_iota(jnp.int32, x.shape, 0)
    acc = jnp.dot(x, w_ref[3], preferred_element_type=jnp.float32)   # tap d = 0
    for t in range(7):
        d = t - 3
        if d == 0:
            continue
        # shifted[r] = x[r + d]  (zero outside [0, S))  -- XLU roll is a free slot
        shifted = pltpu.roll(x, shift=(-d) % seq_len, axis=0)
        valid = (row + d >= 0) & (row + d < seq_len)
        shifted = jnp.where(valid, shifted, jnp.zeros_like(shifted))
        acc = acc + jnp.dot(shifted, w_ref[t], preferred_element_type=jnp.float32)
    z = acc + b_ref[...]
    o_ref[...] = _layernorm(z, g_ref[...], beta_ref[...]).astype(o_ref.dtype)


def multiscale_branch(x_bse, w_comb, b_comb, g, beta):
    """x_bse: (B, S, E) f32 -> (B, S, E//4): 3 grouped convs + scale_fusion + LN."""
    b, s, e = x_bse.shape
    eq = w_comb.shape[-1]
    vec_spec = pl.BlockSpec((1, eq), lambda i: (0, 0))
    return pl.pallas_call(
        partial(_multiscale_kernel, seq_len=s),
        grid=(b,),
        in_specs=[pl.BlockSpec((None, s, e), lambda i: (i, 0, 0)),
                  pl.BlockSpec((7, e, eq), lambda i: (0, 0, 0)),
                  vec_spec, vec_spec, vec_spec],
        out_specs=pl.BlockSpec((None, s, eq), lambda i: (i, 0, 0)),
        out_shape=jax.ShapeDtypeStruct((b, s, eq), jnp.float32),
        compiler_params=_cp("parallel"),
    )(x_bse, w_comb, b_comb.reshape(1, eq), g.reshape(1, eq), beta.reshape(1, eq))


# --------------------------------------------------------------------------
# final encoder LayerNorm (+ fused branch add), per-quarter lane-slice writes
# --------------------------------------------------------------------------

def _final_ln_fuse_kernel(x_ref, f_ref, g_ref, b_ref, o_ref, *, fw, eq):
    ln = _layernorm(x_ref[...].astype(jnp.float32), g_ref[...], b_ref[...])
    f = f_ref[...] * fw                                   # (tm, E//4) f32
    for qtr in range(4):                                  # cat([fused]*4, -1)
        lo = qtr * eq
        o_ref[:, lo:lo + eq] = (ln[:, lo:lo + eq] + f).astype(o_ref.dtype)


def _final_ln_kernel(x_ref, g_ref, b_ref, o_ref):
    o_ref[...] = _layernorm(x_ref[...].astype(jnp.float32),
                            g_ref[...], b_ref[...]).astype(o_ref.dtype)


def final_ln_fuse(x, fused, g, b, fw):
    n, e = x.shape
    eq = fused.shape[1]
    tm = _pick_row_tile(n)
    vec_spec = pl.BlockSpec((1, e), lambda i: (0, 0))
    return pl.pallas_call(
        partial(_final_ln_fuse_kernel, fw=fw, eq=eq),
        grid=(n // tm,),
        in_specs=[pl.BlockSpec((tm, e), lambda i: (i, 0)),
                  pl.BlockSpec((tm, eq), lambda i: (i, 0)),
                  vec_spec, vec_spec],
        out_specs=pl.BlockSpec((tm, e), lambda i: (i, 0)),
        out_shape=jax.ShapeDtypeStruct((n, e), jnp.float32),
        compiler_params=_cp("parallel"),
    )(x, fused, g.reshape(1, e), b.reshape(1, e))


def final_ln(x, g, b):
    n, e = x.shape
    tm = _pick_row_tile(n)
    vec_spec = pl.BlockSpec((1, e), lambda i: (0, 0))
    return pl.pallas_call(
        _final_ln_kernel,
        grid=(n // tm,),
        in_specs=[pl.BlockSpec((tm, e), lambda i: (i, 0)), vec_spec, vec_spec],
        out_specs=pl.BlockSpec((tm, e), lambda i: (i, 0)),
        out_shape=jax.ShapeDtypeStruct((n, e), jnp.float32),
        compiler_params=_cp("parallel"),
    )(x, g.reshape(1, e), b.reshape(1, e))


# --------------------------------------------------------------------------
# transformer encoder (post-norm layers, exact-gelu activation, final LN)
# --------------------------------------------------------------------------

def transformer_layer(x2, p, s, b, e, h):
    q, k, v = qkv_proj(x2, p["wq_T"], p["wk_T"], p["wv_T"],
                       p["bq"], p["bk"], p["bv"])             # (B*S, E) each
    # free (contiguous) reshapes into the per-batch attention layout
    a = attention(q.reshape(b, s, e), k.reshape(b, s, e), v.reshape(b, s, e), h)
    a2 = a.reshape(b * s, e)
    # out_proj + residual + norm1 fused
    x2 = linear_add_ln(a2, p["out_w_T"], p["out_b"], x2, p["ln1_g"], p["ln1_b"])
    # linear1 + GELU fused, then linear2 + residual + norm2 fused
    hmid = linear_gelu(x2, p["lin1_w_T"], p["lin1_b"])        # (B*S, FFN_DIM)
    x2 = linear_add_ln(hmid, p["lin2_w_T"], p["lin2_b"], x2,
                       p["ln2_g"], p["ln2_b"])
    return x2


def multi_scale_temporal_encoder(x, params):
    """x: (S, B, E) float32 -> (S, B, E) float32."""
    s, b, e = x.shape
    h = params["n_head"]

    x_bse = jnp.transpose(x, (1, 0, 2))                 # (B,S,E) f32: conv-branch input
    enc = x_bse.astype(ACT_DTYPE).reshape(b * s, e)     # bf16 token matrix, main path
    for lp in params["layers"]:
        enc = transformer_layer(enc, lp, s, b, e, h)

    # fusion_weight is a static Python float here (init value 0.05); if it ever
    # becomes a traced/trained array this static branch must be reworked.
    fw_sig = 1.0 / (1.0 + math.exp(-float(params["fusion_weight"])))
    if fw_sig > 0.01:
        fused = multiscale_branch(x_bse, params["w_comb"], params["b_comb"],
                                  params["sn_g"], params["sn_b"])   # (B,S,E/4)
        out2 = final_ln_fuse(enc, fused.reshape(b * s, e // 4),
                             params["final_g"], params["final_b"], fw_sig)
    else:
        out2 = final_ln(enc, params["final_g"], params["final_b"])
    return jnp.transpose(out2.reshape(b, s, e), (1, 0, 2))


# --------------------------------------------------------------------------
# deterministic parameter construction (shapes from the PyTorch __init__)
# --------------------------------------------------------------------------

def init_params(key, e, h, n_layers, ffn_dim=FFN_DIM):
    eq = e // 4
    groups = e // 8
    in_pg = e // groups            # input channels per conv group  (= 8)
    out_pg = eq // groups          # output channels per conv group (= 2)
    kit = iter(jax.random.split(key, 4 * n_layers + 8))

    def nrm(shape, scale=0.05):
        return (scale * jax.random.normal(next(kit), shape)).astype(jnp.float32)

    layers = []
    for _ in range(n_layers):
        in_w_T = nrm((e, 3 * e))                     # in_proj_weight^T, split q/k/v
        layers.append(dict(
            wq_T=in_w_T[:, :e].astype(WEIGHT_DTYPE),
            wk_T=in_w_T[:, e:2 * e].astype(WEIGHT_DTYPE),
            wv_T=in_w_T[:, 2 * e:].astype(WEIGHT_DTYPE),
            bq=jnp.zeros((e,), jnp.float32),
            bk=jnp.zeros((e,), jnp.float32),
            bv=jnp.zeros((e,), jnp.float32),
            out_w_T=nrm((e, e)).astype(WEIGHT_DTYPE),        # out_proj.weight^T
            out_b=jnp.zeros((e,), jnp.float32),
            lin1_w_T=nrm((e, ffn_dim)).astype(WEIGHT_DTYPE), # linear1.weight^T
            lin1_b=jnp.zeros((ffn_dim,), jnp.float32),
            lin2_w_T=nrm((ffn_dim, e)).astype(WEIGHT_DTYPE), # linear2.weight^T
            lin2_b=jnp.zeros((e,), jnp.float32),
            ln1_g=jnp.ones((e,), jnp.float32), ln1_b=jnp.zeros((e,), jnp.float32),
            ln2_g=jnp.ones((e,), jnp.float32), ln2_b=jnp.zeros((e,), jnp.float32),
        ))

    def grouped_to_taps(w_g, ksize):
        # grouped Conv1d weight (eq, in_pg, K) -> block-diagonal dense per-tap
        # matrices (K, E, eq)
        dense = jnp.zeros((eq, e, ksize), dtype=w_g.dtype)
        for gi in range(groups):
            dense = dense.at[gi * out_pg:(gi + 1) * out_pg,
                             gi * in_pg:(gi + 1) * in_pg, :].set(
                w_g[gi * out_pg:(gi + 1) * out_pg])
        return jnp.transpose(dense, (2, 1, 0))

    taps, conv_bias = {}, {}
    for name, ksize in (("short", 3), ("medium", 5), ("long", 7)):
        bound = 0.1 * math.sqrt(6.0 / (in_pg * ksize + out_pg * ksize))  # xavier, gain=0.1
        w_g = jax.random.uniform(next(kit), (eq, in_pg, ksize),
                                 minval=-bound, maxval=bound, dtype=jnp.float32)
        taps[name] = grouped_to_taps(w_g, ksize)
        conv_bias[name] = jnp.zeros((eq,), jnp.float32)     # bias init 0

    bound = 0.1 * math.sqrt(6.0 / (3 * eq + eq))
    wf = jax.random.uniform(next(kit), (eq, 3 * eq),
                            minval=-bound, maxval=bound, dtype=jnp.float32)
    bf = jnp.zeros((eq,), jnp.float32)                      # scale_fusion bias 0
    wfT = wf.T                                              # (3*eq, eq)
    wf_parts = {"short": wfT[:eq], "medium": wfT[eq:2 * eq], "long": wfT[2 * eq:]}

    # Fold scale_fusion into the conv taps (exact: no nonlinearity in between).
    # Unified time-offset d in [-3, 3]; conv with kernel K contributes its tap
    # (d + (K-1)//2) whenever |d| <= (K-1)//2.
    w_comb = jnp.zeros((7, e, eq), jnp.float32)
    for name, ksize in (("short", 3), ("medium", 5), ("long", 7)):
        half = (ksize - 1) // 2
        for d in range(-half, half + 1):
            w_comb = w_comb.at[d + 3].add(taps[name][d + half] @ wf_parts[name])
    b_comb = (conv_bias["short"] @ wf_parts["short"]
              + conv_bias["medium"] @ wf_parts["medium"]
              + conv_bias["long"] @ wf_parts["long"] + bf)

    return dict(
        n_head=h,
        layers=layers,
        final_g=jnp.ones((e,), jnp.float32),                # encoder final LN
        final_b=jnp.zeros((e,), jnp.float32),
        w_comb=w_comb,                                      # (7, E, E//4), f32 branch
        b_comb=b_comb,                                      # (E//4,)
        sn_g=jnp.ones((eq,), jnp.float32),                  # scale_norm
        sn_b=jnp.zeros((eq,), jnp.float32),
        scale_weights=jnp.full((3,), 0.01, jnp.float32),    # unused in forward
        fusion_weight=0.05,                                 # nn.Parameter init value
    )


if __name__ == "__main__":
    S, B, E, H, L = 8, 2, 32, 4, 2
    key = jax.random.PRNGKey(0)
    kx, kp = jax.random.split(key)
    x = jax.random.normal(kx, (S, B, E), dtype=jnp.float32)
    params = init_params(kp, E, H, L)

    fwd = jax.jit(lambda xx: multi_scale_temporal_encoder(xx, params))
    out = jax.block_until_ready(fwd(x))

    assert out.shape == (S, B, E), out.shape
    assert bool(jnp.all(jnp.isfinite(out)))
    print("KERNEL_OK")
</pallas_src>

<mosaic_0001>
module attributes {stable_mosaic.version = 11 : i64} {
  func.func @_qkv_kernel(%arg0: i32, %arg1: i32, %arg2: i32, %arg3: memref<16x32xbf16, #tpu.memory_space<vmem>>, %arg4: memref<32x32xbf16, #tpu.memory_space<vmem>>, %arg5: memref<32x32xbf16, #tpu.memory_space<vmem>>, %arg6: memref<32x32xbf16, #tpu.memory_space<vmem>>, %arg7: memref<1x32xf32, #tpu.memory_space<vmem>>, %arg8: memref<1x32xf32, #tpu.memory_space<vmem>>, %arg9: memref<1x32xf32, #tpu.memory_space<vmem>>, %arg10: memref<16x32xbf16, #tpu.memory_space<vmem>>, %arg11: memref<16x32xbf16, #tpu.memory_space<vmem>>, %arg12: memref<16x32xbf16, #tpu.memory_space<vmem>>, %arg13: memref<16x32xf32, #tpu.memory_space<vmem>>, %arg14: memref<16x32xf32, #tpu.memory_space<vmem>>, %arg15: memref<16x32xf32, #tpu.memory_space<vmem>>) attributes {dimension_semantics = [#tpu.dimension_semantics<parallel>, #tpu.dimension_semantics<parallel>, #tpu.dimension_semantics<arbitrary>], iteration_bounds = array<i64: 1, 1, 1>, scalar_prefetch = 0 : i64, scratch_operands = 3 : i64, tpu.core_type = #tpu.core_type<tc>, window_params = [{transform_indices = @transform_0, window_bounds = array<i64: 16, 32>}, {transform_indices = @transform_1, window_bounds = array<i64: 32, 32>}, {transform_indices = @transform_2, window_bounds = array<i64: 32, 32>}, {transform_indices = @transform_3, window_bounds = array<i64: 32, 32>}, {transform_indices = @transform_4, window_bounds = array<i64: 1, 32>}, {transform_indices = @transform_5, window_bounds = array<i64: 1, 32>}, {transform_indices = @transform_6, window_bounds = array<i64: 1, 32>}, {transform_indices = @transform_7, window_bounds = array<i64: 16, 32>}, {transform_indices = @transform_8, window_bounds = array<i64: 16, 32>}, {transform_indices = @transform_9, window_bounds = array<i64: 16, 32>}]} {
    %c0_i32 = arith.constant 0 : i32
    %0 = arith.cmpi eq, %arg2, %c0_i32 : i32
    %1 = arith.extui %0 : i1 to i32
    %c0_i32_0 = arith.constant 0 : i32
    %2 = arith.cmpi ne, %1, %c0_i32_0 : i32
    scf.if %2 {
      %cst_24 = arith.constant 0.000000e+00 : f32
      %22 = vector.broadcast %cst_24 : f32 to vector<16x32xf32>
      %c0_25 = arith.constant 0 : index
      %c0_26 = arith.constant 0 : index
      %23 = vector.load %arg13[%c0_25, %c0_26] : memref<16x32xf32, #tpu.memory_space<vmem>>, vector<16x32xf32>
      tpu.vector_store %arg13[%c0_25, %c0_26], %22 {strides = array<i32>} : memref<16x32xf32, #tpu.memory_space<vmem>>, vector<16x32xf32>,
      %cst_27 = arith.constant 0.000000e+00 : f32
      %24 = vector.broadcast %cst_27 : f32 to vector<16x32xf32>
      %c0_28 = arith.constant 0 : index
      %c0_29 = arith.constant 0 : index
      %25 = vector.load %arg14[%c0_28, %c0_29] : memref<16x32xf32, #tpu.memory_space<vmem>>, vector<16x32xf32>
      tpu.vector_store %arg14[%c0_28, %c0_29], %24 {strides = array<i32>} : memref<16x32xf32, #tpu.memory_space<vmem>>, vector<16x32xf32>,
      %cst_30 = arith.constant 0.000000e+00 : f32
      %26 = vector.broadcast %cst_30 : f32 to vector<16x32xf32>
      %c0_31 = arith.constant 0 : index
      %c0_32 = arith.constant 0 : index
      %27 = vector.load %arg15[%c0_31, %c0_32] : memref<16x32xf32, #tpu.memory_space<vmem>>, vector<16x32xf32>
      tpu.vector_store %arg15[%c0_31, %c0_32], %26 {strides = array<i32>} : memref<16x32xf32, #tpu.memory_space<vmem>>, vector<16x32xf32>,
    } else {
    }
    %c0 = arith.constant 0 : index
    %c0_1 = arith.constant 0 : index
    %3 = vector.load %arg3[%c0, %c0_1] : memref<16x32xbf16, #tpu.memory_space<vmem>>, vector<16x32xbf16>
    %c0_2 = arith.constant 0 : index
    %c0_3 = arith.constant 0 : index
    %4 = vector.load %arg13[%c0_2, %c0_3] : memref<16x32xf32, #tpu.memory_space<vmem>>, vector<16x32xf32>
    %c0_4 = arith.constant 0 : index
    %c0_5 = arith.constant 0 : index
    %5 = vector.load %arg4[%c0_4, %c0_5] : memref<32x32xbf16, #tpu.memory_space<vmem>>, vector<32x32xbf16>
    %cst = arith.constant dense<0.000000e+00> : vector<16x32xf32>
    %6 = tpu.matmul %3, %5, %cst {dimension_numbers = #tpu.dot_dimension_numbers<[1], [0], [0], [1], [0, 0, 1, 1], [], []>} : vector<16x32xbf16>, vector<32x32xbf16>, vector<16x32xf32> -> vector<16x32xf32>
    %7 = arith.addf %4, %6 : vector<16x32xf32>
    %c0_6 = arith.constant 0 : index
    %c0_7 = arith.constant 0 : index
    %8 = vector.load %arg13[%c0_6, %c0_7] : memref<16x32xf32, #tpu.memory_space<vmem>>, vector<16x32xf32>
    tpu.vector_store %arg13[%c0_6, %c0_7], %7 {strides = array<i32>} : memref<16x32xf32, #tpu.memory_space<vmem>>, vector<16x32xf32>,
    %c0_8 = arith.constant 0 : index
    %c0_9 = arith.constant 0 : index
    %9 = vector.load %arg14[%c0_8, %c0_9] : memref<16x32xf32, #tpu.memory_space<vmem>>, vector<16x32xf32>
    %c0_10 = arith.constant 0 : index
    %c0_11 = arith.constant 0 : index
    %10 = vector.load %arg5[%c0_10, %c0_11] : memref<32x32xbf16, #tpu.memory_space<vmem>>, vector<32x32xbf16>
    %cst_12 = arith.constant dense<0.000000e+00> : vector<16x32xf32>
    %11 = tpu.matmul %3, %10, %cst_12 {dimension_numbers = #tpu.dot_dimension_numbers<[1], [0], [0], [1], [0, 0, 1, 1], [], []>} : vector<16x32xbf16>, vector<32x32xbf16>, vector<16x32xf32> -> vector<16x32xf32>
    %12 = arith.addf %9, %11 : vector<16x32xf32>
    %c0_13 = arith.constant 0 : index
    %c0_14 = arith.constant 0 : index
    %13 = vector.load %arg14[%c0_13, %c0_14] : memref<16x32xf32, #tpu.memory_space<vmem>>, vector<16x32xf32>
    tpu.vector_store %arg14[%c0_13, %c0_14], %12 {strides = array<i32>} : memref<16x32xf32, #tpu.memory_space<vmem>>, vector<16x32xf32>,
    %c0_15 = arith.constant 0 : index
    %c0_16 = arith.constant 0 : index
    %14 = vector.load %arg15[%c0_15, %c0_16] : memref<16x32xf32, #tpu.memory_space<vmem>>, vector<16x32xf32>
    %c0_17 = arith.constant 0 : index
    %c0_18 = arith.constant 0 : index
    %15 = vector.load %arg6[%c0_17, %c0_18] : memref<32x32xbf16, #tpu.memory_space<vmem>>, vector<32x32xbf16>
    %cst_19 = arith.constant dense<0.000000e+00> : vector<16x32xf32>
    %16 = tpu.matmul %3, %15, %cst_19 {dimension_numbers = #tpu.dot_dimension_numbers<[1], [0], [0], [1], [0, 0, 1, 1], [], []>} : vector<16x32xbf16>, vector<32x32xbf16>, vector<16x32xf32> -> vector<16x32xf32>
    %17 = arith.addf %14, %16 : vector<16x32xf32>
    %c0_20 = arith.constant 0 : index
    %c0_21 = arith.constant 0 : index
    %18 = vector.load %arg15[%c0_20, %c0_21] : memref<16x32xf32, #tpu.memory_space<vmem>>, vector<16x32xf32>
    tpu.vector_store %arg15[%c0_20, %c0_21], %17 {strides = array<i32>} : memref<16x32xf32, #tpu.memory_space<vmem>>, vector<16x32xf32>,
    %c0_i32_22 = arith.constant 0 : i32
    %19 = arith.cmpi eq, %arg2, %c0_i32_22 : i32
    %20 = arith.extui %19 : i1 to i32
    %c0_i32_23 = arith.constant 0 : i32
    %21 = arith.cmpi ne, %20, %c0_i32_23 : i32
    scf.if %21 {
      %c0_24 = arith.constant 0 : index
      %c0_25 = arith.constant 0 : index
      %22 = vector.load %arg13[%c0_24, %c0_25] : memref<16x32xf32, #tpu.memory_space<vmem>>, vector<16x32xf32>
      %c0_26 = arith.constant 0 : index
      %c0_27 = arith.constant 0 : index
      %23 = vector.load %arg7[%c0_26, %c0_27] : memref<1x32xf32, #tpu.memory_space<vmem>>, vector<1x32xf32>
      %24 = vector.broadcast %23 : vector<1x32xf32> to vector<16x32xf32>
      %25 = arith.addf %22, %24 : vector<16x32xf32>
      %26 = arith.truncf %25 : vector<16x32xf32> to vector<16x32xbf16>
      %c0_28 = arith.constant 0 : index
      %c0_29 = arith.constant 0 : index
      %27 = vector.load %arg10[%c0_28, %c0_29] : memref<16x32xbf16, #tpu.memory_space<vmem>>, vector<16x32xbf16>
      tpu.vector_store %arg10[%c0_28, %c0_29], %26 {strides = array<i32>} : memref<16x32xbf16, #tpu.memory_space<vmem>>, vector<16x32xbf16>,
      %c0_30 = arith.constant 0 : index
      %c0_31 = arith.constant 0 : index
      %28 = vector.load %arg14[%c0_30, %c0_31] : memref<16x32xf32, #tpu.memory_space<vmem>>, vector<16x32xf32>
      %c0_32 = arith.constant 0 : index
      %c0_33 = arith.constant 0 : index
      %29 = vector.load %arg8[%c0_32, %c0_33] : memref<1x32xf32, #tpu.memory_space<vmem>>, vector<1x32xf32>
      %30 = vector.broadcast %29 : vector<1x32xf32> to vector<16x32xf32>
      %31 = arith.addf %28, %30 : vector<16x32xf32>
      %32 = arith.truncf %31 : vector<16x32xf32> to vector<16x32xbf16>
      %c0_34 = arith.constant 0 : index
      %c0_35 = arith.constant 0 : index
      %33 = vector.load %arg11[%c0_34, %c0_35] : memref<16x32xbf16, #tpu.memory_space<vmem>>, vector<16x32xbf16>
      tpu.vector_store %arg11[%c0_34, %c0_35], %32 {strides = array<i32>} : memref<16x32xbf16, #tpu.memory_space<vmem>>, vector<16x32xbf16>,
      %c0_36 = arith.constant 0 : index
      %c0_37 = arith.constant 0 : index
      %34 = vector.load %arg15[%c0_36, %c0_37] : memref<16x32xf32, #tpu.memory_space<vmem>>, vector<16x32xf32>
      %c0_38 = arith.constant 0 : index
      %c0_39 = arith.constant 0 : index
      %35 = vector.load %arg9[%c0_38, %c0_39] : memref<1x32xf32, #tpu.memory_space<vmem>>, vector<1x32xf32>
      %36 = vector.broadcast %35 : vector<1x32xf32> to vector<16x32xf32>
      %37 = arith.addf %34, %36 : vector<16x32xf32>
      %38 = arith.truncf %37 : vector<16x32xf32> to vector<16x32xbf16>
      %c0_40 = arith.constant 0 : index
      %c0_41 = arith.constant 0 : index
      %39 = vector.load %arg12[%c0_40, %c0_41] : memref<16x32xbf16, #tpu.memory_space<vmem>>, vector<16x32xbf16>
      tpu.vector_store %arg12[%c0_40, %c0_41], %38 {strides = array<i32>} : memref<16x32xbf16, #tpu.memory_space<vmem>>, vector<16x32xbf16>,
    } else {
    }
    return
  }
  func.func @transform_0(%arg0: i32, %arg1: i32, %arg2: i32) -> (i32, i32) {
    %c0_i32 = arith.constant 0 : i32
    return %arg0, %arg2 : i32, i32
  }
  func.func @transform_1(%arg0: i32, %arg1: i32, %arg2: i32) -> (i32, i32) {
    %c0_i32 = arith.constant 0 : i32
    return %arg2, %arg1 : i32, i32
  }
  func.func @transform_2(%arg0: i32, %arg1: i32, %arg2: i32) -> (i32, i32) {
    %c0_i32 = arith.constant 0 : i32
    return %arg2, %arg1 : i32, i32
  }
  func.func @transform_3(%arg0: i32, %arg1: i32, %arg2: i32) -> (i32, i32) {
    %c0_i32 = arith.constant 0 : i32
    return %arg2, %arg1 : i32, i32
  }
  func.func @transform_4(%arg0: i32, %arg1: i32, %arg2: i32) -> (i32, i32) {
    %c0_i32 = arith.constant 0 : i32
    %c0_i32_0 = arith.constant 0 : i32
    return %c0_i32, %arg1 : i32, i32
  }
  func.func @transform_5(%arg0: i32, %arg1: i32, %arg2: i32) -> (i32, i32) {
    %c0_i32 = arith.constant 0 : i32
    %c0_i32_0 = arith.constant 0 : i32
    return %c0_i32, %arg1 : i32, i32
  }
  func.func @transform_6(%arg0: i32, %arg1: i32, %arg2: i32) -> (i32, i32) {
    %c0_i32 = arith.constant 0 : i32
    %c0_i32_0 = arith.constant 0 : i32
    return %c0_i32, %arg1 : i32, i32
  }
  func.func @transform_7(%arg0: i32, %arg1: i32, %arg2: i32) -> (i32, i32) {
    %c0_i32 = arith.constant 0 : i32
    return %arg0, %arg1 : i32, i32
  }
  func.func @transform_8(%arg0: i32, %arg1: i32, %arg2: i32) -> (i32, i32) {
    %c0_i32 = arith.constant 0 : i32
    return %arg0, %arg1 : i32, i32
  }
  func.func @transform_9(%arg0: i32, %arg1: i32, %arg2: i32) -> (i32, i32) {
    %c0_i32 = arith.constant 0 : i32
    return %arg0, %arg1 : i32, i32
  }
}

module attributes {stable_mosaic.version = 11 : i64} {
  func.func @_attention_kernel(%arg0: i32, %arg1: memref<1x8x32xbf16, #tpu.memory_space<vmem>>, %arg2: memref<1x8x32xbf16, #tpu.memory_space<vmem>>, %arg3: memref<1x8x32xbf16, #tpu.memory_space<vmem>>, %arg4: memref<1x8x32xbf16, #tpu.memory_space<vmem>>) attributes {dimension_semantics = [#tpu.dimension_semantics<parallel>], iteration_bounds = array<i64: 2>, scalar_prefetch = 0 : i64, scratch_operands = 0 : i64, tpu.core_type = #tpu.core_type<tc>, window_params = [{transform_indices = @transform_0, window_bounds = array<i64: 1, 8, 32>}, {transform_indices = @transform_1, window_bounds = array<i64: 1, 8, 32>}, {transform_indices = @transform_2, window_bounds = array<i64: 1, 8, 32>}, {transform_indices = @transform_3, window_bounds = array<i64: 1, 8, 32>}]} {
    %c0 = arith.constant 0 : index
    %c0_0 = arith.constant 0 : index
    %c0_1 = arith.constant 0 : index
    %0 = vector.load %arg1[%c0, %c0_0, %c0_1] : memref<1x8x32xbf16, #tpu.memory_space<vmem>>, vector<1x8x32xbf16>
    %1 = vector.shape_cast %0 : vector<1x8x32xbf16> to vector<8x32xbf16>
    %c0_2 = arith.constant 0 : index
    %c0_3 = arith.constant 0 : index
    %c0_4 = arith.constant 0 : index
    %2 = vector.load %arg2[%c0_2, %c0_3, %c0_4] : memref<1x8x32xbf16, #tpu.memory_space<vmem>>, vector<1x8x32xbf16>
    %3 = vector.shape_cast %2 : vector<1x8x32xbf16> to vector<8x32xbf16>
    %c0_5 = arith.constant 0 : index
    %c0_6 = arith.constant 0 : index
    %c0_7 = arith.constant 0 : index
    %4 = vector.load %arg3[%c0_5, %c0_6, %c0_7] : memref<1x8x32xbf16, #tpu.memory_space<vmem>>, vector<1x8x32xbf16>
    %5 = vector.shape_cast %4 : vector<1x8x32xbf16> to vector<8x32xbf16>
    %6 = vector.extract_strided_slice %1 {offsets = [0, 0], sizes = [8, 8], strides = [1, 1]} : vector<8x32xbf16> to vector<8x8xbf16>
    %cst = arith.constant 3.535160e-01 : bf16
    %7 = vector.broadcast %cst : bf16 to vector<8x8xbf16>
    %8 = arith.mulf %6, %7 : vector<8x8xbf16>
    %9 = vector.extract_strided_slice %3 {offsets = [0, 0], sizes = [8, 8], strides = [1, 1]} : vector<8x32xbf16> to vector<8x8xbf16>
    %cst_8 = arith.constant dense<0.000000e+00> : vector<8x8xf32>
    %10 = tpu.matmul %8, %9, %cst_8 {dimension_numbers = #tpu.dot_dimension_numbers<[1], [1], [0], [0], [0, 0, 1, 0], [], []>} : vector<8x8xbf16>, vector<8x8xbf16>, vector<8x8xf32> -> vector<8x8xf32>
    %cst_9 = arith.constant dense<0xFF800000> : vector<8xf32>
    %11 = vector.multi_reduction <maximumf>, %10, %cst_9 [1] : vector<8x8xf32> to vector<8xf32>
    %12 = vector.shape_cast %11 : vector<8xf32> to vector<8x1xf32>
    %13 = vector.broadcast %12 : vector<8x1xf32> to vector<8x8xf32>
    %14 = arith.subf %10, %13 : vector<8x8xf32>
    %15 = math.exp %14 : vector<8x8xf32>
    %cst_10 = arith.constant dense<0.000000e+00> : vector<8xf32>
    %16 = vector.multi_reduction <add>, %15, %cst_10 [1] : vector<8x8xf32> to vector<8xf32>
    %17 = vector.shape_cast %16 : vector<8xf32> to vector<8x1xf32>
    %18 = arith.truncf %15 : vector<8x8xf32> to vector<8x8xbf16>
    %19 = vector.extract_strided_slice %5 {offsets = [0, 0], sizes = [8, 8], strides = [1, 1]} : vector<8x32xbf16> to vector<8x8xbf16>
    %cst_11 = arith.constant dense<0.000000e+00> : vector<8x8xf32>
    %20 = tpu.matmul %18, %19, %cst_11 {dimension_numbers = #tpu.dot_dimension_numbers<[1], [0], [0], [1], [0, 0, 1, 1], [], []>} : vector<8x8xbf16>, vector<8x8xbf16>, vector<8x8xf32> -> vector<8x8xf32>
    %21 = tpu.reciprocal %17 {approx = true} : vector<8x1xf32> -> vector<8x1xf32>
    %22 = vector.broadcast %21 : vector<8x1xf32> to vector<8x8xf32>
    %23 = arith.mulf %20, %22 : vector<8x8xf32>
    %24 = arith.truncf %23 : vector<8x8xf32> to vector<8x8xbf16>
    %c0_12 = arith.constant 0 : index
    %c0_13 = arith.constant 0 : index
    %c0_14 = arith.constant 0 : index
    %25 = vector.load %arg4[%c0_12, %c0_13, %c0_14] : memref<1x8x32xbf16, #tpu.memory_space<vmem>>, vector<1x8x8xbf16>
    %26 = vector.shape_cast %25 : vector<1x8x8xbf16> to vector<8x8xbf16>
    %27 = vector.shape_cast %24 : vector<8x8xbf16> to vector<1x8x8xbf16>
    tpu.vector_store %arg4[%c0_12, %c0_13, %c0_14], %27 {strides = array<i32>} : memref<1x8x32xbf16, #tpu.memory_space<vmem>>, vector<1x8x8xbf16>,
    %28 = vector.extract_strided_slice %1 {offsets = [0, 8], sizes = [8, 8], strides = [1, 1]} : vector<8x32xbf16> to vector<8x8xbf16>
    %cst_15 = arith.constant 3.535160e-01 : bf16
    %29 = vector.broadcast %cst_15 : bf16 to vector<8x8xbf16>
    %30 = arith.mulf %28, %29 : vector<8x8xbf16>
    %31 = vector.extract_strided_slice %3 {offsets = [0, 8], sizes = [8, 8], strides = [1, 1]} : vector<8x32xbf16> to vector<8x8xbf16>
    %cst_16 = arith.constant dense<0.000000e+00> : vector<8x8xf32>
    %32 = tpu.matmul %30, %31, %cst_16 {dimension_numbers = #tpu.dot_dimension_numbers<[1], [1], [0], [0], [0, 0, 1, 0], [], []>} : vector<8x8xbf16>, vector<8x8xbf16>, vector<8x8xf32> -> vector<8x8xf32>
    %cst_17 = arith.constant dense<0xFF800000> : vector<8xf32>
    %33 = vector.multi_reduction <maximumf>, %32, %cst_17 [1] : vector<8x8xf32> to vector<8xf32>
    %34 = vector.shape_cast %33 : vector<8xf32> to vector<8x1xf32>
    %35 = vector.broadcast %34 : vector<8x1xf32> to vector<8x8xf32>
    %36 = arith.subf %32, %35 : vector<8x8xf32>
    %37 = math.exp %36 : vector<8x8xf32>
    %cst_18 = arith.constant dense<0.000000e+00> : vector<8xf32>
    %38 = vector.multi_reduction <add>, %37, %cst_18 [1] : vector<8x8xf32> to vector<8xf32>
    %39 = vector.shape_cast %38 : vector<8xf32> to vector<8x1xf32>
    %40 = arith.truncf %37 : vector<8x8xf32> to vector<8x8xbf16>
    %41 = vector.extract_strided_slice %5 {offsets = [0, 8], sizes = [8, 8], strides = [1, 1]} : vector<8x32xbf16> to vector<8x8xbf16>
    %cst_19 = arith.constant dense<0.000000e+00> : vector<8x8xf32>
    %42 = tpu.matmul %40, %41, %cst_19 {dimension_numbers = #tpu.dot_dimension_numbers<[1], [0], [0], [1], [0, 0, 1, 1], [], []>} : vector<8x8xbf16>, vector<8x8xbf16>, vector<8x8xf32> -> vector<8x8xf32>
    %43 = tpu.reciprocal %39 {approx = true} : vector<8x1xf32> -> vector<8x1xf32>
    %44 = vector.broadcast %43 : vector<8x1xf32> to vector<8x8xf32>
    %45 = arith.mulf %42, %44 : vector<8x8xf32>
    %46 = arith.truncf %45 : vector<8x8xf32> to vector<8x8xbf16>
    %c0_20 = arith.constant 0 : index
    %c0_21 = arith.constant 0 : index
    %c8 = arith.constant 8 : index
    %47 = vector.load %arg4[%c0_20, %c0_21, %c8] : memref<1x8x32xbf16, #tpu.memory_space<vmem>>, vector<1x8x8xbf16>
    %48 = vector.shape_cast %47 : vector<1x8x8xbf16> to vector<8x8xbf16>
    %49 = vector.shape_cast %46 : vector<8x8xbf16> to vector<1x8x8xbf16>
    tpu.vector_store %arg4[%c0_20, %c0_21, %c8], %49 {strides = array<i32>} : memref<1x8x32xbf16, #tpu.memory_space<vmem>>, vector<1x8x8xbf16>,
    %50 = vector.extract_strided_slice %1 {offsets = [0, 16], sizes = [8, 8], strides = [1, 1]} : vector<8x32xbf16> to vector<8x8xbf16>
    %cst_22 = arith.constant 3.535160e-01 : bf16
    %51 = vector.broadcast %cst_22 : bf16 to vector<8x8xbf16>
    %52 = arith.mulf %50, %51 : vector<8x8xbf16>
    %53 = vector.extract_strided_slice %3 {offsets = [0, 16], sizes = [8, 8], strides = [1, 1]} : vector<8x32xbf16> to vector<8x8xbf16>
    %cst_23 = arith.constant dense<0.000000e+00> : vector<8x8xf32>
    %54 = tpu.matmul %52, %53, %cst_23 {dimension_numbers = #tpu.dot_dimension_numbers<[1], [1], [0], [0], [0, 0, 1, 0], [], []>} : vector<8x8xbf16>, vector<8x8xbf16>, vector<8x8xf32> -> vector<8x8xf32>
    %cst_24 = arith.constant dense<0xFF800000> : vector<8xf32>
    %55 = vector.multi_reduction <maximumf>, %54, %cst_24 [1] : vector<8x8xf32> to vector<8xf32>
    %56 = vector.shape_cast %55 : vector<8xf32> to vector<8x1xf32>
    %57 = vector.broadcast %56 : vector<8x1xf32> to vector<8x8xf32>
    %58 = arith.subf %54, %57 : vector<8x8xf32>
    %59 = math.exp %58 : vector<8x8xf32>
    %cst_25 = arith.constant dense<0.000000e+00> : vector<8xf32>
    %60 = vector.multi_reduction <add>, %59, %cst_25 [1] : vector<8x8xf32> to vector<8xf32>
    %61 = vector.shape_cast %60 : vector<8xf32> to vector<8x1xf32>
    %62 = arith.truncf %59 : vector<8x8xf32> to vector<8x8xbf16>
    %63 = vector.extract_strided_slice %5 {offsets = [0, 16], sizes = [8, 8], strides = [1, 1]} : vector<8x32xbf16> to vector<8x8xbf16>
    %cst_26 = arith.constant dense<0.000000e+00> : vector<8x8xf32>
    %64 = tpu.matmul %62, %63, %cst_26 {dimension_numbers = #tpu.dot_dimension_numbers<[1], [0], [0], [1], [0, 0, 1, 1], [], []>} : vector<8x8xbf16>, vector<8x8xbf16>, vector<8x8xf32> -> vector<8x8xf32>
    %65 = tpu.reciprocal %61 {approx = true} : vector<8x1xf32> -> vector<8x1xf32>
    %66 = vector.broadcast %65 : vector<8x1xf32> to vector<8x8xf32>
    %67 = arith.mulf %64, %66 : vector<8x8xf32>
    %68 = arith.truncf %67 : vector<8x8xf32> to vector<8x8xbf16>
    %c0_27 = arith.constant 0 : index
    %c0_28 = arith.constant 0 : index
    %c16 = arith.constant 16 : index
    %69 = vector.load %arg4[%c0_27, %c0_28, %c16] : memref<1x8x32xbf16, #tpu.memory_space<vmem>>, vector<1x8x8xbf16>
    %70 = vector.shape_cast %69 : vector<1x8x8xbf16> to vector<8x8xbf16>
    %71 = vector.shape_cast %68 : vector<8x8xbf16> to vector<1x8x8xbf16>
    tpu.vector_store %arg4[%c0_27, %c0_28, %c16], %71 {strides = array<i32>} : memref<1x8x32xbf16, #tpu.memory_space<vmem>>, vector<1x8x8xbf16>,
    %72 = vector.extract_strided_slice %1 {offsets = [0, 24], sizes = [8, 8], strides = [1, 1]} : vector<8x32xbf16> to vector<8x8xbf16>
    %cst_29 = arith.constant 3.535160e-01 : bf16
    %73 = vector.broadcast %cst_29 : bf16 to vector<8x8xbf16>
    %74 = arith.mulf %72, %73 : vector<8x8xbf16>
    %75 = vector.extract_strided_slice %3 {offsets = [0, 24], sizes = [8, 8], strides = [1, 1]} : vector<8x32xbf16> to vector<8x8xbf16>
    %cst_30 = arith.constant dense<0.000000e+00> : vector<8x8xf32>
    %76 = tpu.matmul %74, %75, %cst_30 {dimension_numbers = #tpu.dot_dimension_numbers<[1], [1], [0], [0], [0, 0, 1, 0], [], []>} : vector<8x8xbf16>, vector<8x8xbf16>, vector<8x8xf32> -> vector<8x8xf32>
    %cst_31 = arith.constant dense<0xFF800000> : vector<8xf32>
    %77 = vector.multi_reduction <maximumf>, %76, %cst_31 [1] : vector<8x8xf32> to vector<8xf32>
    %78 = vector.shape_cast %77 : vector<8xf32> to vector<8x1xf32>
    %79 = vector.broadcast %78 : vector<8x1xf32> to vector<8x8xf32>
    %80 = arith.subf %76, %79 : vector<8x8xf32>
    %81 = math.exp %80 : vector<8x8xf32>
    %cst_32 = arith.constant dense<0.000000e+00> : vector<8xf32>
    %82 = vector.multi_reduction <add>, %81, %cst_32 [1] : vector<8x8xf32> to vector<8xf32>
    %83 = vector.shape_cast %82 : vector<8xf32> to vector<8x1xf32>
    %84 = arith.truncf %81 : vector<8x8xf32> to vector<8x8xbf16>
    %85 = vector.extract_strided_slice %5 {offsets = [0, 24], sizes = [8, 8], strides = [1, 1]} : vector<8x32xbf16> to vector<8x8xbf16>
    %cst_33 = arith.constant dense<0.000000e+00> : vector<8x8xf32>
    %86 = tpu.matmul %84, %85, %cst_33 {dimension_numbers = #tpu.dot_dimension_numbers<[1], [0], [0], [1], [0, 0, 1, 1], [], []>} : vector<8x8xbf16>, vector<8x8xbf16>, vector<8x8xf32> -> vector<8x8xf32>
    %87 = tpu.reciprocal %83 {approx = true} : vector<8x1xf32> -> vector<8x1xf32>
    %88 = vector.broadcast %87 : vector<8x1xf32> to vector<8x8xf32>
    %89 = arith.mulf %86, %88 : vector<8x8xf32>
    %90 = arith.truncf %89 : vector<8x8xf32> to vector<8x8xbf16>
    %c0_34 = arith.constant 0 : index
    %c0_35 = arith.constant 0 : index
    %c24 = arith.constant 24 : index
    %91 = vector.load %arg4[%c0_34, %c0_35, %c24] : memref<1x8x32xbf16, #tpu.memory_space<vmem>>, vector<1x8x8xbf16>
    %92 = vector.shape_cast %91 : vector<1x8x8xbf16> to vector<8x8xbf16>
    %93 = vector.shape_cast %90 : vector<8x8xbf16> to vector<1x8x8xbf16>
    tpu.vector_store %arg4[%c0_34, %c0_35, %c24], %93 {strides = array<i32>} : memref<1x8x32xbf16, #tpu.memory_space<vmem>>, vector<1x8x8xbf16>,
    return
  }
  func.func @transform_0(%arg0: i32) -> (i32, i32, i32) {
    %c0_i32 = arith.constant 0 : i32
    %c0_i32_0 = arith.constant 0 : i32
    %c0_i32_1 = arith.constant 0 : i32
    return %arg0, %c0_i32, %c0_i32_0 : i32, i32, i32
  }
  func.func @transform_1(%arg0: i32) -> (i32, i32, i32) {
    %c0_i32 = arith.constant 0 : i32
    %c0_i32_0 = arith.constant 0 : i32
    %c0_i32_1 = arith.constant 0 : i32
    return %arg0, %c0_i32, %c0_i32_0 : i32, i32, i32
  }
  func.func @transform_2(%arg0: i32) -> (i32, i32, i32) {
    %c0_i32 = arith.constant 0 : i32
    %c0_i32_0 = arith.constant 0 : i32
    %c0_i32_1 = arith.constant 0 : i32
    return %arg0, %c0_i32, %c0_i32_0 : i32, i32, i32
  }
  func.func @transform_3(%arg0: i32) -> (i32, i32, i32) {
    %c0_i32 = arith.constant 0 : i32
    %c0_i32_0 = arith.constant 0 : i32
    %c0_i32_1 = arith.constant 0 : i32
    return %arg0, %c0_i32, %c0_i32_0 : i32, i32, i32
  }
}

module attributes {stable_mosaic.version = 11 : i64} {
  func.func @_linear_add_ln_kernel(%arg0: i32, %arg1: i32, %arg2: memref<16x32xbf16, #tpu.memory_space<vmem>>, %arg3: memref<32x32xbf16, #tpu.memory_space<vmem>>, %arg4: memref<1x32xf32, #tpu.memory_space<vmem>>, %arg5: memref<16x32xbf16, #tpu.memory_space<vmem>>, %arg6: memref<1x32xf32, #tpu.memory_space<vmem>>, %arg7: memref<1x32xf32, #tpu.memory_space<vmem>>, %arg8: memref<16x32xbf16, #tpu.memory_space<vmem>>, %arg9: memref<16x32xf32, #tpu.memory_space<vmem>>) attributes {dimension_semantics = [#tpu.dimension_semantics<parallel>, #tpu.dimension_semantics<arbitrary>], iteration_bounds = array<i64: 1, 1>, scalar_prefetch = 0 : i64, scratch_operands = 1 : i64, tpu.core_type = #tpu.core_type<tc>, window_params = [{transform_indices = @transform_0, window_bounds = array<i64: 16, 32>}, {transform_indices = @transform_1, window_bounds = array<i64: 32, 32>}, {pipeline_mode = #tpu.pipeline_mode<synchronous>, transform_indices = @transform_2, window_bounds = array<i64: 1, 32>}, {transform_indices = @transform_3, window_bounds = array<i64: 16, 32>}, {pipeline_mode = #tpu.pipeline_mode<synchronous>, transform_indices = @transform_4, window_bounds = array<i64: 1, 32>}, {pipeline_mode = #tpu.pipeline_mode<synchronous>, transform_indices = @transform_5, window_bounds = array<i64: 1, 32>}, {transform_indices = @transform_6, window_bounds = array<i64: 16, 32>}]} {
    %c0_i32 = arith.constant 0 : i32
    %0 = arith.cmpi eq, %arg1, %c0_i32 : i32
    %1 = arith.extui %0 : i1 to i32
    %c0_i32_0 = arith.constant 0 : i32
    %2 = arith.cmpi ne, %1, %c0_i32_0 : i32
    scf.if %2 {
      %cst_10 = arith.constant 0.000000e+00 : f32
      %12 = vector.broadcast %cst_10 : f32 to vector<16x32xf32>
      %c0_11 = arith.constant 0 : index
      %c0_12 = arith.constant 0 : index
      %13 = vector.load %arg9[%c0_11, %c0_12] : memref<16x32xf32, #tpu.memory_space<vmem>>, vector<16x32xf32>
      tpu.vector_store %arg9[%c0_11, %c0_12], %12 {strides = array<i32>} : memref<16x32xf32, #tpu.memory_space<vmem>>, vector<16x32xf32>,
    } else {
    }
    %c0 = arith.constant 0 : index
    %c0_1 = arith.constant 0 : index
    %3 = vector.load %arg9[%c0, %c0_1] : memref<16x32xf32, #tpu.memory_space<vmem>>, vector<16x32xf32>
    %c0_2 = arith.constant 0 : index
    %c0_3 = arith.constant 0 : index
    %4 = vector.load %arg2[%c0_2, %c0_3] : memref<16x32xbf16, #tpu.memory_space<vmem>>, vector<16x32xbf16>
    %c0_4 = arith.constant 0 : index
    %c0_5 = arith.constant 0 : index
    %5 = vector.load %arg3[%c0_4, %c0_5] : memref<32x32xbf16, #tpu.memory_space<vmem>>, vector<32x32xbf16>
    %cst = arith.constant dense<0.000000e+00> : vector<16x32xf32>
    %6 = tpu.matmul %4, %5, %cst {dimension_numbers = #tpu.dot_dimension_numbers<[1], [0], [0], [1], [0, 0, 1, 1], [], []>} : vector<16x32xbf16>, vector<32x32xbf16>, vector<16x32xf32> -> vector<16x32xf32>
    %7 = arith.addf %3, %6 : vector<16x32xf32>
    %c0_6 = arith.constant 0 : index
    %c0_7 = arith.constant 0 : index
    %8 = vector.load %arg9[%c0_6, %c0_7] : memref<16x32xf32, #tpu.memory_space<vmem>>, vector<16x32xf32>
    tpu.vector_store %arg9[%c0_6, %c0_7], %7 {strides = array<i32>} : memref<16x32xf32, #tpu.memory_space<vmem>>, vector<16x32xf32>,
    %c0_i32_8 = arith.constant 0 : i32
    %9 = arith.cmpi eq, %arg1, %c0_i32_8 : i32
    %10 = arith.extui %9 : i1 to i32
    %c0_i32_9 = arith.constant 0 : i32
    %11 = arith.cmpi ne, %10, %c0_i32_9 : i32
    scf.if %11 {
      %c0_10 = arith.constant 0 : index
      %c0_11 = arith.constant 0 : index
      %12 = vector.load %arg9[%c0_10, %c0_11] : memref<16x32xf32, #tpu.memory_space<vmem>>, vector<16x32xf32>
      %c0_12 = arith.constant 0 : index
      %c0_13 = arith.constant 0 : index
      %13 = vector.load %arg4[%c0_12, %c0_13] : memref<1x32xf32, #tpu.memory_space<vmem>>, vector<1x32xf32>
      %14 = vector.broadcast %13 : vector<1x32xf32> to vector<16x32xf32>
      %15 = arith.addf %12, %14 : vector<16x32xf32>
      %c0_14 = arith.constant 0 : index
      %c0_15 = arith.constant 0 : index
      %16 = vector.load %arg5[%c0_14, %c0_15] : memref<16x32xbf16, #tpu.memory_space<vmem>>, vector<16x32xbf16>
      %17 = arith.extf %16 : vector<16x32xbf16> to vector<16x32xf32>
      %18 = arith.addf %15, %17 : vector<16x32xf32>
      %c0_16 = arith.constant 0 : index
      %c0_17 = arith.constant 0 : index
      %19 = vector.load %arg6[%c0_16, %c0_17] : memref<1x32xf32, #tpu.memory_space<vmem>>, vector<1x32xf32>
      %c0_18 = arith.constant 0 : index
      %c0_19 = arith.constant 0 : index
      %20 = vector.load %arg7[%c0_18, %c0_19] : memref<1x32xf32, #tpu.memory_space<vmem>>, vector<1x32xf32>
      %cst_20 = arith.constant dense<0.000000e+00> : vector<16xf32>
      %21 = vector.multi_reduction <add>, %18, %cst_20 [1] : vector<16x32xf32> to vector<16xf32>
      %22 = vector.shape_cast %21 : vector<16xf32> to vector<16x1xf32>
      %cst_21 = arith.constant 3.200000e+01 : f32
      %23 = vector.broadcast %cst_21 : f32 to vector<16x1xf32>
      %24 = arith.divf %22, %23 : vector<16x1xf32>
      %25 = vector.broadcast %24 : vector<16x1xf32> to vector<16x32xf32>
      %26 = arith.subf %18, %25 : vector<16x32xf32>
      %27 = arith.mulf %26, %26 : vector<16x32xf32>
      %cst_22 = arith.constant dense<0.000000e+00> : vector<16xf32>
      %28 = vector.multi_reduction <add>, %27, %cst_22 [1] : vector<16x32xf32> to vector<16xf32>
      %29 = vector.shape_cast %28 : vector<16xf32> to vector<16x1xf32>
      %cst_23 = arith.constant 3.200000e+01 : f32
      %30 = vector.broadcast %cst_23 : f32 to vector<16x1xf32>
      %31 = arith.divf %29, %30 : vector<16x1xf32>
      %32 = vector.broadcast %24 : vector<16x1xf32> to vector<16x32xf32>
      %33 = arith.subf %18, %32 : vector<16x32xf32>
      %cst_24 = arith.constant 9.99999974E-6 : f32
      %34 = vector.broadcast %cst_24 : f32 to vector<16x1xf32>
      %35 = arith.addf %31, %34 : vector<16x1xf32>
      %36 = math.rsqrt %35 : vector<16x1xf32>
      %37 = vector.broadcast %36 : vector<16x1xf32> to vector<16x32xf32>
      %38 = arith.mulf %33, %37 : vector<16x32xf32>
      %39 = vector.broadcast %19 : vector<1x32xf32> to vector<16x32xf32>
      %40 = arith.mulf %38, %39 : vector<16x32xf32>
      %41 = vector.broadcast %20 : vector<1x32xf32> to vector<16x32xf32>
      %42 = arith.addf %40, %41 : vector<16x32xf32>
      %43 = arith.truncf %42 : vector<16x32xf32> to vector<16x32xbf16>
      %c0_25 = arith.constant 0 : index
      %c0_26 = arith.constant 0 : index
      %44 = vector.load %arg8[%c0_25, %c0_26] : memref<16x32xbf16, #tpu.memory_space<vmem>>, vector<16x32xbf16>
      tpu.vector_store %arg8[%c0_25, %c0_26], %43 {strides = array<i32>} : memref<16x32xbf16, #tpu.memory_space<vmem>>, vector<16x32xbf16>,
    } else {
    }
    return
  }
  func.func @transform_0(%arg0: i32, %arg1: i32) -> (i32, i32) {
    %c0_i32 = arith.constant 0 : i32
    return %arg0, %arg1 : i32, i32
  }
  func.func @transform_1(%arg0: i32, %arg1: i32) -> (i32, i32) {
    %c0_i32 = arith.constant 0 : i32
    %c0_i32_0 = arith.constant 0 : i32
    return %arg1, %c0_i32 : i32, i32
  }
  func.func @transform_2(%arg0: i32, %arg1: i32) -> (i32, i32) {
    %c0_i32 = arith.constant 0 : i32
    %c0_i32_0 = arith.constant 0 : i32
    %c0_i32_1 = arith.constant 0 : i32
    return %c0_i32, %c0_i32_0 : i32, i32
  }
  func.func @transform_3(%arg0: i32, %arg1: i32) -> (i32, i32) {
    %c0_i32 = arith.constant 0 : i32
    %c0_i32_0 = arith.constant 0 : i32
    return %arg0, %c0_i32 : i32, i32
  }
  func.func @transform_4(%arg0: i32, %arg1: i32) -> (i32, i32) {
    %c0_i32 = arith.constant 0 : i32
    %c0_i32_0 = arith.constant 0 : i32
    %c0_i32_1 = arith.constant 0 : i32
    return %c0_i32, %c0_i32_0 : i32, i32
  }
  func.func @transform_5(%arg0: i32, %arg1: i32) -> (i32, i32) {
    %c0_i32 = arith.constant 0 : i32
    %c0_i32_0 = arith.constant 0 : i32
    %c0_i32_1 = arith.constant 0 : i32
    return %c0_i32, %c0_i32_0 : i32, i32
  }
  func.func @transform_6(%arg0: i32, %arg1: i32) -> (i32, i32) {
    %c0_i32 = arith.constant 0 : i32
    %c0_i32_0 = arith.constant 0 : i32
    return %arg0, %c0_i32 : i32, i32
  }
}

module attributes {stable_mosaic.version = 11 : i64} {
  func.func @_linear_gelu_kernel(%arg0: i32, %arg1: i32, %arg2: i32, %arg3: memref<16x32xbf16, #tpu.memory_space<vmem>>, %arg4: memref<32x512xbf16, #tpu.memory_space<vmem>>, %arg5: memref<1x512xf32, #tpu.memory_space<vmem>>, %arg6: memref<16x512xbf16, #tpu.memory_space<vmem>>, %arg7: memref<16x512xf32, #tpu.memory_space<vmem>>) attributes {dimension_semantics = [#tpu.dimension_semantics<parallel>, #tpu.dimension_semantics<parallel>, #tpu.dimension_semantics<arbitrary>], iteration_bounds = array<i64: 1, 4, 1>, scalar_prefetch = 0 : i64, scratch_operands = 1 : i64, tpu.core_type = #tpu.core_type<tc>, window_params = [{transform_indices = @transform_0, window_bounds = array<i64: 16, 32>}, {transform_indices = @transform_1, window_bounds = array<i64: 32, 512>}, {transform_indices = @transform_2, window_bounds = array<i64: 1, 512>}, {transform_indices = @transform_3, window_bounds = array<i64: 16, 512>}]} {
    %c0_i32 = arith.constant 0 : i32
    %0 = arith.cmpi eq, %arg2, %c0_i32 : i32
    %1 = arith.extui %0 : i1 to i32
    %c0_i32_0 = arith.constant 0 : i32
    %2 = arith.cmpi ne, %1, %c0_i32_0 : i32
    scf.if %2 {
      %cst_10 = arith.constant 0.000000e+00 : f32
      %12 = vector.broadcast %cst_10 : f32 to vector<16x512xf32>
      %c0_11 = arith.constant 0 : index
      %c0_12 = arith.constant 0 : index
      %13 = vector.load %arg7[%c0_11, %c0_12] : memref<16x512xf32, #tpu.memory_space<vmem>>, vector<16x512xf32>
      tpu.vector_store %arg7[%c0_11, %c0_12], %12 {strides = array<i32>} : memref<16x512xf32, #tpu.memory_space<vmem>>, vector<16x512xf32>,
    } else {
    }
    %c0 = arith.constant 0 : index
    %c0_1 = arith.constant 0 : index
    %3 = vector.load %arg7[%c0, %c0_1] : memref<16x512xf32, #tpu.memory_space<vmem>>, vector<16x512xf32>
    %c0_2 = arith.constant 0 : index
    %c0_3 = arith.constant 0 : index
    %4 = vector.load %arg3[%c0_2, %c0_3] : memref<16x32xbf16, #tpu.memory_space<vmem>>, vector<16x32xbf16>
    %c0_4 = arith.constant 0 : index
    %c0_5 = arith.constant 0 : index
    %5 = vector.load %arg4[%c0_4, %c0_5] : memref<32x512xbf16, #tpu.memory_space<vmem>>, vector<32x512xbf16>
    %cst = arith.constant dense<0.000000e+00> : vector<16x512xf32>
    %6 = tpu.matmul %4, %5, %cst {dimension_numbers = #tpu.dot_dimension_numbers<[1], [0], [0], [1], [0, 0, 1, 1], [], []>} : vector<16x32xbf16>, vector<32x512xbf16>, vector<16x512xf32> -> vector<16x512xf32>
    %7 = arith.addf %3, %6 : vector<16x512xf32>
    %c0_6 = arith.constant 0 : index
    %c0_7 = arith.constant 0 : index
    %8 = vector.load %arg7[%c0_6, %c0_7] : memref<16x512xf32, #tpu.memory_space<vmem>>, vector<16x512xf32>
    tpu.vector_store %arg7[%c0_6, %c0_7], %7 {strides = array<i32>} : memref<16x512xf32, #tpu.memory_space<vmem>>, vector<16x512xf32>,
    %c0_i32_8 = arith.constant 0 : i32
    %9 = arith.cmpi eq, %arg2, %c0_i32_8 : i32
    %10 = arith.extui %9 : i1 to i32
    %c0_i32_9 = arith.constant 0 : i32
    %11 = arith.cmpi ne, %10, %c0_i32_9 : i32
    scf.if %11 {
      %c0_10 = arith.constant 0 : index
      %c0_11 = arith.constant 0 : index
      %12 = vector.load %arg7[%c0_10, %c0_11] : memref<16x512xf32, #tpu.memory_space<vmem>>, vector<16x512xf32>
      %c0_12 = arith.constant 0 : index
      %c0_13 = arith.constant 0 : index
      %13 = vector.load %arg5[%c0_12, %c0_13] : memref<1x512xf32, #tpu.memory_space<vmem>>, vector<1x512xf32>
      %14 = vector.broadcast %13 : vector<1x512xf32> to vector<16x512xf32>
      %15 = arith.addf %12, %14 : vector<16x512xf32>
      %cst_14 = arith.constant 5.000000e-01 : f32
      %16 = vector.broadcast %cst_14 : f32 to vector<16x512xf32>
      %17 = arith.mulf %16, %15 : vector<16x512xf32>
      %cst_15 = arith.constant 0.707106769 : f32
      %18 = vector.broadcast %cst_15 : f32 to vector<16x512xf32>
      %19 = arith.mulf %15, %18 : vector<16x512xf32>
      %cst_16 = arith.constant 0.000000e+00 : f32
      %20 = vector.broadcast %cst_16 : f32 to vector<16x512xf32>
      %21 = arith.cmpf olt, %19, %20 : vector<16x512xf32>
      %cst_17 = arith.constant -1.000000e+00 : f32
      %cst_18 = arith.constant 1.000000e+00 : f32
      %22 = vector.broadcast %cst_17 : f32 to vector<16x512xf32>
      %23 = vector.broadcast %cst_18 : f32 to vector<16x512xf32>
      %24 = arith.select %21, %22, %23 : vector<16x512xi1>, vector<16x512xf32>
      %25 = math.absf %19 : vector<16x512xf32>
      %cst_19 = arith.constant 0.327591091 : f32
      %26 = vector.broadcast %cst_19 : f32 to vector<16x512xf32>
      %27 = arith.mulf %26, %25 : vector<16x512xf32>
      %cst_20 = arith.constant 1.000000e+00 : f32
      %28 = vector.broadcast %cst_20 : f32 to vector<16x512xf32>
      %29 = arith.addf %28, %27 : vector<16x512xf32>
      %cst_21 = arith.constant 1.000000e+00 : f32
      %30 = vector.broadcast %cst_21 : f32 to vector<16x512xf32>
      %31 = arith.divf %30, %29 : vector<16x512xf32>
      %cst_22 = arith.constant 1.06140542 : f32
      %32 = vector.broadcast %cst_22 : f32 to vector<16x512xf32>
      %33 = arith.mulf %32, %31 : vector<16x512xf32>
      %cst_23 = arith.constant 1.45315206 : f32
      %34 = vector.broadcast %cst_23 : f32 to vector<16x512xf32>
      %35 = arith.subf %33, %34 : vector<16x512xf32>
      %36 = arith.mulf %35, %31 : vector<16x512xf32>
      %cst_24 = arith.constant 1.42141378 : f32
      %37 = vector.broadcast %cst_24 : f32 to vector<16x512xf32>
      %38 = arith.addf %36, %37 : vector<16x512xf32>
      %39 = arith.mulf %38, %31 : vector<16x512xf32>
      %cst_25 = arith.constant 0.284496725 : f32
      %40 = vector.broadcast %cst_25 : f32 to vector<16x512xf32>
      %41 = arith.subf %39, %40 : vector<16x512xf32>
      %42 = arith.mulf %41, %31 : vector<16x512xf32>
      %cst_26 = arith.constant 0.254829586 : f32
      %43 = vector.broadcast %cst_26 : f32 to vector<16x512xf32>
      %44 = arith.addf %42, %43 : vector<16x512xf32>
      %45 = arith.mulf %44, %31 : vector<16x512xf32>
      %cst_27 = arith.constant 0.000000e+00 : f32
      %46 = vector.broadcast %cst_27 : f32 to vector<16x512xf32>
      %47 = arith.subf %46, %25 : vector<16x512xf32>
      %48 = arith.mulf %47, %25 : vector<16x512xf32>
      %49 = math.exp %48 : vector<16x512xf32>
      %50 = arith.mulf %45, %49 : vector<16x512xf32>
      %cst_28 = arith.constant 1.000000e+00 : f32
      %51 = vector.broadcast %cst_28 : f32 to vector<16x512xf32>
      %52 = arith.subf %51, %50 : vector<16x512xf32>
      %53 = arith.mulf %24, %52 : vector<16x512xf32>
      %cst_29 = arith.constant 1.000000e+00 : f32
      %54 = vector.broadcast %cst_29 : f32 to vector<16x512xf32>
      %55 = arith.addf %54, %53 : vector<16x512xf32>
      %56 = arith.mulf %17, %55 : vector<16x512xf32>
      %57 = arith.truncf %56 : vector<16x512xf32> to vector<16x512xbf16>
      %c0_30 = arith.constant 0 : index
      %c0_31 = arith.constant 0 : index
      %58 = vector.load %arg6[%c0_30, %c0_31] : memref<16x512xbf16, #tpu.memory_space<vmem>>, vector<16x512xbf16>
      tpu.vector_store %arg6[%c0_30, %c0_31], %57 {strides = array<i32>} : memref<16x512xbf16, #tpu.memory_space<vmem>>, vector<16x512xbf16>,
    } else {
    }
    return
  }
  func.func @transform_0(%arg0: i32, %arg1: i32, %arg2: i32) -> (i32, i32) {
    %c0_i32 = arith.constant 0 : i32
    return %arg0, %arg2 : i32, i32
  }
  func.func @transform_1(%arg0: i32, %arg1: i32, %arg2: i32) -> (i32, i32) {
    %c0_i32 = arith.constant 0 : i32
    return %arg2, %arg1 : i32, i32
  }
  func.func @transform_2(%arg0: i32, %arg1: i32, %arg2: i32) -> (i32, i32) {
    %c0_i32 = arith.constant 0 : i32
    %c0_i32_0 = arith.constant 0 : i32
    return %c0_i32, %arg1 : i32, i32
  }
  func.func @transform_3(%arg0: i32, %arg1: i32, %arg2: i32) -> (i32, i32) {
    %c0_i32 = arith.constant 0 : i32
    return %arg0, %arg1 : i32, i32
  }
}

module attributes {stable_mosaic.version = 11 : i64} {
  func.func @_linear_add_ln_kernel(%arg0: i32, %arg1: i32, %arg2: memref<16x512xbf16, #tpu.memory_space<vmem>>, %arg3: memref<512x32xbf16, #tpu.memory_space<vmem>>, %arg4: memref<1x32xf32, #tpu.memory_space<vmem>>, %arg5: memref<16x32xbf16, #tpu.memory_space<vmem>>, %arg6: memref<1x32xf32, #tpu.memory_space<vmem>>, %arg7: memref<1x32xf32, #tpu.memory_space<vmem>>, %arg8: memref<16x32xbf16, #tpu.memory_space<vmem>>, %arg9: memref<16x32xf32, #tpu.memory_space<vmem>>) attributes {dimension_semantics = [#tpu.dimension_semantics<parallel>, #tpu.dimension_semantics<arbitrary>], iteration_bounds = array<i64: 1, 4>, scalar_prefetch = 0 : i64, scratch_operands = 1 : i64, tpu.core_type = #tpu.core_type<tc>, window_params = [{transform_indices = @transform_0, window_bounds = array<i64: 16, 512>}, {transform_indices = @transform_1, window_bounds = array<i64: 512, 32>}, {pipeline_mode = #tpu.pipeline_mode<synchronous>, transform_indices = @transform_2, window_bounds = array<i64: 1, 32>}, {transform_indices = @transform_3, window_bounds = array<i64: 16, 32>}, {pipeline_mode = #tpu.pipeline_mode<synchronous>, transform_indices = @transform_4, window_bounds = array<i64: 1, 32>}, {pipeline_mode = #tpu.pipeline_mode<synchronous>, transform_indices = @transform_5, window_bounds = array<i64: 1, 32>}, {transform_indices = @transform_6, window_bounds = array<i64: 16, 32>}]} {
    %c0_i32 = arith.constant 0 : i32
    %0 = arith.cmpi eq, %arg1, %c0_i32 : i32
    %1 = arith.extui %0 : i1 to i32
    %c0_i32_0 = arith.constant 0 : i32
    %2 = arith.cmpi ne, %1, %c0_i32_0 : i32
    scf.if %2 {
      %cst_9 = arith.constant 0.000000e+00 : f32
      %12 = vector.broadcast %cst_9 : f32 to vector<16x32xf32>
      %c0_10 = arith.constant 0 : index
      %c0_11 = arith.constant 0 : index
      %13 = vector.load %arg9[%c0_10, %c0_11] : memref<16x32xf32, #tpu.memory_space<vmem>>, vector<16x32xf32>
      tpu.vector_store %arg9[%c0_10, %c0_11], %12 {strides = array<i32>} : memref<16x32xf32, #tpu.memory_space<vmem>>, vector<16x32xf32>,
    } else {
    }
    %c0 = arith.constant 0 : index
    %c0_1 = arith.constant 0 : index
    %3 = vector.load %arg9[%c0, %c0_1] : memref<16x32xf32, #tpu.memory_space<vmem>>, vector<16x32xf32>
    %c0_2 = arith.constant 0 : index
    %c0_3 = arith.constant 0 : index
    %4 = vector.load %arg2[%c0_2, %c0_3] : memref<16x512xbf16, #tpu.memory_space<vmem>>, vector<16x512xbf16>
    %c0_4 = arith.constant 0 : index
    %c0_5 = arith.constant 0 : index
    %5 = vector.load %arg3[%c0_4, %c0_5] : memref<512x32xbf16, #tpu.memory_space<vmem>>, vector<512x32xbf16>
    %cst = arith.constant dense<0.000000e+00> : vector<16x32xf32>
    %6 = tpu.matmul %4, %5, %cst {dimension_numbers = #tpu.dot_dimension_numbers<[1], [0], [0], [1], [0, 0, 1, 1], [], []>} : vector<16x512xbf16>, vector<512x32xbf16>, vector<16x32xf32> -> vector<16x32xf32>
    %7 = arith.addf %3, %6 : vector<16x32xf32>
    %c0_6 = arith.constant 0 : index
    %c0_7 = arith.constant 0 : index
    %8 = vector.load %arg9[%c0_6, %c0_7] : memref<16x32xf32, #tpu.memory_space<vmem>>, vector<16x32xf32>
    tpu.vector_store %arg9[%c0_6, %c0_7], %7 {strides = array<i32>} : memref<16x32xf32, #tpu.memory_space<vmem>>, vector<16x32xf32>,
    %c3_i32 = arith.constant 3 : i32
    %9 = arith.cmpi eq, %arg1, %c3_i32 : i32
    %10 = arith.extui %9 : i1 to i32
    %c0_i32_8 = arith.constant 0 : i32
    %11 = arith.cmpi ne, %10, %c0_i32_8 : i32
    scf.if %11 {
      %c0_9 = arith.constant 0 : index
      %c0_10 = arith.constant 0 : index
      %12 = vector.load %arg9[%c0_9, %c0_10] : memref<16x32xf32, #tpu.memory_space<vmem>>, vector<16x32xf32>
      %c0_11 = arith.constant 0 : index
      %c0_12 = arith.constant 0 : index
      %13 = vector.load %arg4[%c0_11, %c0_12] : memref<1x32xf32, #tpu.memory_space<vmem>>, vector<1x32xf32>
      %14 = vector.broadcast %13 : vector<1x32xf32> to vector<16x32xf32>
      %15 = arith.addf %12, %14 : vector<16x32xf32>
      %c0_13 = arith.constant 0 : index
      %c0_14 = arith.constant 0 : index
      %16 = vector.load %arg5[%c0_13, %c0_14] : memref<16x32xbf16, #tpu.memory_space<vmem>>, vector<16x32xbf16>
      %17 = arith.extf %16 : vector<16x32xbf16> to vector<16x32xf32>
      %18 = arith.addf %15, %17 : vector<16x32xf32>
      %c0_15 = arith.constant 0 : index
      %c0_16 = arith.constant 0 : index
      %19 = vector.load %arg6[%c0_15, %c0_16] : memref<1x32xf32, #tpu.memory_space<vmem>>, vector<1x32xf32>
      %c0_17 = arith.constant 0 : index
      %c0_18 = arith.constant 0 : index
      %20 = vector.load %arg7[%c0_17, %c0_18] : memref<1x32xf32, #tpu.memory_space<vmem>>, vector<1x32xf32>
      %cst_19 = arith.constant dense<0.000000e+00> : vector<16xf32>
      %21 = vector.multi_reduction <add>, %18, %cst_19 [1] : vector<16x32xf32> to vector<16xf32>
      %22 = vector.shape_cast %21 : vector<16xf32> to vector<16x1xf32>
      %cst_20 = arith.constant 3.200000e+01 : f32
      %23 = vector.broadcast %cst_20 : f32 to vector<16x1xf32>
      %24 = arith.divf %22, %23 : vector<16x1xf32>
      %25 = vector.broadcast %24 : vector<16x1xf32> to vector<16x32xf32>
      %26 = arith.subf %18, %25 : vector<16x32xf32>
      %27 = arith.mulf %26, %26 : vector<16x32xf32>
      %cst_21 = arith.constant dense<0.000000e+00> : vector<16xf32>
      %28 = vector.multi_reduction <add>, %27, %cst_21 [1] : vector<16x32xf32> to vector<16xf32>
      %29 = vector.shape_cast %28 : vector<16xf32> to vector<16x1xf32>
      %cst_22 = arith.constant 3.200000e+01 : f32
      %30 = vector.broadcast %cst_22 : f32 to vector<16x1xf32>
      %31 = arith.divf %29, %30 : vector<16x1xf32>
      %32 = vector.broadcast %24 : vector<16x1xf32> to vector<16x32xf32>
      %33 = arith.subf %18, %32 : vector<16x32xf32>
      %cst_23 = arith.constant 9.99999974E-6 : f32
      %34 = vector.broadcast %cst_23 : f32 to vector<16x1xf32>
      %35 = arith.addf %31, %34 : vector<16x1xf32>
      %36 = math.rsqrt %35 : vector<16x1xf32>
      %37 = vector.broadcast %36 : vector<16x1xf32> to vector<16x32xf32>
      %38 = arith.mulf %33, %37 : vector<16x32xf32>
      %39 = vector.broadcast %19 : vector<1x32xf32> to vector<16x32xf32>
      %40 = arith.mulf %38, %39 : vector<16x32xf32>
      %41 = vector.broadcast %20 : vector<1x32xf32> to vector<16x32xf32>
      %42 = arith.addf %40, %41 : vector<16x32xf32>
      %43 = arith.truncf %42 : vector<16x32xf32> to vector<16x32xbf16>
      %c0_24 = arith.constant 0 : index
      %c0_25 = arith.constant 0 : index
      %44 = vector.load %arg8[%c0_24, %c0_25] : memref<16x32xbf16, #tpu.memory_space<vmem>>, vector<16x32xbf16>
      tpu.vector_store %arg8[%c0_24, %c0_25], %43 {strides = array<i32>} : memref<16x32xbf16, #tpu.memory_space<vmem>>, vector<16x32xbf16>,
    } else {
    }
    return
  }
  func.func @transform_0(%arg0: i32, %arg1: i32) -> (i32, i32) {
    %c0_i32 = arith.constant 0 : i32
    return %arg0, %arg1 : i32, i32
  }
  func.func @transform_1(%arg0: i32, %arg1: i32) -> (i32, i32) {
    %c0_i32 = arith.constant 0 : i32
    %c0_i32_0 = arith.constant 0 : i32
    return %arg1, %c0_i32 : i32, i32
  }
  func.func @transform_2(%arg0: i32, %arg1: i32) -> (i32, i32) {
    %c0_i32 = arith.constant 0 : i32
    %c0_i32_0 = arith.constant 0 : i32
    %c0_i32_1 = arith.constant 0 : i32
    return %c0_i32, %c0_i32_0 : i32, i32
  }
  func.func @transform_3(%arg0: i32, %arg1: i32) -> (i32, i32) {
    %c0_i32 = arith.constant 0 : i32
    %c0_i32_0 = arith.constant 0 : i32
    return %arg0, %c0_i32 : i32, i32
  }
  func.func @transform_4(%arg0: i32, %arg1: i32) -> (i32, i32) {
    %c0_i32 = arith.constant 0 : i32
    %c0_i32_0 = arith.constant 0 : i32
    %c0_i32_1 = arith.constant 0 : i32
    return %c0_i32, %c0_i32_0 : i32, i32
  }
  func.func @transform_5(%arg0: i32, %arg1: i32) -> (i32, i32) {
    %c0_i32 = arith.constant 0 : i32
    %c0_i32_0 = arith.constant 0 : i32
    %c0_i32_1 = arith.constant 0 : i32
    return %c0_i32, %c0_i32_0 : i32, i32
  }
  func.func @transform_6(%arg0: i32, %arg1: i32) -> (i32, i32) {
    %c0_i32 = arith.constant 0 : i32
    %c0_i32_0 = arith.constant 0 : i32
    return %arg0, %c0_i32 : i32, i32
  }
}

module attributes {stable_mosaic.version = 11 : i64} {
  func.func @_final_ln_fuse_kernel(%arg0: i32, %arg1: memref<16x32xbf16, #tpu.memory_space<vmem>>, %arg2: memref<16x8xf32, #tpu.memory_space<vmem>>, %arg3: memref<1x32xf32, #tpu.memory_space<vmem>>, %arg4: memref<1x32xf32, #tpu.memory_space<vmem>>, %arg5: memref<16x32xf32, #tpu.memory_space<vmem>>) attributes {dimension_semantics = [#tpu.dimension_semantics<parallel>], iteration_bounds = array<i64: 1>, scalar_prefetch = 0 : i64, scratch_operands = 0 : i64, tpu.core_type = #tpu.core_type<tc>, window_params = [{transform_indices = @transform_0, window_bounds = array<i64: 16, 32>}, {transform_indices = @transform_1, window_bounds = array<i64: 16, 8>}, {pipeline_mode = #tpu.pipeline_mode<synchronous>, transform_indices = @transform_2, window_bounds = array<i64: 1, 32>}, {pipeline_mode = #tpu.pipeline_mode<synchronous>, transform_indices = @transform_3, window_bounds = array<i64: 1, 32>}, {transform_indices = @transform_4, window_bounds = array<i64: 16, 32>}]} {
    %c0 = arith.constant 0 : index
    %c0_0 = arith.constant 0 : index
    %0 = vector.load %arg1[%c0, %c0_0] : memref<16x32xbf16, #tpu.memory_space<vmem>>, vector<16x32xbf16>
    %1 = arith.extf %0 : vector<16x32xbf16> to vector<16x32xf32>
    %c0_1 = arith.constant 0 : index
    %c0_2 = arith.constant 0 : index
    %2 = vector.load %arg3[%c0_1, %c0_2] : memref<1x32xf32, #tpu.memory_space<vmem>>, vector<1x32xf32>
    %c0_3 = arith.constant 0 : index
    %c0_4 = arith.constant 0 : index
    %3 = vector.load %arg4[%c0_3, %c0_4] : memref<1x32xf32, #tpu.memory_space<vmem>>, vector<1x32xf32>
    %cst = arith.constant dense<0.000000e+00> : vector<16xf32>
    %4 = vector.multi_reduction <add>, %1, %cst [1] : vector<16x32xf32> to vector<16xf32>
    %5 = vector.shape_cast %4 : vector<16xf32> to vector<16x1xf32>
    %cst_5 = arith.constant 3.200000e+01 : f32
    %6 = vector.broadcast %cst_5 : f32 to vector<16x1xf32>
    %7 = arith.divf %5, %6 : vector<16x1xf32>
    %8 = vector.broadcast %7 : vector<16x1xf32> to vector<16x32xf32>
    %9 = arith.subf %1, %8 : vector<16x32xf32>
    %10 = arith.mulf %9, %9 : vector<16x32xf32>
    %cst_6 = arith.constant dense<0.000000e+00> : vector<16xf32>
    %11 = vector.multi_reduction <add>, %10, %cst_6 [1] : vector<16x32xf32> to vector<16xf32>
    %12 = vector.shape_cast %11 : vector<16xf32> to vector<16x1xf32>
    %cst_7 = arith.constant 3.200000e+01 : f32
    %13 = vector.broadcast %cst_7 : f32 to vector<16x1xf32>
    %14 = arith.divf %12, %13 : vector<16x1xf32>
    %15 = vector.broadcast %7 : vector<16x1xf32> to vector<16x32xf32>
    %16 = arith.subf %1, %15 : vector<16x32xf32>
    %cst_8 = arith.constant 9.99999974E-6 : f32
    %17 = vector.broadcast %cst_8 : f32 to vector<16x1xf32>
    %18 = arith.addf %14, %17 : vector<16x1xf32>
    %19 = math.rsqrt %18 : vector<16x1xf32>
    %20 = vector.broadcast %19 : vector<16x1xf32> to vector<16x32xf32>
    %21 = arith.mulf %16, %20 : vector<16x32xf32>
    %22 = vector.broadcast %2 : vector<1x32xf32> to vector<16x32xf32>
    %23 = arith.mulf %21, %22 : vector<16x32xf32>
    %24 = vector.broadcast %3 : vector<1x32xf32> to vector<16x32xf32>
    %25 = arith.addf %23, %24 : vector<16x32xf32>
    %c0_9 = arith.constant 0 : index
    %c0_10 = arith.constant 0 : index
    %26 = vector.load %arg2[%c0_9, %c0_10] : memref<16x8xf32, #tpu.memory_space<vmem>>, vector<16x8xf32>
    %cst_11 = arith.constant 0.512497425 : f32
    %27 = vector.broadcast %cst_11 : f32 to vector<16x8xf32>
    %28 = arith.mulf %26, %27 : vector<16x8xf32>
    %29 = vector.extract_strided_slice %25 {offsets = [0, 0], sizes = [16, 8], strides = [1, 1]} : vector<16x32xf32> to vector<16x8xf32>
    %30 = arith.addf %29, %28 : vector<16x8xf32>
    %c0_12 = arith.constant 0 : index
    %c0_13 = arith.constant 0 : index
    %31 = vector.load %arg5[%c0_12, %c0_13] : memref<16x32xf32, #tpu.memory_space<vmem>>, vector<16x8xf32>
    tpu.vector_store %arg5[%c0_12, %c0_13], %30 {strides = array<i32>} : memref<16x32xf32, #tpu.memory_space<vmem>>, vector<16x8xf32>,
    %32 = vector.extract_strided_slice %25 {offsets = [0, 8], sizes = [16, 8], strides = [1, 1]} : vector<16x32xf32> to vector<16x8xf32>
    %33 = arith.addf %32, %28 : vector<16x8xf32>
    %c0_14 = arith.constant 0 : index
    %c8 = arith.constant 8 : index
    %34 = vector.load %arg5[%c0_14, %c8] : memref<16x32xf32, #tpu.memory_space<vmem>>, vector<16x8xf32>
    tpu.vector_store %arg5[%c0_14, %c8], %33 {strides = array<i32>} : memref<16x32xf32, #tpu.memory_space<vmem>>, vector<16x8xf32>,
    %35 = vector.extract_strided_slice %25 {offsets = [0, 16], sizes = [16, 8], strides = [1, 1]} : vector<16x32xf32> to vector<16x8xf32>
    %36 = arith.addf %35, %28 : vector<16x8xf32>
    %c0_15 = arith.constant 0 : index
    %c16 = arith.constant 16 : index
    %37 = vector.load %arg5[%c0_15, %c16] : memref<16x32xf32, #tpu.memory_space<vmem>>, vector<16x8xf32>
    tpu.vector_store %arg5[%c0_15, %c16], %36 {strides = array<i32>} : memref<16x32xf32, #tpu.memory_space<vmem>>, vector<16x8xf32>,
    %38 = vector.extract_strided_slice %25 {offsets = [0, 24], sizes = [16, 8], strides = [1, 1]} : vector<16x32xf32> to vector<16x8xf32>
    %39 = arith.addf %38, %28 : vector<16x8xf32>
    %c0_16 = arith.constant 0 : index
    %c24 = arith.constant 24 : index
    %40 = vector.load %arg5[%c0_16, %c24] : memref<16x32xf32, #tpu.memory_space<vmem>>, vector<16x8xf32>
    tpu.vector_store %arg5[%c0_16, %c24], %39 {strides = array<i32>} : memref<16x32xf32, #tpu.memory_space<vmem>>, vector<16x8xf32>,
    return
  }
  func.func @transform_0(%arg0: i32) -> (i32, i32) {
    %c0_i32 = arith.constant 0 : i32
    %c0_i32_0 = arith.constant 0 : i32
    return %arg0, %c0_i32 : i32, i32
  }
  func.func @transform_1(%arg0: i32) -> (i32, i32) {
    %c0_i32 = arith.constant 0 : i32
    %c0_i32_0 = arith.constant 0 : i32
    return %arg0, %c0_i32 : i32, i32
  }
  func.func @transform_2(%arg0: i32) -> (i32, i32) {
    %c0_i32 = arith.constant 0 : i32
    %c0_i32_0 = arith.constant 0 : i32
    %c0_i32_1 = arith.constant 0 : i32
    return %c0_i32, %c0_i32_0 : i32, i32
  }
  func.func @transform_3(%arg0: i32) -> (i32, i32) {
    %c0_i32 = arith.constant 0 : i32
    %c0_i32_0 = arith.constant 0 : i32
    %c0_i32_1 = arith.constant 0 : i32
    return %c0_i32, %c0_i32_0 : i32, i32
  }
  func.func @transform_4(%arg0: i32) -> (i32, i32) {
    %c0_i32 = arith.constant 0 : i32
    %c0_i32_0 = arith.constant 0 : i32
    return %arg0, %c0_i32 : i32, i32
  }
}

module attributes {stable_mosaic.version = 11 : i64} {
  func.func @_multiscale_kernel(%arg0: i32, %arg1: memref<1x8x32xf32, #tpu.memory_space<vmem>>, %arg2: memref<7x32x8xf32, #tpu.memory_space<vmem>>, %arg3: memref<1x8xf32, #tpu.memory_space<vmem>>, %arg4: memref<1x8xf32, #tpu.memory_space<vmem>>, %arg5: memref<1x8xf32, #tpu.memory_space<vmem>>, %arg6: memref<1x8x8xf32, #tpu.memory_space<vmem>>) attributes {dimension_semantics = [#tpu.dimension_semantics<parallel>], iteration_bounds = array<i64: 2>, scalar_prefetch = 0 : i64, scratch_operands = 0 : i64, tpu.core_type = #tpu.core_type<tc>, window_params = [{transform_indices = @transform_0, window_bounds = array<i64: 1, 8, 32>}, {pipeline_mode = #tpu.pipeline_mode<synchronous>, transform_indices = @transform_1, window_bounds = array<i64: 7, 32, 8>}, {pipeline_mode = #tpu.pipeline_mode<synchronous>, transform_indices = @transform_2, window_bounds = array<i64: 1, 8>}, {pipeline_mode = #tpu.pipeline_mode<synchronous>, transform_indices = @transform_3, window_bounds = array<i64: 1, 8>}, {pipeline_mode = #tpu.pipeline_mode<synchronous>, transform_indices = @transform_4, window_bounds = array<i64: 1, 8>}, {transform_indices = @transform_5, window_bounds = array<i64: 1, 8, 8>}]} {
    %c0 = arith.constant 0 : index
    %c0_0 = arith.constant 0 : index
    %c0_1 = arith.constant 0 : index
    %0 = vector.load %arg1[%c0, %c0_0, %c0_1] : memref<1x8x32xf32, #tpu.memory_space<vmem>>, vector<1x8x32xf32>
    %1 = vector.shape_cast %0 : vector<1x8x32xf32> to vector<8x32xf32>
    %2 = tpu.iota {dimensions = array<i32: 0>} : vector<8x32xi32>
    %c3 = arith.constant 3 : index
    %c0_2 = arith.constant 0 : index
    %c0_3 = arith.constant 0 : index
    %3 = vector.load %arg2[%c3, %c0_2, %c0_3] : memref<7x32x8xf32, #tpu.memory_space<vmem>>, vector<1x32x8xf32>
    %4 = vector.shape_cast %3 : vector<1x32x8xf32> to vector<32x8xf32>
    %cst = arith.constant dense<0.000000e+00> : vector<8x8xf32>
    %5 = tpu.matmul %1, %4, %cst {dimension_numbers = #tpu.dot_dimension_numbers<[1], [0], [0], [1], [0, 0, 1, 1], [], []>} : vector<8x32xf32>, vector<32x8xf32>, vector<8x8xf32> -> vector<8x8xf32>
    %c3_i32 = arith.constant 3 : i32
    %6 = tpu.dynamic_rotate %1 by %c3_i32 dim 0 : vector<8x32xf32>, i32 -> vector<8x32xf32>
    %c-3_i32 = arith.constant -3 : i32
    %7 = vector.broadcast %c-3_i32 : i32 to vector<8x32xi32>
    %8 = arith.addi %2, %7 : vector<8x32xi32>
    %c0_i32 = arith.constant 0 : i32
    %9 = vector.broadcast %c0_i32 : i32 to vector<8x32xi32>
    %10 = arith.cmpi sge, %8, %9 : vector<8x32xi32>
    %c-3_i32_4 = arith.constant -3 : i32
    %11 = vector.broadcast %c-3_i32_4 : i32 to vector<8x32xi32>
    %12 = arith.addi %2, %11 : vector<8x32xi32>
    %c8_i32 = arith.constant 8 : i32
    %13 = vector.broadcast %c8_i32 : i32 to vector<8x32xi32>
    %14 = arith.cmpi slt, %12, %13 : vector<8x32xi32>
    %15 = arith.andi %10, %14 : vector<8x32xi1>
    %cst_5 = arith.constant 0.000000e+00 : f32
    %16 = vector.broadcast %cst_5 : f32 to vector<8x32xf32>
    %17 = arith.select %15, %6, %16 : vector<8x32xi1>, vector<8x32xf32>
    %c0_6 = arith.constant 0 : index
    %c0_7 = arith.constant 0 : index
    %c0_8 = arith.constant 0 : index
    %18 = vector.load %arg2[%c0_6, %c0_7, %c0_8] : memref<7x32x8xf32, #tpu.memory_space<vmem>>, vector<1x32x8xf32>
    %19 = vector.shape_cast %18 : vector<1x32x8xf32> to vector<32x8xf32>
    %cst_9 = arith.constant dense<0.000000e+00> : vector<8x8xf32>
    %20 = tpu.matmul %17, %19, %cst_9 {dimension_numbers = #tpu.dot_dimension_numbers<[1], [0], [0], [1], [0, 0, 1, 1], [], []>} : vector<8x32xf32>, vector<32x8xf32>, vector<8x8xf32> -> vector<8x8xf32>
    %21 = arith.addf %5, %20 : vector<8x8xf32>
    %c2_i32 = arith.constant 2 : i32
    %22 = tpu.dynamic_rotate %1 by %c2_i32 dim 0 : vector<8x32xf32>, i32 -> vector<8x32xf32>
    %c-2_i32 = arith.constant -2 : i32
    %23 = vector.broadcast %c-2_i32 : i32 to vector<8x32xi32>
    %24 = arith.addi %2, %23 : vector<8x32xi32>
    %c0_i32_10 = arith.constant 0 : i32
    %25 = vector.broadcast %c0_i32_10 : i32 to vector<8x32xi32>
    %26 = arith.cmpi sge, %24, %25 : vector<8x32xi32>
    %c-2_i32_11 = arith.constant -2 : i32
    %27 = vector.broadcast %c-2_i32_11 : i32 to vector<8x32xi32>
    %28 = arith.addi %2, %27 : vector<8x32xi32>
    %c8_i32_12 = arith.constant 8 : i32
    %29 = vector.broadcast %c8_i32_12 : i32 to vector<8x32xi32>
    %30 = arith.cmpi slt, %28, %29 : vector<8x32xi32>
    %31 = arith.andi %26, %30 : vector<8x32xi1>
    %cst_13 = arith.constant 0.000000e+00 : f32
    %32 = vector.broadcast %cst_13 : f32 to vector<8x32xf32>
    %33 = arith.select %31, %22, %32 : vector<8x32xi1>, vector<8x32xf32>
    %c1 = arith.constant 1 : index
    %c0_14 = arith.constant 0 : index
    %c0_15 = arith.constant 0 : index
    %34 = vector.load %arg2[%c1, %c0_14, %c0_15] : memref<7x32x8xf32, #tpu.memory_space<vmem>>, vector<1x32x8xf32>
    %35 = vector.shape_cast %34 : vector<1x32x8xf32> to vector<32x8xf32>
    %cst_16 = arith.constant dense<0.000000e+00> : vector<8x8xf32>
    %36 = tpu.matmul %33, %35, %cst_16 {dimension_numbers = #tpu.dot_dimension_numbers<[1], [0], [0], [1], [0, 0, 1, 1], [], []>} : vector<8x32xf32>, vector<32x8xf32>, vector<8x8xf32> -> vector<8x8xf32>
    %37 = arith.addf %21, %36 : vector<8x8xf32>
    %c1_i32 = arith.constant 1 : i32
    %38 = tpu.dynamic_rotate %1 by %c1_i32 dim 0 : vector<8x32xf32>, i32 -> vector<8x32xf32>
    %c-1_i32 = arith.constant -1 : i32
    %39 = vector.broadcast %c-1_i32 : i32 to vector<8x32xi32>
    %40 = arith.addi %2, %39 : vector<8x32xi32>
    %c0_i32_17 = arith.constant 0 : i32
    %41 = vector.broadcast %c0_i32_17 : i32 to vector<8x32xi32>
    %42 = arith.cmpi sge, %40, %41 : vector<8x32xi32>
    %c-1_i32_18 = arith.constant -1 : i32
    %43 = vector.broadcast %c-1_i32_18 : i32 to vector<8x32xi32>
    %44 = arith.addi %2, %43 : vector<8x32xi32>
    %c8_i32_19 = arith.constant 8 : i32
    %45 = vector.broadcast %c8_i32_19 : i32 to vector<8x32xi32>
    %46 = arith.cmpi slt, %44, %45 : vector<8x32xi32>
    %47 = arith.andi %42, %46 : vector<8x32xi1>
    %cst_20 = arith.constant 0.000000e+00 : f32
    %48 = vector.broadcast %cst_20 : f32 to vector<8x32xf32>
    %49 = arith.select %47, %38, %48 : vector<8x32xi1>, vector<8x32xf32>
    %c2 = arith.constant 2 : index
    %c0_21 = arith.constant 0 : index
    %c0_22 = arith.constant 0 : index
    %50 = vector.load %arg2[%c2, %c0_21, %c0_22] : memref<7x32x8xf32, #tpu.memory_space<vmem>>, vector<1x32x8xf32>
    %51 = vector.shape_cast %50 : vector<1x32x8xf32> to vector<32x8xf32>
    %cst_23 = arith.constant dense<0.000000e+00> : vector<8x8xf32>
    %52 = tpu.matmul %49, %51, %cst_23 {dimension_numbers = #tpu.dot_dimension_numbers<[1], [0], [0], [1], [0, 0, 1, 1], [], []>} : vector<8x32xf32>, vector<32x8xf32>, vector<8x8xf32> -> vector<8x8xf32>
    %53 = arith.addf %37, %52 : vector<8x8xf32>
    %c7_i32 = arith.constant 7 : i32
    %54 = tpu.dynamic_rotate %1 by %c7_i32 dim 0 : vector<8x32xf32>, i32 -> vector<8x32xf32>
    %c1_i32_24 = arith.constant 1 : i32
    %55 = vector.broadcast %c1_i32_24 : i32 to vector<8x32xi32>
    %56 = arith.addi %2, %55 : vector<8x32xi32>
    %c0_i32_25 = arith.constant 0 : i32
    %57 = vector.broadcast %c0_i32_25 : i32 to vector<8x32xi32>
    %58 = arith.cmpi sge, %56, %57 : vector<8x32xi32>
    %c1_i32_26 = arith.constant 1 : i32
    %59 = vector.broadcast %c1_i32_26 : i32 to vector<8x32xi32>
    %60 = arith.addi %2, %59 : vector<8x32xi32>
    %c8_i32_27 = arith.constant 8 : i32
    %61 = vector.broadcast %c8_i32_27 : i32 to vector<8x32xi32>
    %62 = arith.cmpi slt, %60, %61 : vector<8x32xi32>
    %63 = arith.andi %58, %62 : vector<8x32xi1>
    %cst_28 = arith.constant 0.000000e+00 : f32
    %64 = vector.broadcast %cst_28 : f32 to vector<8x32xf32>
    %65 = arith.select %63, %54, %64 : vector<8x32xi1>, vector<8x32xf32>
    %c4 = arith.constant 4 : index
    %c0_29 = arith.constant 0 : index
    %c0_30 = arith.constant 0 : index
    %66 = vector.load %arg2[%c4, %c0_29, %c0_30] : memref<7x32x8xf32, #tpu.memory_space<vmem>>, vector<1x32x8xf32>
    %67 = vector.shape_cast %66 : vector<1x32x8xf32> to vector<32x8xf32>
    %cst_31 = arith.constant dense<0.000000e+00> : vector<8x8xf32>
    %68 = tpu.matmul %65, %67, %cst_31 {dimension_numbers = #tpu.dot_dimension_numbers<[1], [0], [0], [1], [0, 0, 1, 1], [], []>} : vector<8x32xf32>, vector<32x8xf32>, vector<8x8xf32> -> vector<8x8xf32>
    %69 = arith.addf %53, %68 : vector<8x8xf32>
    %c6_i32 = arith.constant 6 : i32
    %70 = tpu.dynamic_rotate %1 by %c6_i32 dim 0 : vector<8x32xf32>, i32 -> vector<8x32xf32>
    %c2_i32_32 = arith.constant 2 : i32
    %71 = vector.broadcast %c2_i32_32 : i32 to vector<8x32xi32>
    %72 = arith.addi %2, %71 : vector<8x32xi32>
    %c0_i32_33 = arith.constant 0 : i32
    %73 = vector.broadcast %c0_i32_33 : i32 to vector<8x32xi32>
    %74 = arith.cmpi sge, %72, %73 : vector<8x32xi32>
    %c2_i32_34 = arith.constant 2 : i32
    %75 = vector.broadcast %c2_i32_34 : i32 to vector<8x32xi32>
    %76 = arith.addi %2, %75 : vector<8x32xi32>
    %c8_i32_35 = arith.constant 8 : i32
    %77 = vector.broadcast %c8_i32_35 : i32 to vector<8x32xi32>
    %78 = arith.cmpi slt, %76, %77 : vector<8x32xi32>
    %79 = arith.andi %74, %78 : vector<8x32xi1>
    %cst_36 = arith.constant 0.000000e+00 : f32
    %80 = vector.broadcast %cst_36 : f32 to vector<8x32xf32>
    %81 = arith.select %79, %70, %80 : vector<8x32xi1>, vector<8x32xf32>
    %c5 = arith.constant 5 : index
    %c0_37 = arith.constant 0 : index
    %c0_38 = arith.constant 0 : index
    %82 = vector.load %arg2[%c5, %c0_37, %c0_38] : memref<7x32x8xf32, #tpu.memory_space<vmem>>, vector<1x32x8xf32>
    %83 = vector.shape_cast %82 : vector<1x32x8xf32> to vector<32x8xf32>
    %cst_39 = arith.constant dense<0.000000e+00> : vector<8x8xf32>
    %84 = tpu.matmul %81, %83, %cst_39 {dimension_numbers = #tpu.dot_dimension_numbers<[1], [0], [0], [1], [0, 0, 1, 1], [], []>} : vector<8x32xf32>, vector<32x8xf32>, vector<8x8xf32> -> vector<8x8xf32>
    %85 = arith.addf %69, %84 : vector<8x8xf32>
    %c5_i32 = arith.constant 5 : i32
    %86 = tpu.dynamic_rotate %1 by %c5_i32 dim 0 : vector<8x32xf32>, i32 -> vector<8x32xf32>
    %c3_i32_40 = arith.constant 3 : i32
    %87 = vector.broadcast %c3_i32_40 : i32 to vector<8x32xi32>
    %88 = arith.addi %2, %87 : vector<8x32xi32>
    %c0_i32_41 = arith.constant 0 : i32
    %89 = vector.broadcast %c0_i32_41 : i32 to vector<8x32xi32>
    %90 = arith.cmpi sge, %88, %89 : vector<8x32xi32>
    %c3_i32_42 = arith.constant 3 : i32
    %91 = vector.broadcast %c3_i32_42 : i32 to vector<8x32xi32>
    %92 = arith.addi %2, %91 : vector<8x32xi32>
    %c8_i32_43 = arith.constant 8 : i32
    %93 = vector.broadcast %c8_i32_43 : i32 to vector<8x32xi32>
    %94 = arith.cmpi slt, %92, %93 : vector<8x32xi32>
    %95 = arith.andi %90, %94 : vector<8x32xi1>
    %cst_44 = arith.constant 0.000000e+00 : f32
    %96 = vector.broadcast %cst_44 : f32 to vector<8x32xf32>
    %97 = arith.select %95, %86, %96 : vector<8x32xi1>, vector<8x32xf32>
    %c6 = arith.constant 6 : index
    %c0_45 = arith.constant 0 : index
    %c0_46 = arith.constant 0 : index
    %98 = vector.load %arg2[%c6, %c0_45, %c0_46] : memref<7x32x8xf32, #tpu.memory_space<vmem>>, vector<1x32x8xf32>
    %99 = vector.shape_cast %98 : vector<1x32x8xf32> to vector<32x8xf32>
    %cst_47 = arith.constant dense<0.000000e+00> : vector<8x8xf32>
    %100 = tpu.matmul %97, %99, %cst_47 {dimension_numbers = #tpu.dot_dimension_numbers<[1], [0], [0], [1], [0, 0, 1, 1], [], []>} : vector<8x32xf32>, vector<32x8xf32>, vector<8x8xf32> -> vector<8x8xf32>
    %101 = arith.addf %85, %100 : vector<8x8xf32>
    %c0_48 = arith.constant 0 : index
    %c0_49 = arith.constant 0 : index
    %102 = vector.load %arg3[%c0_48, %c0_49] : memref<1x8xf32, #tpu.memory_space<vmem>>, vector<1x8xf32>
    %103 = vector.broadcast %102 : vector<1x8xf32> to vector<8x8xf32>
    %104 = arith.addf %101, %103 : vector<8x8xf32>
    %c0_50 = arith.constant 0 : index
    %c0_51 = arith.constant 0 : index
    %105 = vector.load %arg4[%c0_50, %c0_51] : memref<1x8xf32, #tpu.memory_space<vmem>>, vector<1x8xf32>
    %c0_52 = arith.constant 0 : index
    %c0_53 = arith.constant 0 : index
    %106 = vector.load %arg5[%c0_52, %c0_53] : memref<1x8xf32, #tpu.memory_space<vmem>>, vector<1x8xf32>
    %cst_54 = arith.constant dense<0.000000e+00> : vector<8xf32>
    %107 = vector.multi_reduction <add>, %104, %cst_54 [1] : vector<8x8xf32> to vector<8xf32>
    %108 = vector.shape_cast %107 : vector<8xf32> to vector<8x1xf32>
    %cst_55 = arith.constant 8.000000e+00 : f32
    %109 = vector.broadcast %cst_55 : f32 to vector<8x1xf32>
    %110 = arith.divf %108, %109 : vector<8x1xf32>
    %111 = vector.broadcast %110 : vector<8x1xf32> to vector<8x8xf32>
    %112 = arith.subf %104, %111 : vector<8x8xf32>
    %113 = arith.mulf %112, %112 : vector<8x8xf32>
    %cst_56 = arith.constant dense<0.000000e+00> : vector<8xf32>
    %114 = vector.multi_reduction <add>, %113, %cst_56 [1] : vector<8x8xf32> to vector<8xf32>
    %115 = vector.shape_cast %114 : vector<8xf32> to vector<8x1xf32>
    %cst_57 = arith.constant 8.000000e+00 : f32
    %116 = vector.broadcast %cst_57 : f32 to vector<8x1xf32>
    %117 = arith.divf %115, %116 : vector<8x1xf32>
    %118 = vector.broadcast %110 : vector<8x1xf32> to vector<8x8xf32>
    %119 = arith.subf %104, %118 : vector<8x8xf32>
    %cst_58 = arith.constant 9.99999974E-6 : f32
    %120 = vector.broadcast %cst_58 : f32 to vector<8x1xf32>
    %121 = arith.addf %117, %120 : vector<8x1xf32>
    %122 = math.rsqrt %121 : vector<8x1xf32>
    %123 = vector.broadcast %122 : vector<8x1xf32> to vector<8x8xf32>
    %124 = arith.mulf %119, %123 : vector<8x8xf32>
    %125 = vector.broadcast %105 : vector<1x8xf32> to vector<8x8xf32>
    %126 = arith.mulf %124, %125 : vector<8x8xf32>
    %127 = vector.broadcast %106 : vector<1x8xf32> to vector<8x8xf32>
    %128 = arith.addf %126, %127 : vector<8x8xf32>
    %c0_59 = arith.constant 0 : index
    %c0_60 = arith.constant 0 : index
    %c0_61 = arith.constant 0 : index
    %129 = vector.load %arg6[%c0_59, %c0_60, %c0_61] : memref<1x8x8xf32, #tpu.memory_space<vmem>>, vector<1x8x8xf32>
    %130 = vector.shape_cast %129 : vector<1x8x8xf32> to vector<8x8xf32>
    %131 = vector.shape_cast %128 : vector<8x8xf32> to vector<1x8x8xf32>
    tpu.vector_store %arg6[%c0_59, %c0_60, %c0_61], %131 {strides = array<i32>} : memref<1x8x8xf32, #tpu.memory_space<vmem>>, vector<1x8x8xf32>,
    return
  }
  func.func @transform_0(%arg0: i32) -> (i32, i32, i32) {
    %c0_i32 = arith.constant 0 : i32
    %c0_i32_0 = arith.constant 0 : i32
    %c0_i32_1 = arith.constant 0 : i32
    return %arg0, %c0_i32, %c0_i32_0 : i32, i32, i32
  }
  func.func @transform_1(%arg0: i32) -> (i32, i32, i32) {
    %c0_i32 = arith.constant 0 : i32
    %c0_i32_0 = arith.constant 0 : i32
    %c0_i32_1 = arith.constant 0 : i32
    %c0_i32_2 = arith.constant 0 : i32
    return %c0_i32, %c0_i32_0, %c0_i32_1 : i32, i32, i32
  }
  func.func @transform_2(%arg0: i32) -> (i32, i32) {
    %c0_i32 = arith.constant 0 : i32
    %c0_i32_0 = arith.constant 0 : i32
    %c0_i32_1 = arith.constant 0 : i32
    return %c0_i32, %c0_i32_0 : i32, i32
  }
  func.func @transform_3(%arg0: i32) -> (i32, i32) {
    %c0_i32 = arith.constant 0 : i32
    %c0_i32_0 = arith.constant 0 : i32
    %c0_i32_1 = arith.constant 0 : i32
    return %c0_i32, %c0_i32_0 : i32, i32
  }
  func.func @transform_4(%arg0: i32) -> (i32, i32) {
    %c0_i32 = arith.constant 0 : i32
    %c0_i32_0 = arith.constant 0 : i32
    %c0_i32_1 = arith.constant 0 : i32
    return %c0_i32, %c0_i32_0 : i32, i32
  }
  func.func @transform_5(%arg0: i32) -> (i32, i32, i32) {
    %c0_i32 = arith.constant 0 : i32
    %c0_i32_0 = arith.constant 0 : i32
    %c0_i32_1 = arith.constant 0 : i32
    return %arg0, %c0_i32, %c0_i32_0 : i32, i32, i32
  }
}

</mosaic_0001>

<bundles_post_ra>
// kernel: _lambda_.12
= control target key start
LH: loop header
LB: loop body
LE: loop exit
PB: predicated region body
PF: predicated region fallthrough
CT: control target
= control target key end

     0   :  { %vm34_vm0 = vcmask 261120   ;;  %v387_v0 = vmov 0.0   ;;  %vm388_vm1 = vmmov 0   ;;  %vm263_vm2 = vcmask 257024   ;;  %s511_s1 = inlined_call_operand.vmem [shape: bf16[32,32], index: 1, kind: input, shape index: {}]   ;;  %s512_s2 = inlined_call_operand.vmem [shape: bf16[32,32], index: 2, kind: input, shape index: {}]   ;;  %s513_s0 = inlined_call_operand.vmem [shape: bf16[16,32], index: 0, kind: input, shape index: {}]   ;;  %s514_s3 = inlined_call_operand.vmem [shape: bf16[32,32], index: 3, kind: input, shape index: {}]   ;;  %s515_s4 = inlined_call_operand.vmem [shape: f32[1,32], index: 4, kind: input, shape index: {}, may-alias: {4,5,6}]   ;;  %s516_s5 = inlined_call_operand.vmem [shape: f32[1,32], index: 5, kind: input, shape index: {}, may-alias: {4,5,6}]   ;;  %s517_s7 = inlined_call_operand.vmem [shape: bf16[16,32], index: 7, kind: output, shape index: {0}]   ;;  %s518_s6 = inlined_call_operand.vmem [shape: f32[1,32], index: 6, kind: input, shape index: {}, may-alias: {4,5,6}]   ;;  %s519_s8 = inlined_call_operand.vmem [shape: bf16[16,32], index: 8, kind: output, shape index: {1}]   ;;  %s520_s9 = inlined_call_operand.vmem [shape: bf16[16,32], index: 9, kind: output, shape index: {2}]  }
   0x1   :  { %354 = vmatprep.subr.bf16.mxu0 %v387_v0  ;;  %v380_v1 = vld [vmem:[%s511_s1] sm:$0xff]   ;;  %362 = vmatprep.subr.bf16.mxu1 %v387_v0  ;;  %35 = vst.msk [vmem:[#allocation2] sm:$0xff] %vm34_vm0, %v387_v0  ;;  %36 = vst.msk [vmem:[#allocation2 + $0x8] sm:$0xff] %vm34_vm0, %v387_v0  ;;  %v381_v2 = vld [vmem:[%s511_s1 + $0x8] sm:$0xff]  }
   0x2   :  { %37 = vst.msk [vmem:[#allocation3] sm:$0xff] %vm34_vm0, %v387_v0  ;;  %38 = vst.msk [vmem:[#allocation3 + $0x8] sm:$0xff] %vm34_vm0, %v387_v0  ;;  %358 = vmatprep.mubr.msk.bf16.mxu0 %vm388_vm1, %v387_v0  ;;  %366 = vmatprep.mubr.msk.bf16.mxu1 %vm388_vm1, %v387_v0  ;;  %v382_v3 = vld [vmem:[%s512_s2] sm:$0xff]   ;;  %v385_v5 = vld [vmem:[%s512_s2 + $0x8] sm:$0xff]  }
   0x3   :  { %39 = vst.msk [vmem:[#allocation4] sm:$0xff] %vm34_vm0, %v387_v0  ;;  %40 = vst.msk [vmem:[#allocation4 + $0x8] sm:$0xff] %vm34_vm0, %v387_v0  ;;  %355 = vmatpush3.bf16.msra.mxu0 %v380_v1  ;;  %363 = vmatpush3.bf16.msra.mxu1 %v382_v3  ;;  %v383_v4 = vld [vmem:[%s513_s0] sm:$0xff]   ;;  %v386_v7 = vld [vmem:[%s514_s3 + $0x8] sm:$0xff]  }
   0x4   :  { %356 = vmatprep.subr.bf16.mxu0 %v387_v0  ;;  %364 = vmatprep.subr.bf16.mxu1 %v387_v0  ;;  %v384_v6 = vld [vmem:[%s514_s3] sm:$0xff]  }
   0x5   :  { %v330_v25 = vld [vmem:[%s515_s4] ss:$0 sm:$0xff] }
   0x6   :  { %v333_v31 = vld [vmem:[%s516_s5] ss:$0 sm:$0xff] }
   0x7   :  { %357 = vmatpush3.bf16.msra.mxu0 %v381_v2  ;;  %365 = vmatpush3.bf16.msra.mxu1 %v385_v5  ;;  %v336_v45 = vld [vmem:[%s518_s6] ss:$0 sm:$0xff] }
   0x8   :  { %370 = vmatprep.subr.bf16.mxu0 %v387_v0  ;;  %v43_v8 = vld [vmem:[#allocation2] sm:$0xff]  ;;  %v44_v10 = vld [vmem:[#allocation2 + $0x8] sm:$0xff] }
   0x9   :  { %v115_v11 = vld [vmem:[#allocation3] sm:$0xff]  ;;  %v116_v16 = vld [vmem:[#allocation3 + $0x8] sm:$0xff] }
   0xa   :  { %359 = vmatmul.mubr.msk.bf16.vlgmr.msra.gmra.mrb[0].mxu0 %vm34_vm0, %v383_v4  ;;  %367 = vmatmul.mubr.msk.bf16.vlgmr.msra.gmra.mrb[0].mxu1 %vm34_vm0, %v383_v4  ;;  %v178_v24 = vld [vmem:[#allocation4] sm:$0xff]  ;;  %v179_v27 = vld [vmem:[#allocation4 + $0x8] sm:$0xff] }
   0xb   :  { %371 = vmatpush3.bf16.msra.mxu0 %v384_v6  ;;  %374 = vmatprep.mubr.msk.bf16.mxu0 %vm388_vm1, %v387_v0 }
   0xc   :  { %372 = vmatprep.subr.bf16.mxu0 %v387_v0 }
   0xf   :  { %373 = vmatpush3.bf16.msra.mxu0 %v386_v7 }
  0x12   :  { %375 = vmatmul.mubr.msk.bf16.vlgmr.msra.gmra.mrb[4].mxu0 %vm34_vm0, %v383_v4 }
  0xdd   :  { %v104_v9 = vpop.f32.mrb[0].mxu0  ;;  %v167_v15 = vpop.f32.mrb[0].mxu1 }
  0xde   :  { %v111_v12 = vadd.f32 %v104_v9, %v43_v8  ;;  %v360_v13 = vpop.f32.mrb[1].mxu0  ;;  %v174_v19 = vadd.f32 %v167_v15, %v115_v11  ;;  %v368_v20 = vpop.f32.mrb[1].mxu1 }
  0xdf   :  { %v107_v14 = vpop.f32.mrb[2].mxu0  ;;  %v170_v21 = vpop.f32.mrb[2].mxu1 }
  0xe0   :  { %113 = vst.msk [vmem:[#allocation2] sm:$0xff] %vm34_vm0, %v111_v12  ;;  %v112_v17 = vadd.f32 %v107_v14, %v44_v10  ;;  %v361_v18 = vpop.f32.mrb[3].mxu0  ;;  %176 = vst.msk [vmem:[#allocation3] sm:$0xff] %vm34_vm0, %v174_v19  ;;  %v175_v22 = vadd.f32 %v170_v21, %v116_v16  ;;  %v369_v23 = vpop.f32.mrb[3].mxu1 }
  0xe2   :  { %114 = vst.msk [vmem:[#allocation2 + $0x8] sm:$0xff] %vm34_vm0, %v112_v17  ;;  %177 = vst.msk [vmem:[#allocation3 + $0x8] sm:$0xff] %vm34_vm0, %v175_v22 }
  0xe5   :  { %v230_v26 = vpop.f32.mrb[4].mxu0 }
  0xe6   :  { %v237_v28 = vadd.f32 %v230_v26, %v178_v24  ;;  %v376_v29 = vpop.f32.mrb[5].mxu0 }
  0xe7   :  { %v244_v30 = vld [vmem:[#allocation2] sm:$0xff]  ;;  %v233_v32 = vpop.f32.mrb[6].mxu0  ;;  %v266_v37 = vld [vmem:[#allocation3] sm:$0xff] }
  0xe8   :  { %v253_v33 = vadd.f32 %v330_v25, %v244_v30  ;;  %239 = vst.msk [vmem:[#allocation4] sm:$0xff] %vm34_vm0, %v237_v28  ;;  %v238_v34 = vadd.f32 %v233_v32, %v179_v27  ;;  %v377_v35 = vpop.f32.mrb[7].mxu0  ;;  %v275_v40 = vadd.f32 %v333_v31, %v266_v37 }
  0xe9   :  { %v245_v36 = vld [vmem:[#allocation2 + $0x8] sm:$0xff]  ;;  %v267_v41 = vld [vmem:[#allocation3 + $0x8] sm:$0xff] }
  0xea   :  { %v339_v38 = vpack.c.bf16 %v253_v33, %v253_v33  ;;  %v254_v39 = vadd.f32 %v330_v25, %v245_v36  ;;  %240 = vst.msk [vmem:[#allocation4 + $0x8] sm:$0xff] %vm34_vm0, %v238_v34  ;;  %v341_v43 = vpack.c.bf16 %v275_v40, %v275_v40  ;;  %v276_v44 = vadd.f32 %v333_v31, %v267_v41 }
  0xec   :  { %264 = vst.msk [vmem:[%s517_s7] sm:$0xf] %vm263_vm2, %v339_v38  ;;  %v340_v42 = vpack.c.bf16 %v254_v39, %v254_v39  ;;  %285 = vst.msk [vmem:[%s519_s8] sm:$0xf] %vm263_vm2, %v341_v43  ;;  %v342_v46 = vpack.c.bf16 %v276_v44, %v276_v44 }
  0xee   :  { %265 = vst.msk [vmem:[%s517_s7 + $0x4] sm:$0xf] %vm263_vm2, %v340_v42  ;;  %286 = vst.msk [vmem:[%s519_s8 + $0x4] sm:$0xf] %vm263_vm2, %v342_v46 }
  0xef   :  { %v287_v47 = vld [vmem:[#allocation4] sm:$0xff] }
  0xf0   :  { %v296_v48 = vadd.f32 %v336_v45, %v287_v47 }
  0xf1   :  { %v288_v49 = vld [vmem:[#allocation4 + $0x8] sm:$0xff] }
  0xf2   :  { %v343_v50 = vpack.c.bf16 %v296_v48, %v296_v48  ;;  %v297_v51 = vadd.f32 %v336_v45, %v288_v49 }
  0xf4   :  { %306 = vst.msk [vmem:[%s520_s9] sm:$0xf] %vm263_vm2, %v343_v50  ;;  %v344_v52 = vpack.c.bf16 %v297_v51, %v297_v51 }
  0xf6   :  { %307 = vst.msk [vmem:[%s520_s9 + $0x4] sm:$0xf] %vm263_vm2, %v344_v52 }

// kernel: _lambda_.14
= control target key start
LH: loop header
LB: loop body
LE: loop exit
PB: predicated region body
PF: predicated region fallthrough
CT: control target
= control target key end

     0   :  { %vm28_vm0 = vcmask 261120   ;;  %v220_v0 = vmov 0.0   ;;  %vm221_vm1 = vmmov 0   ;;  %vm178_vm2 = vcmask 257024   ;;  %s293_s1 = inlined_call_operand.vmem [shape: bf16[32,32], index: 1, kind: input, shape index: {}]   ;;  %s294_s0 = inlined_call_operand.vmem [shape: bf16[16,32], index: 0, kind: input, shape index: {}]   ;;  %s295_s3 = inlined_call_operand.vmem [shape: bf16[16,32], index: 3, kind: input, shape index: {}]   ;;  %s296_s2 = inlined_call_operand.vmem [shape: f32[1,32], index: 2, kind: input, shape index: {}, may-alias: {2,5}]   ;;  %s297_s4 = inlined_call_operand.vmem [shape: f32[1,32], index: 4, kind: input, shape index: {}]   ;;  %s298_s5 = inlined_call_operand.vmem [shape: f32[1,32], index: 5, kind: input, shape index: {}, may-alias: {2,5}]   ;;  %s299_s6 = inlined_call_operand.vmem [shape: bf16[16,32], index: 6, kind: output, shape index: {}]  }
   0x1   :  { %203 = vmatprep.subr.bf16.mxu0 %v220_v0  ;;  %v213_v1 = vld [vmem:[%s293_s1] sm:$0xff]   ;;  %207 = vmatprep.mubr.msk.bf16.mxu0 %vm221_vm1, %v220_v0  ;;  %29 = vst.msk [vmem:[#allocation2] sm:$0xff] %vm28_vm0, %v220_v0  ;;  %30 = vst.msk [vmem:[#allocation2 + $0x8] sm:$0xff] %vm28_vm0, %v220_v0  ;;  %v214_v2 = vld [vmem:[%s293_s1 + $0x8] sm:$0xff]  }
   0x2   :  { %204 = vmatpush3.bf16.msra.mxu0 %v213_v1  ;;  %v215_v3 = vld [vmem:[%s294_s0] sm:$0xff]  }
   0x3   :  { %205 = vmatprep.subr.bf16.mxu0 %v220_v0  ;;  %v197_v12 = vld [vmem:[%s295_s3] sm:$0xff]  }
   0x4   :  { %v189_v13 = vld [vmem:[%s296_s2] ss:$0 sm:$0xff]  ;;  %v198_v14 = vunpack.c.l.bf16 %v197_v12  ;;  %v199_v17 = vunpack.c.h.bf16 %v197_v12 }
   0x5   :  { %v190_v41 = vld [vmem:[%s297_s4] ss:$0 sm:$0xff] }
   0x6   :  { %206 = vmatpush3.bf16.msra.mxu0 %v214_v2  ;;  %v191_v43 = vld [vmem:[%s298_s5] ss:$0 sm:$0xff] }
   0x8   :  { %v31_v4 = vld [vmem:[#allocation2] sm:$0xff]  ;;  %v32_v6 = vld [vmem:[#allocation2 + $0x8] sm:$0xff] }
   0x9   :  { %208 = vmatmul.mubr.msk.bf16.vlgmr.msra.gmra.mrb[0].mxu0 %vm28_vm0, %v215_v3 }
  0xdc   :  { %v94_v5 = vpop.f32.mrb[0].mxu0 }
  0xdd   :  { %v101_v7 = vadd.f32 %v94_v5, %v31_v4  ;;  %v209_v8 = vpop.f32.mrb[1].mxu0 }
  0xde   :  { %v97_v9 = vpop.f32.mrb[2].mxu0 }
  0xdf   :  { %103 = vst.msk [vmem:[#allocation2] sm:$0xff] %vm28_vm0, %v101_v7  ;;  %v102_v10 = vadd.f32 %v97_v9, %v32_v6  ;;  %v210_v11 = vpop.f32.mrb[3].mxu0 }
  0xe1   :  { %104 = vst.msk [vmem:[#allocation2 + $0x8] sm:$0xff] %vm28_vm0, %v102_v10 }
  0xe6   :  { %v108_v15 = vld [vmem:[#allocation2] sm:$0xff] }
  0xe7   :  { %v117_v16 = vadd.f32 %v189_v13, %v108_v15 }
  0xe8   :  { %v109_v18 = vld [vmem:[#allocation2 + $0x8] sm:$0xff] }
  0xe9   :  { %v123_v19 = vadd.f32 %v198_v14, %v117_v16  ;;  %v118_v20 = vadd.f32 %v189_v13, %v109_v18 }
  0xeb   :  { %v127_v21 = vsel %vm28_vm0, %v123_v19, 0.0  ;;  %v124_v22 = vadd.f32 %v199_v17, %v118_v20 }
  0xec   :  { %128 = vadd.xlane.f32.xlu0 %v127_v21 }
  0xed   :  { %v130_v23 = vsel %vm28_vm0, %v124_v22, 0.0 }
  0xf0   :  { %131 = vadd.xlane.f32.xlu0 %v130_v23 }
 0x179   :  { %v129_v24 = vpop.xlane.xlu0 %128 }
 0x17a   :  { %v134_v25 = vmul.f32 0.03125, %v129_v24 }
 0x17c   :  { %v136_v26 = vsub.f32 %v123_v19, %v134_v25 }
 0x17d   :  { %v132_v27 = vpop.xlane.xlu0 %131 }
 0x17e   :  { %v135_v28 = vmul.f32 0.03125, %v132_v27  ;;  %v138_v29 = vmul.f32 %v136_v26, %v136_v26 }
 0x180   :  { %v137_v30 = vsub.f32 %v124_v22, %v135_v28  ;;  %v140_v31 = vsel %vm28_vm0, %v138_v29, 0.0 }
 0x181   :  { %141 = vadd.xlane.f32.xlu1 %v140_v31 }
 0x182   :  { %v139_v32 = vmul.f32 %v137_v30, %v137_v30 }
 0x184   :  { %v143_v33 = vsel %vm28_vm0, %v139_v32, 0.0 }
 0x185   :  { %144 = vadd.xlane.f32.xlu1 %v143_v33 }
 0x20e   :  { %v142_v34 = vpop.xlane.xlu1 %141 }
 0x20f   :  { %v146_v35 = vmul.f32 0.03125, %v142_v34 }
 0x211   :  { %v148_v36 = vadd.f32 1e-05, %v146_v35 }
 0x212   :  { %v145_v37 = vpop.xlane.xlu1 %144 }
 0x213   :  { %216 = vrsqrt.f32 %v148_v36  ;;  %v147_v38 = vmul.f32 0.03125, %v145_v37 }
 0x215   :  { %v149_v39 = vadd.f32 1e-05, %v147_v38 }
 0x217   :  { %218 = vrsqrt.f32 %v149_v39 }
 0x21d   :  { %v217_v40 = vpop.eup %216 }
 0x21e   :  { %v152_v42 = vmul.f32 %v217_v40, %v136_v26 }
 0x220   :  { %v160_v44 = vmul.f32 %v190_v41, %v152_v42 }
 0x221   :  { %v219_v45 = vpop.eup %218 }
 0x222   :  { %v168_v46 = vadd.f32 %v191_v43, %v160_v44  ;;  %v153_v47 = vmul.f32 %v219_v45, %v137_v30 }
 0x224   :  { %v194_v48 = vpack.c.bf16 %v168_v46, %v168_v46  ;;  %v161_v49 = vmul.f32 %v190_v41, %v153_v47 }
 0x226   :  { %179 = vst.msk [vmem:[%s299_s6] sm:$0xf] %vm178_vm2, %v194_v48  ;;  %v169_v50 = vadd.f32 %v191_v43, %v161_v49 }
 0x228   :  { %v195_v51 = vpack.c.bf16 %v169_v50, %v169_v50 }
 0x22a   :  { %180 = vst.msk [vmem:[%s299_s6 + $0x4] sm:$0xf] %vm178_vm2, %v195_v51 }

// kernel: _lambda_.13
= control target key start
LH: loop header
LB: loop body
LE: loop exit
PB: predicated region body
PF: predicated region fallthrough
CT: control target
= control target key end

     0   :  { %s920_s12 = smov 0   ;;  %s1020_s0 = inlined_call_operand.vmem [shape: bf16[2,8,32], index: 0, kind: input, shape index: {}]   ;;  %s1021_s1 = inlined_call_operand.vmem [shape: bf16[2,8,32], index: 1, kind: input, shape index: {}]   ;;  %s1022_s2 = inlined_call_operand.vmem [shape: bf16[2,8,32], index: 2, kind: input, shape index: {}]   ;;  %s1023_s3 = inlined_call_operand.vmem [shape: bf16[2,8,32], index: 3, kind: output, shape index: {}]  }
   0x1 LB: > { %s758_s13 = sadd.s32 4294967295, %s890_s12   ;;  %p762_p0 = scmp.ge.s32.totalorder %s890_s12, 1  ;;  %s890_s12 = sphi %s920_s12, %s13_s12  }
   0x2   : > { %p154_p1 = scmp.lt.s32.totalorder %s890_s12, 3 }
   0x4   : > { %p155_p2 = pnand %p762_p0, %p154_p1 }
   0x5   : > { %p184_p3 = scmp.lt.s32.totalorder (!%p155_p2), %s758_s13, 1  ;;  %v892_v0 = vmov (!%p155_p2), 0.0   ;;  %vm893_vm0 = vmmov (!%p155_p2), 0   ;;  %vm206_vm1 = vcmask (!%p155_p2), 64512   ;;  %s894_s21 = smov (!%p155_p2), 120   ;;  %vm266_vm2 = vcmask (!%p155_p2), 1043456  }
   0x6   : > { %158 = sbr.rel (%p155_p2) target bundleno = 1162 (0x48a), region = 32  ;;  %802 = vmatprep.subr.bf16.mxu0 (!%p155_p2), %v892_v0  ;;  %804 = vmatprep.mubr.msk.bf16.mxu0 (!%p155_p2), %vm893_vm0, %v892_v0  ;;  %s895_s22 = smov (!%p155_p2), 112   ;;  %vm313_vm3 = vcmask (!%p155_p2), 60416   ;;  %vm441_vm4 = vcmask (!%p155_p2), 126016   ;;  %vm560_vm5 = vcmask (!%p155_p2), 191616   ;;  %vm679_vm6 = vcmask (!%p155_p2), 257216  }
   0x7   : > { %808 = vmatprep.subr.bf16.mxu1 (!%p155_p2), %v892_v0  ;;  %810 = vmatprep.mubr.msk.bf16.mxu1 (!%p155_p2), %vm893_vm0, %v892_v0  ;;  %s896_s23 = smov (!%p155_p2), 104   ;;  %s897_s30 = smov (!%p155_p2), 8  }
   0x8   : > { %s898_s4 = smov (!%p155_p2), 16   ;;  %s899_s5 = smov (!%p155_p2), 24  }
   0xd   : > { %s1025_s13 = smov (!%p184_p3, %s758_s13), 1 }
   0xe   : > { %s934_s14 = sshll.u32 %s1025_s13, 2 }
   0xf   : > { %s191_s17 = scalar_lea.vmem %s1021_s1, %s934_s14  ;;  %s187_s20 = scalar_lea.vmem %s1020_s0, %s934_s14 }
  0x10   : > { %v203_v1 = vld [vmem:[%s191_s17] sm:$0xf]  ;;  %s195_s26 = scalar_lea.vmem %s1022_s2, %s934_s14  ;;  %s1011_s29 = scalar_lea.vmem %s1023_s3, %s934_s14 }
  0x11   : > { %v211_v2 = vsel %vm206_vm1, %v203_v1, 0  ;;  %v202_v3 = vld [vmem:[%s187_s20] sm:$0xf]  ;;  %v770_v6 = vcombine.low %v203_v1, %v203_v1 }
  0x12   : > { %803 = vmatpush3.bf16.xpose.msra.mxu0 %v211_v2  ;;  %v205_v4 = vmul.bf16 1052065461, %v202_v3  ;;  %v204_v12 = vld [vmem:[%s195_s26] sm:$0xf] }
  0x13   : > { %820 = vmatprep.subr.bf16.mxu0 %v892_v0  ;;  %v268_v13 = vsel %vm266_vm2, %v204_v12, 0  ;;  %v772_v42 = vcombine.low %v204_v12, %v204_v12 }
  0x14   : > { %v769_v5 = vcombine.low %v205_v4, %v205_v4  ;;  %809 = vmatpush3.bf16.msra.mxu1 %v268_v13 }
  0x15   : > { %814 = vmatprep.subr.bf16.mxu1 %v892_v0 }
  0x16   : > { %318 = vrot.lane.b32.xlu1 %v769_v5, %s894_s21 }
  0x19   : > { %805 = vmatmul.mubr.msk.bf16.vlgmr.msra.gmra.mrb[0].mxu0 %vm206_vm1, %v205_v4 }
  0x1a   : > { %822 = vmatprep.mubr.msk.bf16.mxu0 %vm893_vm0, %v892_v0  ;;  %445 = vrot.lane.b32.xlu1 %v770_v6, %s895_s22 }
  0x1e   : > { %443 = vrot.lane.b32.xlu1 %v769_v5, %s895_s22 }
  0x22   : > { %564 = vrot.lane.b32.xlu1 %v770_v6, %s896_s23 }
  0x26   : > { %562 = vrot.lane.b32.xlu1 %v769_v5, %s896_s23 }
  0x88   : > { %v319_v19 = vpop.permute.xlu1 %318 }
  0x8c   : > { %v446_v22 = vpop.permute.xlu1 %445 }
  0x8d   : > { %v451_v23 = vsel %vm206_vm1, %v446_v22, 0 }
  0x90   : > { %v444_v24 = vpop.permute.xlu1 %443 }
  0x94   : > { %v565_v25 = vpop.permute.xlu1 %564 }
  0x95   : > { %v570_v26 = vsel %vm206_vm1, %v565_v25, 0 }
  0x98   : > { %v563_v27 = vpop.permute.xlu1 %562 }
  0xec   : > { %v247_v7 = vpop.f32.mrb[0].mxu0 }
  0xed   : > { %v806_v8 = vpop.f32.mrb[1].mxu0  ;;  %v253_v9 = vsel %vm206_vm1, %v247_v7, -inf }
  0xee   : > { %254 = vmax.xlane.f32.xlu0 %v253_v9  ;;  %v250_v10 = vpop.f32.mrb[2].mxu0 }
  0xef   : > { %v807_v11 = vpop.f32.mrb[3].mxu0 }
 0x104   : > { %323 = vrot.lane.b32.xlu0 %v770_v6, %s894_s21 }
 0x17b   : > { %v255_v14 = vpop.xlane.xlu0 %254 }
 0x17c   : > { %v256_v15 = vsub.f32 %v247_v7, %v255_v14 }
 0x17e   : > { %v257_v16 = vmul.f32 1.442695, %v256_v15 }
 0x17f   : > { %v324_v17 = vpop.permute.xlu0 %323 }
 0x180   : > { %868 = vpow2.f32 %v257_v16  ;;  %v329_v20 = vsel %vm206_vm1, %v324_v17, 0 }
 0x18a   : > { %v962_v18 = vpop.eup %868 }
 0x18b   : > { %v262_v21 = vpack.c.bf16 %v962_v18, %v962_v18  ;;  %v259_v9 = vsel %vm206_vm1, %v962_v18, 0.0 }
 0x18d   : > { %811 = vmatmul.mubr.msk.bf16.vlgmr.msra.gmra.mrb[0].mxu1 %vm206_vm1, %v262_v21 }
 0x18e   : > { %815 = vmatpush3.bf16.xpose.msra.mxu1 %v329_v20  ;;  %816 = vmatprep.mubr.msk.bf16.mxu1 %vm893_vm0, %v892_v0 }
 0x18f   : > { %826 = vmatprep.subr.bf16.mxu1 %v892_v0 }
 0x195   : > { %817 = vmatmul.mubr.msk.bf16.vlgmr.msra.gmra.mrb[4].mxu1 %vm206_vm1, %v319_v19 }
 0x196   : > { %827 = vmatpush3.bf16.xpose.msra.mxu1 %v451_v23  ;;  %828 = vmatprep.mubr.msk.bf16.mxu1 %vm893_vm0, %v892_v0 }
 0x197   : > { %838 = vmatprep.subr.bf16.mxu1 %v892_v0 }
 0x19d   : > { %829 = vmatmul.mubr.msk.bf16.vlgmr.msra.gmra.mrb[8].mxu1 %vm206_vm1, %v444_v24 }
 0x19e   : > { %839 = vmatpush3.bf16.xpose.msra.mxu1 %v570_v26  ;;  %840 = vmatprep.mubr.msk.bf16.mxu1 %vm893_vm0, %v892_v0 }
 0x1a5   : > { %841 = vmatmul.mubr.msk.bf16.vlgmr.msra.gmra.mrb[12].mxu1 %vm206_vm1, %v563_v27 }
 0x260   : > { %v981_v28 = vpop.f32.mrb[0].mxu1 }
 0x261   : > { %v812_v29 = vpop.f32.mrb[1].mxu1 }
 0x262   : > { %v307_v30 = vpop.f32.mrb[2].mxu1 }
 0x263   : > { %v813_v31 = vpop.f32.mrb[3].mxu1 }
 0x268   : > { %v365_v32 = vpop.f32.mrb[4].mxu1 }
 0x269   : > { %v818_v33 = vpop.f32.mrb[5].mxu1  ;;  %v371_v34 = vsel %vm206_vm1, %v365_v32, -inf }
 0x26a   : > { %372 = vmax.xlane.f32.xlu1 %v371_v34  ;;  %v368_v35 = vpop.f32.mrb[6].mxu1 }
 0x26b   : > { %v819_v36 = vpop.f32.mrb[7].mxu1 }
 0x270   : > { %v487_v37 = vpop.f32.mrb[8].mxu1 }
 0x271   : > { %v493_v38 = vsel %vm206_vm1, %v487_v37, -inf  ;;  %v830_v39 = vpop.f32.mrb[9].mxu1 }
 0x272   : > { %494 = vmax.xlane.f32.xlu0 %v493_v38  ;;  %v490_v40 = vpop.f32.mrb[10].mxu1 }
 0x273   : > { %v831_v41 = vpop.f32.mrb[11].mxu1 }
 0x278   : > { %v606_v43 = vpop.f32.mrb[12].mxu1 }
 0x279   : > { %v842_v44 = vpop.f32.mrb[13].mxu1  ;;  %v612_v47 = vsel %vm206_vm1, %v606_v43, -inf }
 0x27a   : > { %v609_v45 = vpop.f32.mrb[14].mxu1 }
 0x27b   : > { %503 = vrot.lane.b32.xlu1 %v772_v42, %s895_s22  ;;  %v843_v46 = vpop.f32.mrb[15].mxu1 }
 0x288   : > { %384 = vrot.lane.b32.xlu0 %v772_v42, %s894_s21 }
 0x29f   : > { %613 = vmax.xlane.f32.xlu1 %v612_v47 }
 0x2b0   : > { %622 = vrot.lane.b32.xlu1 %v772_v42, %s896_s23 }
 0x2f7   : > { %v373_v48 = vpop.xlane.xlu1 %372 }
 0x2f8   : > { %v374_v49 = vsub.f32 %v365_v32, %v373_v48 }
 0x2fa   : > { %v375_v50 = vmul.f32 1.442695, %v374_v49 }
 0x2fb   : > { %v504_v57 = vpop.permute.xlu1 %503 }
 0x2fc   : > { %870 = vpow2.f32 %v375_v50  ;;  %v509_v60 = vsel %vm266_vm2, %v504_v57, 0 }
 0x2ff   : > { %v495_v51 = vpop.xlane.xlu0 %494 }
 0x300   : > { %v496_v52 = vsub.f32 %v487_v37, %v495_v51 }
 0x302   : > { %v497_v53 = vmul.f32 1.442695, %v496_v52 }
 0x303   : > { %v385_v54 = vpop.permute.xlu0 %384 }
 0x304   : > { %872 = vpow2.f32 %v497_v53  ;;  %v390_v55 = vsel %vm266_vm2, %v385_v54, 0 }
 0x305   : > { %821 = vmatpush3.bf16.msra.mxu0 %v390_v55 }
 0x306   : > { %v871_v56 = vpop.eup %870  ;;  %832 = vmatprep.subr.bf16.mxu0 %v892_v0 }
 0x307   : > { %v377_v58 = vsel %vm206_vm1, %v871_v56, 0.0  ;;  %v380_v59 = vpack.c.bf16 %v871_v56, %v871_v56 }
 0x308   : > { %378 = vadd.xlane.f32.xlu0 %v377_v58 }
 0x309   : > { %823 = vmatmul.mubr.msk.bf16.vlgmr.msra.gmra.mrb[4].mxu0 %vm206_vm1, %v380_v59 }
 0x30a   : > { %833 = vmatpush3.bf16.msra.mxu0 %v509_v60  ;;  %834 = vmatprep.mubr.msk.bf16.mxu0 %vm893_vm0, %v892_v0 }
 0x30b   : > { %844 = vmatprep.subr.bf16.mxu0 %v892_v0 }
 0x30e   : > { %v873_v61 = vpop.eup %872 }
 0x30f   : > { %v499_v62 = vsel %vm206_vm1, %v873_v61, 0.0  ;;  %v502_v63 = vpack.c.bf16 %v873_v61, %v873_v61 }
 0x310   : > { %500 = vadd.xlane.f32.xlu1 %v499_v62 }
 0x311   : > { %835 = vmatmul.mubr.msk.bf16.vlgmr.msra.gmra.mrb[8].mxu0 %vm206_vm1, %v502_v63 }
 0x312   : > { %846 = vmatprep.mubr.msk.bf16.mxu0 %vm893_vm0, %v892_v0 }
 0x32c   : > { %v614_v1 = vpop.xlane.xlu1 %613 }
 0x32d   : > { %v615_v2 = vsub.f32 %v606_v43, %v614_v1 }
 0x32f   : > { %v616_v3 = vmul.f32 1.442695, %v615_v2 }
 0x330   : > { %v623_v4 = vpop.permute.xlu1 %622 }
 0x331   : > { %874 = vpow2.f32 %v616_v3  ;;  %v628_v5 = vsel %vm266_vm2, %v623_v4, 0 }
 0x332   : > { %845 = vmatpush3.bf16.msra.mxu0 %v628_v5 }
 0x33b   : > { %v875_v6 = vpop.eup %874 }
 0x33c   : > { %v618_v7 = vsel %vm206_vm1, %v875_v6, 0.0  ;;  %v621_v8 = vpack.c.bf16 %v875_v6, %v875_v6 }
 0x33d   : > { %619 = vadd.xlane.f32.xlu0 %v618_v7 }
 0x33e   : > { %847 = vmatmul.mubr.msk.bf16.vlgmr.msra.gmra.mrb[12].mxu0 %vm206_vm1, %v621_v8 }
 0x341   : > { %260 = vadd.xlane.f32.xlu0 %v259_v9 }
 0x395   : > { %v379_v0 = vpop.xlane.xlu0 %378 }
 0x39d   : > { %v501_v12 = vpop.xlane.xlu1 %500 }
 0x3ca   : > { %v620_v10 = vpop.xlane.xlu0 %619 }
 0x3ce   : > { %v261_v11 = vpop.xlane.xlu0 %260 }
 0x3cf   : > { %876 = vrcp.f32 %v261_v11 }
 0x3d0   : > { %878 = vrcp.f32 %v379_v0 }
 0x3d1   : > { %880 = vrcp.f32 %v501_v12 }
 0x3d2   : > { %882 = vrcp.f32 %v620_v10 }
 0x3d9   : > { %v877_v13 = vpop.eup %876 }
 0x3da   : > { %v311_v14 = vmul.f32 %v877_v13, %v981_v28  ;;  %v879_v15 = vpop.eup %878 }
 0x3db   : > { %v881_v23 = vpop.eup %880 }
 0x3dc   : > { %v426_v16 = vpop.f32.mrb[4].mxu0  ;;  %v312_v17 = vpack.c.bf16 %v311_v14, %v311_v14  ;;  %v883_v30 = vpop.eup %882 }
 0x3dd   : > { %v433_v18 = vmul.f32 %v879_v15, %v426_v16  ;;  %v824_v19 = vpop.f32.mrb[5].mxu0 }
 0x3de   : > { %v429_v20 = vpop.f32.mrb[6].mxu0  ;;  %314 = vst.msk [vmem:[%s1011_s29] sm:$0xf] %vm313_vm3, %v312_v17 }
 0x3df   : > { %v783_v21 = vpack.c.bf16 %v433_v18, %v433_v18  ;;  %v825_v22 = vpop.f32.mrb[7].mxu0 }
 0x3e1   : > { %438 = vrot.lane.b32.xlu1 %v783_v21, %s897_s30 }
 0x3e4   : > { %v545_v24 = vpop.f32.mrb[8].mxu0 }
 0x3e5   : > { %v552_v25 = vmul.f32 %v881_v23, %v545_v24  ;;  %v836_v26 = vpop.f32.mrb[9].mxu0 }
 0x3e6   : > { %v548_v27 = vpop.f32.mrb[10].mxu0 }
 0x3e7   : > { %v784_v28 = vpack.c.bf16 %v552_v25, %v552_v25  ;;  %v837_v29 = vpop.f32.mrb[11].mxu0 }
 0x3e9   : > { %557 = vrot.lane.b32.xlu0 %v784_v28, %s898_s4 }
 0x411   : > { %v664_v31 = vpop.f32.mrb[12].mxu0 }
 0x412   : > { %v671_v32 = vmul.f32 %v883_v30, %v664_v31  ;;  %v848_v33 = vpop.f32.mrb[13].mxu0 }
 0x413   : > { %v667_v34 = vpop.f32.mrb[14].mxu0 }
 0x414   : > { %v785_v35 = vpack.c.bf16 %v671_v32, %v671_v32  ;;  %v849_v36 = vpop.f32.mrb[15].mxu0 }
 0x416   : > { %676 = vrot.lane.b32.xlu1 %v785_v35, %s899_s5 }
 0x453   : > { %v439_v37 = vpop.permute.xlu1 %438 }
 0x454   : > { %442 = vst.msk [vmem:[%s1011_s29] sm:$0xf] %vm441_vm4, %v439_v37 }
 0x45b   : > { %v558_v38 = vpop.permute.xlu0 %557 }
 0x45c   : > { %561 = vst.msk [vmem:[%s1011_s29] sm:$0xf] %vm560_vm5, %v558_v38 }
 0x488   : > { %v677_v39 = vpop.permute.xlu1 %676 }
 0x489   : > { %680 = vst.msk [vmem:[%s1011_s29] sm:$0xf] %vm679_vm6, %v677_v39 }
 0x48a PF: > { %s13_s12 = sadd.s32 1, %s890_s12  }
 0x48b   : > { %p10_p4 = scmp.ge.s32.totalorder %s13_s12, 4  }
 0x48d   :  { %12 = sbr.rel (!%p10_p4) target bundleno = 1 (0x1), region = 68 }

// kernel: _lambda_.15
= control target key start
LH: loop header
LB: loop body
LE: loop exit
PB: predicated region body
PF: predicated region fallthrough
CT: control target
= control target key end

     0   :  { %s1088_s12 = smov 0   ;;  %s1090_s13 = smov 0   ;;  %s1304_s0 = inlined_call_operand.vmem [shape: bf16[16,32], index: 0, kind: input, shape index: {}]   ;;  %s1305_s1 = inlined_call_operand.vmem [shape: bf16[32,2048], index: 1, kind: input, shape index: {}]   ;;  %s1306_s2 = inlined_call_operand.vmem [shape: f32[1,2048], index: 2, kind: input, shape index: {}]   ;;  %s1307_s3 = inlined_call_operand.vmem [shape: bf16[16,2048], index: 3, kind: output, shape index: {}]  }
   0x1   :  { %s1092_s14 = smov 0   ;;  %s1094_s15 = smov 0  }
   0x2   :  { %s1096_s16 = smov 0  }
   0x3 LB: > { %s28_s17 = sadd.s32 1, %s1060_s15  ;;  %s885_s18 = sadd.s32 4294967295, %s1064_s16   ;;  %s1064_s16 = sphi %s1096_s16, %s13_s16   ;;  %s1060_s15 = sphi %s1094_s15, %s1312_s15   ;;  %s1056_s14 = sphi %s1092_s14, %s1311_s14   ;;  %s1052_s13 = sphi %s1090_s13, %s1310_s13   ;;  %s1048_s12 = sphi %s1088_s12, %s1309_s12  }
   0x4   : > { %p30_p0 = scmp.ge.s32.totalorder %s28_s17, 4  ;;  %p76_p1 = scmp.ne.s32.totalorder %s1052_s13, %s1048_s12 }
   0x5   : > { %p77_p2 = scmp.eq.s32.totalorder %s1064_s16, 0  ;;  %p134_p4 = scmp.eq.s32.totalorder %s885_s18, 3 }
   0x6   : > { %s1314_s17 = smov (%p30_p0, %s28_s17), 0  ;;  %s69_s20 = sadd.s32 1, %s1052_s13 }
   0x7   : > { %p78_p3 = por %p77_p2, %p76_p1  ;;  %s65_s19 = ssub.s32 %s1060_s15, %s1314_s17 }
   0x8   : > { %p67_p5 = scmp.eq.s32.totalorder %s65_s19, 0  ;;  %p1123_p6 = por %p134_p4, %p76_p1 }
   0x9   : > { %p889_p7 = scmp.ge.s32.totalorder %s1064_s16, 4 }
   0xa   : > { %s1128_s22 = scalar_select %p67_p5, %s1052_s13, %s69_s20  }
   0xb   : > { %168 = sbr.rel (%p889_p7) target bundleno = 26 (0x1a), region = 20 }
  0x12   : > { %171 = sbr.rel (!%p78_p3) target bundleno = 26 (0x1a), region = 24  ;;  %s173_s23 = sand.u32 (%p78_p3), 1, %s1052_s13  }
  0x13   : > { %s933_s24 = sshll.u32 (%p78_p3), %s1060_s15, 4  ;;  %s890_s25 = sshll.u32 (%p78_p3), %s173_s23, 6 }
  0x14   : > { %s181_s28 = scalar_lea.vmem (%p78_p3), %s1305_s1, %s933_s24  ;;  %s175_s29 = scalar_lea.vmem (%p78_p3), [#allocation3], %s890_s25 }
  0x15   : > { %v194_v0 = vld [vmem:[%s181_s28] sm:$0xff] (%p78_p3)  ;;  %v196_v1 = vld [vmem:[%s181_s28 + $0x8] sm:$0xff] (%p78_p3) }
  0x16   : > { %v198_v2 = vld [vmem:[%s181_s28 + $0x40] sm:$0xff] (%p78_p3)  ;;  %195 = vst [vmem:[%s175_s29] sm:$0xff] (%p78_p3), %v194_v0  ;;  %197 = vst [vmem:[%s175_s29 + $0x8] sm:$0xff] (%p78_p3), %v196_v1  ;;  %v200_v3 = vld [vmem:[%s181_s28 + $0x48] sm:$0xff] (%p78_p3) }
  0x17   : > { %199 = vst [vmem:[%s175_s29 + $0x10] sm:$0xff] (%p78_p3), %v198_v2  ;;  %v202_v4 = vld [vmem:[%s181_s28 + $0x80] sm:$0xff] (%p78_p3)  ;;  %v204_v5 = vld [vmem:[%s181_s28 + $0x88] sm:$0xff] (%p78_p3)  ;;  %201 = vst [vmem:[%s175_s29 + $0x18] sm:$0xff] (%p78_p3), %v200_v3 }
  0x18   : > { %203 = vst [vmem:[%s175_s29 + $0x20] sm:$0xff] (%p78_p3), %v202_v4  ;;  %205 = vst [vmem:[%s175_s29 + $0x28] sm:$0xff] (%p78_p3), %v204_v5  ;;  %v206_v6 = vld [vmem:[%s181_s28 + $0xc0] sm:$0xff] (%p78_p3)  ;;  %v208_v7 = vld [vmem:[%s181_s28 + $0xc8] sm:$0xff] (%p78_p3) }
  0x19   : > { %207 = vst [vmem:[%s175_s29 + $0x30] sm:$0xff] %v206_v6  ;;  %209 = vst [vmem:[%s175_s29 + $0x38] sm:$0xff] %v208_v7 }
  0x1a PF: > { %p893_p8 = scmp.ge.s32.totalorder %s1064_s16, 1  ;;  %p222_p9 = scmp.lt.s32.totalorder %s1064_s16, 5 }
  0x1c   : > { %p223_p10 = pnand %p893_p8, %p222_p9 }
  0x1d   : > { %s229_s30 = sand.u32 (!%p223_p10), 1, %s1048_s12   ;;  %v1066_v8 = vmov (!%p223_p10), 0   ;;  %v993_v17 = vld [vmem:[%s1304_s0] sm:$0xff] (!%p223_p10)   ;;  %vm357_vm0 = vcmask (!%p223_p10), 261120   ;;  %s896_s8 = sshll.u32 (!%p223_p10), %s1056_s14, 2  ;;  %v476_v18 = vlaneseq (!%p223_p10) }
  0x1e   : > { %226 = sbr.rel (%p223_p10) target bundleno = 330 (0x14a), region = 51  ;;  %s894_s4 = sshll.u32 (!%p223_p10), %s229_s30, 6  ;;  %393 = vmatprep.mubr.bf16.mxu0 (!%p223_p10), %v1066_v8  ;;  %436 = vmatprep.mubr.bf16.mxu1 (!%p223_p10), %v1066_v8 }
  0x1f   : > { %s231_s5 = scalar_lea.vmem (!%p223_p10), [#allocation3], %s894_s4  ;;  %p275_p11 = scmp.lt.s32.totalorder (!%p223_p10), %s896_s8, 15  ;;  %v477_v19 = vshrl.u32 (!%p223_p10), %v476_v18, 7 }
  0x20   : > { %v981_v9 = vld [vmem:[%s231_s5 + $0x4] ss:$16 sps:$4 sm:$0xff] (!%p223_p10)   ;;  %v983_v10 = vld [vmem:[%s231_s5 + $0xc] ss:$16 sps:$4 sm:$0xff] (!%p223_p10)   ;;  %v985_v11 = vld [vmem:[%s231_s5] ss:$16 sps:$4 sm:$0xff] (!%p223_p10)  }
  0x21   : > { %361 = vmatprep.subr.bf16.mxu0 (!%p223_p10), %v981_v9  ;;  %v986_v12 = vld [vmem:[%s231_s5 + $0x8] ss:$16 sps:$4 sm:$0xff] (!%p223_p10)   ;;  %404 = vmatprep.subr.bf16.mxu1 (!%p223_p10), %v983_v10  ;;  %v987_v13 = vld [vmem:[%s231_s5 + $0x24] ss:$16 sps:$4 sm:$0xff] (!%p223_p10)   ;;  %v989_v14 = vld [vmem:[%s231_s5 + $0x2c] ss:$16 sps:$4 sm:$0xff] (!%p223_p10)  }
  0x22   : > { %362 = vmatpush1.bf16.msra.mxu0 (!%p223_p10), %v985_v11  ;;  %405 = vmatpush1.bf16.msra.mxu1 (!%p223_p10), %v986_v12  ;;  %v991_v15 = vld [vmem:[%s231_s5 + $0x20] ss:$16 sps:$4 sm:$0xff] (!%p223_p10)   ;;  %v992_v16 = vld [vmem:[%s231_s5 + $0x28] ss:$16 sps:$4 sm:$0xff] (!%p223_p10)   ;;  %v478_v20 = vsub.s32 (!%p223_p10), 0, %v477_v19  ;;  %v486_v21 = vsub.s32 (!%p223_p10), 2, %v477_v19 }
  0x23   : > { %363 = vmatprep.subr.bf16.mxu0 (!%p223_p10), %v987_v13  ;;  %406 = vmatprep.subr.bf16.mxu1 (!%p223_p10), %v989_v14  ;;  %v482_v23 = vsub.s32 (!%p223_p10), 1, %v477_v19  ;;  %v490_v24 = vsub.s32 (!%p223_p10), 3, %v477_v19  ;;  %v1067_v10 = vmov (!%p223_p10), 1.0   ;;  %s895_s18 = sshll.u32 (!%p223_p10), %s229_s30, 5 }
  0x24   : > { %s1263_s12 = scalar_lea.vmem (!%p223_p10), [#allocation4], %s895_s18 }
  0x25   : > { %s1316_s8 = smov (!%p275_p11, %s896_s8), 15  ;;  %s938_s19 = sshll.u32 (%p1123_p6), %s1056_s14, 4 }
  0x26   : > { %364 = vmatpush1.bf16.msra.mxu0 %v991_v15  ;;  %407 = vmatpush1.bf16.msra.mxu1 %v992_v16  ;;  %s277_s11 = scalar_lea.vmem %s1306_s2, %s1316_s8  ;;  %s760_s24 = scalar_lea.vmem (%p1123_p6), %s1307_s3, %s938_s19 }
  0x27   : > { %v474_v22 = vld [vmem:[%s277_s11] sm:$0xf] }
  0x28   : > { %v479_v25 = vrot.slane %v474_v22, %v478_v20  ;;  %v487_v26 = vrot.slane %v474_v22, %v486_v21  ;;  %v483_v27 = vrot.slane %v474_v22, %v482_v23  ;;  %v491_v28 = vrot.slane %v474_v22, %v490_v24 }
  0x29   : > { %906 = vmatmul.mubr.msk.bf16.vlgmr.msra.gmra.mrb[0].mxu0 %vm357_vm0, %v993_v17  ;;  %907 = vmatmul.mubr.msk.bf16.vlgmr.msra.gmra.mrb[0].mxu1 %vm357_vm0, %v993_v17 }
  0xfc   : > { %v395_v29 = vpop.f32.mrb[0].mxu0  ;;  %v438_v30 = vpop.f32.mrb[0].mxu1 }
  0xfd   : > { %v496_v31 = vadd.f32 %v479_v25, %v395_v29  ;;  %v498_v32 = vadd.f32 %v487_v26, %v438_v30  ;;  %v397_v33 = vpop.f32.mrb[1].mxu0  ;;  %v440_v34 = vpop.f32.mrb[1].mxu1 }
  0xfe   : > { %v497_v35 = vadd.f32 %v483_v27, %v397_v33  ;;  %v499_v36 = vadd.f32 %v491_v28, %v440_v34  ;;  %v399_v37 = vpop.f32.mrb[2].mxu0  ;;  %v442_v38 = vpop.f32.mrb[2].mxu1 }
  0xff   : > { %v512_v39 = vmul.f32 0.70710677, %v496_v31  ;;  %v514_v40 = vmul.f32 0.70710677, %v498_v32  ;;  %v401_v46 = vpop.f32.mrb[3].mxu0  ;;  %v444_v50 = vpop.f32.mrb[3].mxu1  ;;  %v1151_v55 = vadd.f32 %v479_v25, %v399_v37  ;;  %v1156_v59 = vadd.f32 %v487_v26, %v442_v38 }
 0x100   : > { %v513_v41 = vmul.f32 0.70710677, %v497_v35  ;;  %v1148_v45 = vmul.f32 0.70710677, %v499_v36  ;;  %v1158_v60 = vmul.f32 0.5, %v496_v31  ;;  %v1160_v62 = vadd.f32 %v483_v27, %v401_v46 }
 0x101   : > { %v536_v42 = vand.u32 2147483647, %v512_v39  ;;  %v538_v43 = vand.u32 2147483647, %v514_v40  ;;  %v1154_v58 = vmul.f32 0.70710677, %v1151_v55  ;;  %v1179_v14 = vadd.f32 %v491_v28, %v444_v50 }
 0x102   : > { %v537_v44 = vand.u32 2147483647, %v513_v41  ;;  %v539_v53 = vand.u32 2147483647, %v1148_v45  ;;  %v1162_v63 = vmul.f32 0.5, %v498_v32  ;;  %vm520_vm1 = vcmp.lt.f32.partialorder %v512_v39, 0.0 }
 0x103   : > { %v544_v47 = vmul.f32 0.3275911, %v536_v42  ;;  %v546_v48 = vmul.f32 0.3275911, %v538_v43  ;;  %v648_v57 = vsub.f32 0.0, %v536_v42  ;;  %v650_v0 = vsub.f32 0.0, %v538_v43 }
 0x104   : > { %v545_v49 = vmul.f32 0.3275911, %v537_v44  ;;  %v547_v56 = vmul.f32 0.3275911, %v539_v53  ;;  %v540_v1 = vand.u32 2147483647, %v1154_v58 }
 0x105   : > { %v552_v51 = vadd.f32 1.0, %v544_v47  ;;  %v554_v52 = vadd.f32 1.0, %v546_v48  ;;  %v1165_v2 = vmul.f32 0.5, %v497_v35  ;;  %v649_v3 = vsub.f32 0.0, %v537_v44 }
 0x106   : > { %v553_v54 = vadd.f32 1.0, %v545_v49  ;;  %v555_v61 = vadd.f32 1.0, %v547_v56  ;;  %v1168_v4 = vmul.f32 0.70710677, %v1156_v59  ;;  %v656_v5 = vmul.f32 %v648_v57, %v536_v42 }
 0x107   : > { %994 = vrcp.f32 %v552_v51  ;;  %vm522_vm2 = vcmp.lt.f32.partialorder %v514_v40, 0.0  ;;  %v548_v6 = vmul.f32 0.3275911, %v540_v1  ;;  %vm521_vm3 = vcmp.lt.f32.partialorder %v513_v41, 0.0 }
 0x108   : > { %996 = vrcp.f32 %v554_v52  ;;  %v1170_v7 = vmul.f32 0.5, %v499_v36  ;;  %v542_v8 = vand.u32 2147483647, %v1168_v4  ;;  %v1174_v9 = vmul.f32 0.70710677, %v1160_v62 }
 0x109   : > { %998 = vrcp.f32 %v553_v54  ;;  %v1177_v11 = vsel %vm520_vm1, -1.0, %v1067_v10  ;;  %v658_v12 = vmul.f32 %v650_v0, %v538_v43  ;;  %v556_v13 = vadd.f32 1.0, %v548_v6 }
 0x10a   : > { %1000 = vrcp.f32 %v555_v61  ;;  %v1182_v15 = vsel %vm522_vm2, -1.0, %v1067_v10  ;;  %v657_v16 = vmul.f32 %v649_v3, %v537_v44  ;;  %v550_v17 = vmul.f32 0.3275911, %v542_v8 }
 0x10b   : > { %v541_v18 = vand.u32 2147483647, %v1174_v9  ;;  %v664_v20 = vmul.f32 1.442695, %v656_v5  ;;  %v1188_v21 = vsel %vm521_vm3, -1.0, %v1067_v10  ;;  %v651_v22 = vsub.f32 0.0, %v539_v53 }
 0x10c   : > { %1002 = vrcp.f32 %v556_v13  ;;  %v652_v25 = vsub.f32 0.0, %v540_v1  ;;  %v558_v26 = vadd.f32 1.0, %v550_v17  ;;  %v668_v29 = vmul.f32 1.442695, %v658_v12 }
 0x10d   : > { %v549_v27 = vmul.f32 0.3275911, %v541_v18  ;;  %v1195_v30 = vmul.f32 0.70710677, %v1179_v14  ;;  %v666_v32 = vmul.f32 1.442695, %v657_v16  ;;  %v659_v36 = vmul.f32 %v651_v22, %v539_v53 }
 0x10e   : > { %1004 = vrcp.f32 %v558_v26  ;;  %v654_v37 = vsub.f32 0.0, %v542_v8  ;;  %v660_v41 = vmul.f32 %v652_v25, %v540_v1  ;;  %v653_v44 = vsub.f32 0.0, %v541_v18 }
 0x10f   : > { %v557_v33 = vadd.f32 1.0, %v549_v27  ;;  %v543_v38 = vand.u32 2147483647, %v1195_v30  ;;  %1006 = vpow2.f32 %v664_v20  ;;  %v670_v51 = vmul.f32 1.442695, %v659_v36 }
 0x110   : > { %v662_v52 = vmul.f32 %v654_v37, %v542_v8  ;;  %v672_v1 = vmul.f32 1.442695, %v660_v41  ;;  %v661_v3 = vmul.f32 %v653_v44, %v541_v18  ;;  %vm523_vm4 = vcmp.lt.f32.partialorder %v1148_v45, 0.0 }
 0x111   : > { %v1185_v19 = vpop.eup %994  ;;  %1008 = vrcp.f32 %v557_v33  ;;  %v551_v46 = vmul.f32 0.3275911, %v543_v38  ;;  %v655_v17 = vsub.f32 0.0, %v543_v38  ;;  %vm524_vm5 = vcmp.lt.f32.partialorder %v1154_v58, 0.0 }
 0x112   : > { %v1190_v23 = vpop.eup %996  ;;  %v576_v24 = vmul.f32 1.0614054, %v1185_v19  ;;  %1010 = vpow2.f32 %v668_v29  ;;  %v676_v16 = vmul.f32 1.442695, %v662_v52  ;;  %v532_v58 = vsel %vm524_vm5, -1.0, %v1067_v10 }
 0x113   : > { %v578_v28 = vmul.f32 1.0614054, %v1190_v23  ;;  %v1197_v34 = vpop.eup %998  ;;  %v559_v53 = vadd.f32 1.0, %v551_v46  ;;  %1012 = vpow2.f32 %v666_v32  ;;  %vm526_vm6 = vcmp.lt.f32.partialorder %v1168_v4, 0.0 }
 0x114   : > { %v908_v31 = vadd.f32 -1.4531521, %v576_v24  ;;  %v577_v40 = vmul.f32 1.0614054, %v1197_v34  ;;  %v1202_v42 = vpop.eup %1000  ;;  %vm525_vm7 = vcmp.lt.f32.partialorder %v1174_v9, 0.0  ;;  %vm527_vm8 = vcmp.lt.f32.partialorder %v1195_v30, 0.0 }
 0x115   : > { %v910_v35 = vadd.f32 -1.4531521, %v578_v28  ;;  %v579_v49 = vmul.f32 1.0614054, %v1202_v42  ;;  %1014 = vrcp.f32 %v559_v53  ;;  %v674_v28 = vmul.f32 1.442695, %v661_v3 }
 0x116   : > { %v592_v39 = vmul.f32 %v1185_v19, %v908_v31  ;;  %v909_v48 = vadd.f32 -1.4531521, %v577_v40  ;;  %v1208_v61 = vpop.eup %1002  ;;  %1016 = vpow2.f32 %v670_v51  ;;  %v663_v40 = vmul.f32 %v655_v17, %v543_v38 }
 0x117   : > { %v594_v43 = vmul.f32 %v1190_v23, %v910_v35  ;;  %v911_v57 = vadd.f32 -1.4531521, %v579_v49  ;;  %v580_v8 = vmul.f32 1.0614054, %v1208_v61  ;;  %1018 = vpow2.f32 %v672_v1 }
 0x118   : > { %v600_v47 = vadd.f32 1.4214138, %v592_v39  ;;  %v593_v56 = vmul.f32 %v1197_v34, %v909_v48  ;;  %v1213_v20 = vpop.eup %1004  ;;  %1020 = vpow2.f32 %v676_v16  ;;  %v678_v1 = vmul.f32 1.442695, %v663_v40 }
 0x119   : > { %v602_v50 = vadd.f32 1.4214138, %v594_v43  ;;  %v595_v12 = vmul.f32 %v1202_v42, %v911_v57  ;;  %v912_v26 = vadd.f32 -1.4531521, %v580_v8  ;;  %v582_v27 = vmul.f32 1.0614054, %v1213_v20  ;;  %v1007_v29 = vpop.eup %1006 }
 0x11a   : > { %v608_v54 = vmul.f32 %v1185_v19, %v600_v47  ;;  %v601_v6 = vadd.f32 1.4214138, %v593_v56  ;;  %1022 = vpow2.f32 %v674_v28 }
 0x11b   : > { %v610_v0 = vmul.f32 %v1190_v23, %v602_v50  ;;  %v603_v25 = vadd.f32 1.4214138, %v595_v12  ;;  %v596_v35 = vmul.f32 %v1208_v61, %v912_v26  ;;  %v1222_v36 = vpop.eup %1008  ;;  %v914_v39 = vadd.f32 -1.4531521, %v582_v27 }
 0x11c   : > { %v916_v5 = vadd.f32 -0.28449672, %v608_v54  ;;  %v609_v24 = vmul.f32 %v1197_v34, %v601_v6  ;;  %v1011_v41 = vpop.eup %1010  ;;  %v581_v50 = vmul.f32 1.0614054, %v1222_v36  ;;  %1024 = vpow2.f32 %v678_v1 }
 0x11d   : > { %v918_v13 = vadd.f32 -0.28449672, %v610_v0  ;;  %v611_v33 = vmul.f32 %v1202_v42, %v603_v25  ;;  %v604_v47 = vadd.f32 1.4214138, %v596_v35  ;;  %v598_v49 = vmul.f32 %v1213_v20, %v914_v39  ;;  %v1013_v51 = vpop.eup %1012 }
 0x11e   : > { %v624_v22 = vmul.f32 %v1185_v19, %v916_v5  ;;  %v917_v32 = vadd.f32 -0.28449672, %v609_v24  ;;  %v913_v0 = vadd.f32 -1.4531521, %v581_v50 }
 0x11f   : > { %v626_v18 = vmul.f32 %v1190_v23, %v918_v13  ;;  %v919_v46 = vadd.f32 -0.28449672, %v611_v33  ;;  %v612_v38 = vmul.f32 %v1208_v61, %v604_v47  ;;  %v1231_v56 = vpop.eup %1014  ;;  %v606_v57 = vadd.f32 1.4214138, %v598_v49 }
 0x120   : > { %v632_v31 = vadd.f32 0.2548296, %v624_v22  ;;  %v625_v44 = vmul.f32 %v1197_v34, %v917_v32  ;;  %v1017_v12 = vpop.eup %1016  ;;  %v597_v16 = vmul.f32 %v1222_v36, %v913_v0  ;;  %v583_v17 = vmul.f32 1.0614054, %v1231_v56 }
 0x121   : > { %v634_v37 = vadd.f32 0.2548296, %v626_v18  ;;  %v627_v54 = vmul.f32 %v1202_v42, %v919_v46  ;;  %v920_v6 = vadd.f32 -0.28449672, %v612_v38  ;;  %v614_v13 = vmul.f32 %v1213_v20, %v606_v57  ;;  %v1019_v18 = vpop.eup %1018 }
 0x122   : > { %v640_v43 = vmul.f32 %v1185_v19, %v632_v31  ;;  %v633_v53 = vadd.f32 0.2548296, %v625_v44  ;;  %v605_v28 = vadd.f32 1.4214138, %v597_v16 }
 0x123   : > { %v642_v48 = vmul.f32 %v1190_v23, %v634_v37  ;;  %v635_v5 = vadd.f32 0.2548296, %v627_v54  ;;  %v628_v26 = vmul.f32 %v1208_v61, %v920_v6  ;;  %v922_v27 = vadd.f32 -0.28449672, %v614_v13  ;;  %v1021_v37 = vpop.eup %1020 }
 0x124   : > { %v680_v52 = vmul.f32 %v1007_v29, %v640_v43  ;;  %v641_v23 = vmul.f32 %v1197_v34, %v633_v53  ;;  %v915_v29 = vadd.f32 -1.4531521, %v583_v17  ;;  %v613_v39 = vmul.f32 %v1222_v36, %v605_v28  ;;  %v1023_v46 = vpop.eup %1022 }
 0x125   : > { %v682_v19 = vmul.f32 %v1011_v41, %v642_v48  ;;  %v643_v25 = vmul.f32 %v1202_v42, %v635_v5  ;;  %v636_v35 = vadd.f32 0.2548296, %v628_v26  ;;  %v630_v42 = vmul.f32 %v1213_v20, %v922_v27 }
 0x126   : > { %v688_v3 = vsub.f32 1.0, %v680_v52  ;;  %v681_v24 = vmul.f32 %v1013_v51, %v641_v23  ;;  %v599_v40 = vmul.f32 %v1231_v56, %v915_v29  ;;  %v921_v48 = vadd.f32 -0.28449672, %v613_v39  ;;  %v1025_v4 = vpop.eup %1024 }
 0x127   : > { %v690_v8 = vsub.f32 1.0, %v682_v19  ;;  %v683_v33 = vmul.f32 %v1017_v12, %v643_v25  ;;  %v644_v44 = vmul.f32 %v1208_v61, %v636_v35  ;;  %v638_v47 = vadd.f32 0.2548296, %v630_v42 }
 0x128   : > { %v696_v22 = vmul.f32 %v688_v3, %v1177_v11  ;;  %v689_v32 = vsub.f32 1.0, %v681_v24  ;;  %v531_v11 = vsel %vm523_vm4, -1.0, %v1067_v10  ;;  %v607_v49 = vadd.f32 1.4214138, %v599_v40 }
 0x129   : > { %v698_v34 = vmul.f32 %v690_v8, %v1182_v15  ;;  %v691_v43 = vsub.f32 1.0, %v683_v33  ;;  %v684_v52 = vmul.f32 %v1019_v18, %v644_v44  ;;  %v646_v53 = vmul.f32 %v1213_v20, %v638_v47 }
 0x12a   : > { %v704_v31 = vadd.f32 1.0, %v696_v22  ;;  %v697_v41 = vmul.f32 %v689_v32, %v1188_v21  ;;  %v629_v21 = vmul.f32 %v1222_v36, %v921_v48  ;;  %v615_v61 = vmul.f32 %v1231_v56, %v607_v49 }
 0x12b   : > { %v706_v15 = vadd.f32 1.0, %v698_v34  ;;  %v699_v51 = vmul.f32 %v691_v43, %v531_v11  ;;  %v692_v57 = vsub.f32 1.0, %v684_v52  ;;  %v534_v8 = vsel %vm526_vm6, -1.0, %v1067_v10 }
 0x12c   : > { %v712_v45 = vmul.f32 %v704_v31, %v1158_v60  ;;  %v705_v50 = vadd.f32 1.0, %v697_v41  ;;  %v686_v60 = vmul.f32 %v1021_v37, %v646_v53  ;;  %v637_v0 = vadd.f32 0.2548296, %v629_v21 }
 0x12d   : > { %v714_v54 = vmul.f32 %v706_v15, %v1162_v63  ;;  %v707_v19 = vadd.f32 1.0, %v699_v51  ;;  %v923_v1 = vadd.f32 -0.28449672, %v615_v61  ;;  %v700_v20 = vmul.f32 %v692_v57, %v532_v58 }
 0x12e   : > { %v713_v38 = vmul.f32 %v705_v50, %v1165_v2  ;;  %v694_v5 = vsub.f32 1.0, %v686_v60  ;;  %v645_v6 = vmul.f32 %v1222_v36, %v637_v0  ;;  %v533_v22 = vsel %vm525_vm7, -1.0, %v1067_v10 }
 0x12f   : > { %v715_v23 = vmul.f32 %v707_v19, %v1170_v7  ;;  %v631_v63 = vmul.f32 %v1231_v56, %v923_v1  ;;  %v708_v13 = vadd.f32 1.0, %v700_v20  ;;  %v508_v24 = vmul.f32 0.5, %v1151_v55 }
 0x130   : > { %v934_v3 = vpack.c.bf16 %v713_v38, %v712_v45  ;;  %v685_v12 = vmul.f32 %v1023_v46, %v645_v6  ;;  %v702_v16 = vmul.f32 %v694_v5, %v534_v8  ;;  %v509_v26 = vmul.f32 0.5, %v1160_v62 }
 0x131   : > { %v935_v2 = vpack.c.bf16 %v715_v23, %v714_v54  ;;  %v639_v7 = vadd.f32 0.2548296, %v631_v63  ;;  %v716_v18 = vmul.f32 %v708_v13, %v508_v24  ;;  %v535_v29 = vsel %vm527_vm8, -1.0, %v1067_v10 }
 0x132   : > { %744 = vst [vmem:[%s1263_s12] sm:$0xff] %v934_v3  ;;  %v693_v17 = vsub.f32 1.0, %v685_v12  ;;  %v710_v34 = vadd.f32 1.0, %v702_v16  ;;  %v511_v35 = vmul.f32 0.5, %v1179_v14 }
 0x133   : > { %745 = vst [vmem:[%s1263_s12 + $0x8] sm:$0xff] %v935_v2  ;;  %v647_v36 = vmul.f32 %v1231_v56, %v639_v7  ;;  %v510_v56 = vmul.f32 0.5, %v1156_v59 }
 0x134   : > { %v701_v25 = vmul.f32 %v693_v17, %v533_v22 }
 0x135   : > { %v687_v9 = vmul.f32 %v1025_v4, %v647_v36  ;;  %v718_v33 = vmul.f32 %v710_v34, %v510_v56 }
 0x136   : > { %v709_v27 = vadd.f32 1.0, %v701_v25 }
 0x137   : > { %v695_v28 = vsub.f32 1.0, %v687_v9 }
 0x138   : > { %v717_v31 = vmul.f32 %v709_v27, %v509_v26 }
 0x139   : > { %v703_v32 = vmul.f32 %v695_v28, %v535_v29  ;;  %v773_v59 = vld [vmem:[%s1263_s12] sm:$0xff] (%p1123_p6) }
 0x13a   : > { %v936_v55 = vpack.c.bf16 %v717_v31, %v716_v18  ;;  %v775_v62 = vld [vmem:[%s1263_s12 + $0x8] sm:$0xff] (%p1123_p6)  ;;  %774 = vst [vmem:[%s760_s24] sm:$0xff] (%p1123_p6), %v773_v59 }
 0x13b   : > { %v711_v37 = vadd.f32 1.0, %v703_v32  ;;  %754 = sbr.rel (!%p1123_p6) target bundleno = 330 (0x14a), region = 67  ;;  %776 = vst [vmem:[%s760_s24 + $0x8] sm:$0xff] (%p1123_p6), %v775_v62 }
 0x13c   : > { %746 = vst [vmem:[%s1263_s12 + $0x10] sm:$0xff] %v936_v55 }
 0x13d   : > { %v719_v30 = vmul.f32 %v711_v37, %v511_v35 }
 0x13f   : > { %v937_v11 = vpack.c.bf16 %v719_v30, %v718_v33 }
 0x141   : > { %747 = vst [vmem:[%s1263_s12 + $0x18] sm:$0xff] %v937_v11 }
 0x143   : > { %v777_v10 = vld [vmem:[%s1263_s12 + $0x10] sm:$0xff] }
 0x144   : > { %778 = vst [vmem:[%s760_s24 + $0x40] sm:$0xff] %v777_v10 }
 0x148   : > { %v779_v14 = vld [vmem:[%s1263_s12 + $0x18] sm:$0xff] }
 0x149   : > { %780 = vst [vmem:[%s760_s24 + $0x48] sm:$0xff] %v779_v14 }
 0x14a PF: > { %s13_s16 = sadd.s32 1, %s1064_s16   ;;  %s1309_s12 = smov %s1052_s13 }
 0x14b   : > { %p10_p12 = scmp.ge.s32.totalorder %s13_s16, 6   ;;  %s1310_s13 = smov %s1128_s22 }
 0x14c   : > { %s1311_s14 = smov %s1060_s15  ;;  %s1312_s15 = smov %s1314_s17 }
 0x14d   :  { %12 = sbr.rel (!%p10_p12) target bundleno = 3 (0x3), region = 127 }

// kernel: _lambda_.23
= control target key start
LH: loop header
LB: loop body
LE: loop exit
PB: predicated region body
PF: predicated region fallthrough
CT: control target
= control target key end

     0   :  { %vm23_vm0 = vcmask 261120   ;;  %s128_s21 = smov 8   ;;  %s130_s22 = smov 24   ;;  %vm73_vm1 = vcmask 64512   ;;  %vm86_vm2 = vcmask 130112   ;;  %vm97_vm3 = vcmask 195712   ;;  %s211_s0 = inlined_call_operand.vmem [shape: bf16[16,32], index: 0, kind: input, shape index: {}]   ;;  %s212_s1 = inlined_call_operand.vmem [shape: f32[16,8], index: 1, kind: input, shape index: {}]   ;;  %s213_s2 = inlined_call_operand.vmem [shape: f32[1,32], index: 2, kind: input, shape index: {}]   ;;  %s214_s3 = inlined_call_operand.vmem [shape: f32[1,32], index: 3, kind: input, shape index: {}]   ;;  %s215_s4 = inlined_call_operand.vmem [shape: f32[16,32], index: 4, kind: output, shape index: {}]  }
   0x1   :  { %v118_v0 = vld [vmem:[%s211_s0] sm:$0xff]   ;;  %v68_v1 = vld [vmem:[%s212_s1 + $0x8] sm:$0xff]  ;;  %s129_s0 = smov 16   ;;  %vm108_vm4 = vcmask 261312  }
   0x2   :  { %v67_v2 = vld [vmem:[%s212_s1] sm:$0xff]  ;;  %v119_v3 = vunpack.c.l.bf16 %v118_v0  ;;  %v120_v4 = vunpack.c.h.bf16 %v118_v0  ;;  %v165_v5 = vmul.f32 0.5124974, %v68_v1 }
   0x3   :  { %v69_v7 = vmul.f32 0.5124974, %v67_v2  ;;  %v115_v28 = vld [vmem:[%s213_s2] ss:$0 sm:$0xff] }
   0x4   :  { %v24_v6 = vsel %vm23_vm0, %v119_v3, 0.0  ;;  %80 = vrot.lane.b32.xlu1 %v165_v5, %s128_s21  ;;  %v27_v8 = vsel %vm23_vm0, %v120_v4, 0.0  ;;  %v116_v31 = vld [vmem:[%s214_s3] ss:$0 sm:$0xff] }
   0x5   :  { %25 = vadd.xlane.f32.xlu0 %v24_v6 }
   0x8   :  { %89 = vrot.lane.b32.xlu1 %v69_v7, %s129_s0 }
   0x9   :  { %28 = vadd.xlane.f32.xlu0 %v27_v8 }
  0x1f   :  { %78 = vrot.lane.b32.xlu0 %v69_v7, %s128_s21 }
  0x23   :  { %100 = vrot.lane.b32.xlu0 %v69_v7, %s130_s22 }
  0x76   :  { %v81_v19 = vpop.permute.xlu1 %80 }
  0x7a   :  { %v90_v20 = vpop.permute.xlu1 %89 }
  0x92   :  { %v26_v9 = vpop.xlane.xlu0 %25 }
  0x93   :  { %v31_v10 = vmul.f32 0.03125, %v26_v9 }
  0x95   :  { %v33_v11 = vsub.f32 %v119_v3, %v31_v10 }
  0x96   :  { %v29_v12 = vpop.xlane.xlu0 %28 }
  0x97   :  { %v32_v13 = vmul.f32 0.03125, %v29_v12  ;;  %v35_v14 = vmul.f32 %v33_v11, %v33_v11 }
  0x99   :  { %v34_v15 = vsub.f32 %v120_v4, %v32_v13  ;;  %v37_v16 = vsel %vm23_vm0, %v35_v14, 0.0 }
  0x9a   :  { %38 = vadd.xlane.f32.xlu1 %v37_v16  ;;  %v79_v30 = vpop.permute.xlu0 %78 }
  0x9b   :  { %v36_v17 = vmul.f32 %v34_v15, %v34_v15 }
  0x9d   :  { %v40_v18 = vsel %vm23_vm0, %v36_v17, 0.0 }
  0x9e   :  { %41 = vadd.xlane.f32.xlu1 %v40_v18  ;;  %v101_v40 = vpop.permute.xlu0 %100 }
  0xaf   :  { %91 = vrot.lane.b32.xlu1 %v165_v5, %s129_s0 }
  0xb3   :  { %102 = vrot.lane.b32.xlu1 %v165_v5, %s130_s22 }
 0x127   :  { %v39_v21 = vpop.xlane.xlu1 %38 }
 0x128   :  { %v43_v22 = vmul.f32 0.03125, %v39_v21 }
 0x12a   :  { %v45_v23 = vadd.f32 1e-05, %v43_v22 }
 0x12b   :  { %v42_v24 = vpop.xlane.xlu1 %41 }
 0x12c   :  { %124 = vrsqrt.f32 %v45_v23  ;;  %v44_v25 = vmul.f32 0.03125, %v42_v24 }
 0x12e   :  { %v46_v26 = vadd.f32 1e-05, %v44_v25 }
 0x12f   :  { %v92_v36 = vpop.permute.xlu1 %91 }
 0x130   :  { %126 = vrsqrt.f32 %v46_v26 }
 0x133   :  { %v103_v46 = vpop.permute.xlu1 %102 }
 0x136   :  { %v125_v27 = vpop.eup %124 }
 0x137   :  { %v49_v29 = vmul.f32 %v125_v27, %v33_v11 }
 0x139   :  { %v57_v32 = vmul.f32 %v115_v28, %v49_v29 }
 0x13a   :  { %v127_v33 = vpop.eup %126 }
 0x13b   :  { %v65_v34 = vadd.f32 %v116_v31, %v57_v32  ;;  %v50_v35 = vmul.f32 %v127_v33, %v34_v15 }
 0x13d   :  { %v71_v37 = vadd.f32 %v69_v7, %v65_v34  ;;  %v84_v38 = vadd.f32 %v79_v30, %v65_v34  ;;  %v58_v39 = vmul.f32 %v115_v28, %v50_v35  ;;  %v95_v41 = vadd.f32 %v90_v20, %v65_v34 }
 0x13e   :  { %v106_v43 = vadd.f32 %v101_v40, %v65_v34 }
 0x13f   :  { %74 = vst.msk [vmem:[%s215_s4] sm:$0xff] %vm73_vm1, %v71_v37  ;;  %v66_v42 = vadd.f32 %v116_v31, %v58_v39 }
 0x140   :  { %87 = vst.msk [vmem:[%s215_s4] sm:$0xff] %vm86_vm2, %v84_v38 }
 0x141   :  { %v72_v44 = vadd.f32 %v165_v5, %v66_v42  ;;  %v85_v45 = vadd.f32 %v81_v19, %v66_v42  ;;  %98 = vst.msk [vmem:[%s215_s4] sm:$0xff] %vm97_vm3, %v95_v41  ;;  %v96_v47 = vadd.f32 %v92_v36, %v66_v42  ;;  %v107_v48 = vadd.f32 %v103_v46, %v66_v42 }
 0x142   :  { %109 = vst.msk [vmem:[%s215_s4] sm:$0xff] %vm108_vm4, %v106_v43 }
 0x143   :  { %75 = vst.msk [vmem:[%s215_s4 + $0x8] sm:$0xff] %vm73_vm1, %v72_v44 }
 0x144   :  { %88 = vst.msk [vmem:[%s215_s4 + $0x8] sm:$0xff] %vm86_vm2, %v85_v45 }
 0x145   :  { %99 = vst.msk [vmem:[%s215_s4 + $0x8] sm:$0xff] %vm97_vm3, %v96_v47 }
 0x146   :  { %110 = vst.msk [vmem:[%s215_s4 + $0x8] sm:$0xff] %vm108_vm4, %v107_v48 }

// kernel: _lambda_.16
= control target key start
LH: loop header
LB: loop body
LE: loop exit
PB: predicated region body
PF: predicated region fallthrough
CT: control target
= control target key end

     0   :  { %s1162_s21 = smov 0   ;;  %s1164_s22 = smov 0   ;;  %s1293_s0 = inlined_call_operand.vmem [shape: bf16[16,2048], index: 0, kind: input, shape index: {}]   ;;  %s1294_s1 = inlined_call_operand.vmem [shape: bf16[2048,32], index: 1, kind: input, shape index: {}]   ;;  %s1295_s2 = inlined_call_operand.vmem [shape: f32[1,32], index: 2, kind: input, shape index: {}, may-alias: {2,5}]   ;;  %s1296_s3 = inlined_call_operand.vmem [shape: bf16[16,32], index: 3, kind: input, shape index: {}]   ;;  %s1297_s4 = inlined_call_operand.vmem [shape: f32[1,32], index: 4, kind: input, shape index: {}]   ;;  %s1298_s5 = inlined_call_operand.vmem [shape: f32[1,32], index: 5, kind: input, shape index: {}, may-alias: {2,5}]   ;;  %s1299_s6 = inlined_call_operand.vmem [shape: bf16[16,32], index: 6, kind: output, shape index: {}]  }
   0x1   :  { %s1166_s23 = smov 0   ;;  %s1168_s24 = smov 0  }
   0x2   :  { %s1170_s25 = smov 0  }
   0x3 LB: > { %s25_s26 = sadd.s32 1, %s1120_s24  ;;  %p44_p1 = scmp.ne.s32.totalorder %s1112_s22, %s1108_s21  ;;  %s1124_s25 = sphi %s1170_s25, %s16_s25   ;;  %s1120_s24 = sphi %s1168_s24, %s1303_s24   ;;  %s1116_s23 = sphi %s1166_s23, %s1302_s23   ;;  %s1112_s22 = sphi %s1164_s22, %s1301_s22   ;;  %s1108_s21 = sphi %s1162_s21, %s1300_s21  }
   0x4   : > { %p26_p0 = scmp.ge.s32.totalorder %s25_s26, 4  ;;  %p45_p2 = scmp.eq.s32.totalorder %s1124_s25, 0 }
   0x5   : > { %s37_s28 = sadd.s32 1, %s1112_s22  ;;  %p897_p5 = scmp.ge.s32.totalorder %s1124_s25, 4 }
   0x6   : > { %s1305_s26 = smov (%p26_p0, %s25_s26), 0  ;;  %p46_p3 = por %p45_p2, %p44_p1 }
   0x7   : > { %s33_s27 = ssub.s32 %s1120_s24, %s1305_s26  ;;  %229 = sbr.rel (%p897_p5) target bundleno = 21 (0x15), region = 32 }
   0x8   : > { %p35_p4 = scmp.eq.s32.totalorder %s33_s27, 0 }
   0xa   : > { %s1197_s29 = scalar_select %p35_p4, %s1112_s22, %s37_s28  }
   0xe   : > { %232 = sbr.rel (!%p46_p3) target bundleno = 21 (0x15), region = 36  ;;  %s234_s30 = sand.u32 (%p46_p3), 1, %s1112_s22  }
   0xf   : > { %s952_s7 = sshll.u32 (%p46_p3), %s1120_s24, 4  ;;  %s898_s8 = sshll.u32 (%p46_p3), %s234_s30, 5 }
  0x10   : > { %s242_s11 = scalar_lea.vmem (%p46_p3), %s1293_s0, %s952_s7  ;;  %s236_s12 = scalar_lea.vmem (%p46_p3), [#allocation3], %s898_s8 }
  0x11   : > { %v255_v0 = vld [vmem:[%s242_s11] sm:$0xff] (%p46_p3)  ;;  %v257_v1 = vld [vmem:[%s242_s11 + $0x8] sm:$0xff] (%p46_p3) }
  0x12   : > { %v259_v2 = vld [vmem:[%s242_s11 + $0x40] sm:$0xff] (%p46_p3)  ;;  %256 = vst [vmem:[%s236_s12] sm:$0xff] (%p46_p3), %v255_v0  ;;  %258 = vst [vmem:[%s236_s12 + $0x8] sm:$0xff] (%p46_p3), %v257_v1  ;;  %v261_v3 = vld [vmem:[%s242_s11 + $0x48] sm:$0xff] (%p46_p3) }
  0x13   : > { %260 = vst [vmem:[%s236_s12 + $0x10] sm:$0xff] (%p46_p3), %v259_v2  ;;  %262 = vst [vmem:[%s236_s12 + $0x18] sm:$0xff] (%p46_p3), %v261_v3 }
  0x15 PF: > { %p901_p6 = scmp.ge.s32.totalorder %s1124_s25, 1  ;;  %p276_p7 = scmp.lt.s32.totalorder %s1124_s25, 5 }
  0x17   : > { %p277_p8 = pnand %p901_p6, %p276_p7 }
  0x18   : > { %s283_s13 = sand.u32 (!%p277_p8), 1, %s1108_s21   ;;  %s903_s14 = sshll.u32 (!%p277_p8), %s1116_s23, 6 }
  0x19   : > { %280 = sbr.rel (%p277_p8) target bundleno = 625 (0x271), region = 63  ;;  %s902_s15 = sshll.u32 (!%p277_p8), %s283_s13, 5 }
  0x1a   : > { %p325_p9 = scmp.lt.s32.totalorder (!%p277_p8), %s903_s14, 255  ;;  %s1214_s20 = scalar_lea.vmem (!%p277_p8), [#allocation3], %s902_s15 }
  0x1b   : > { %p905_p10 = scmp.ne.s32.totalorder (!%p277_p8), %s1116_s23, 0 }
  0x20   : > { %s1307_s14 = smov (!%p325_p9, %s903_s14), 255  ;;  %346 = sbr.rel (%p905_p10) target bundleno = 39 (0x27), region = 71 }
  0x21   : > { %s904_s16 = sshll.u32 %s1307_s14, 2  ;;  %vm347_vm0 = vcmask (!%p905_p10), 261120   ;;  %v1126_v4 = vmov (!%p905_p10), 0.0  }
  0x22   : > { %s1212_s19 = scalar_lea.vmem %s1294_s1, %s904_s16  ;;  %348 = vst.msk [vmem:[#allocation2] sm:$0xff] (!%p905_p10), %vm347_vm0, %v1126_v4  ;;  %349 = vst.msk [vmem:[#allocation2 + $0x8] sm:$0xff] (!%p905_p10), %vm347_vm0, %v1126_v4 }
  0x27 PF: > { %v1044_v5 = vld [vmem:[%s1212_s19 + $0x40] sm:$0xff]   ;;  %v1048_v9 = vld [vmem:[%s1212_s19 + $0x48] sm:$0xff]   ;;  %v1052_v13 = vld [vmem:[%s1212_s19 + $0x50] sm:$0xff]   ;;  %vm716_vm1 = vcmask 261120   ;;  %p942_p11 = scmp.ne.s32.totalorder %s1116_s23, 3 }
  0x28   : > { %v1045_v6 = vld [vmem:[%s1212_s19 + $0xc0] sm:$0xff]   ;;  %959 = vmatprep.subr.bf16.mxu0 %v1044_v5  ;;  %v1049_v10 = vld [vmem:[%s1212_s19 + $0xc8] sm:$0xff]   ;;  %v1053_v14 = vld [vmem:[%s1212_s19 + $0xd0] sm:$0xff]   ;;  %vm793_vm2 = vcmask (!%p942_p11), 257024  }
  0x29   : > { %v1046_v7 = vld [vmem:[%s1212_s19] sm:$0xff]   ;;  %981 = vmatprep.subr.bf16.mxu1 %v1045_v6  ;;  %v1050_v11 = vld [vmem:[%s1212_s19 + $0x8] sm:$0xff]   ;;  %v1054_v15 = vld [vmem:[%s1212_s19 + $0x10] sm:$0xff]  }
  0x2a   : > { %v1047_v8 = vld [vmem:[%s1212_s19 + $0x80] sm:$0xff]   ;;  %960 = vmatpush3.bf16.msra.mxu0 %v1046_v7  ;;  %v1051_v12 = vld [vmem:[%s1212_s19 + $0x88] sm:$0xff]   ;;  %v1055_v16 = vld [vmem:[%s1212_s19 + $0x90] sm:$0xff]  }
  0x2b   : > { %982 = vmatpush3.bf16.msra.mxu1 %v1047_v8  ;;  %961 = vmatprep.subr.bf16.mxu0 %v1048_v9  ;;  %v1056_v17 = vld [vmem:[%s1212_s19 + $0x58] sm:$0xff]   ;;  %v1060_v21 = vld [vmem:[%s1212_s19 + $0x60] sm:$0xff]   ;;  %v1064_v25 = vld [vmem:[%s1212_s19 + $0x68] sm:$0xff]  }
  0x2c   : > { %983 = vmatprep.subr.bf16.mxu1 %v1049_v10  ;;  %v1057_v18 = vld [vmem:[%s1212_s19 + $0xd8] sm:$0xff]   ;;  %v1061_v22 = vld [vmem:[%s1212_s19 + $0xe0] sm:$0xff]   ;;  %v1065_v26 = vld [vmem:[%s1212_s19 + $0xe8] sm:$0xff]  }
  0x2d   : > { %v1058_v19 = vld [vmem:[%s1212_s19 + $0x18] sm:$0xff]   ;;  %v1062_v23 = vld [vmem:[%s1212_s19 + $0x20] sm:$0xff]   ;;  %v1066_v27 = vld [vmem:[%s1212_s19 + $0x28] sm:$0xff]  }
  0x2e   : > { %962 = vmatpush3.bf16.msra.mxu0 %v1050_v11  ;;  %v1059_v20 = vld [vmem:[%s1212_s19 + $0x98] sm:$0xff]   ;;  %v1063_v24 = vld [vmem:[%s1212_s19 + $0xa0] sm:$0xff]   ;;  %v1067_v28 = vld [vmem:[%s1212_s19 + $0xa8] sm:$0xff]  }
  0x2f   : > { %984 = vmatpush3.bf16.msra.mxu1 %v1051_v12  ;;  %963 = vmatprep.subr.bf16.mxu0 %v1052_v13  ;;  %v1068_v29 = vld [vmem:[%s1212_s19 + $0x70] sm:$0xff]   ;;  %v1072_v33 = vld [vmem:[%s1212_s19 + $0x78] sm:$0xff]   ;;  %v350_v50 = vld [vmem:[#allocation2] sm:$0xff] }
  0x30   : > { %985 = vmatprep.subr.bf16.mxu1 %v1053_v14  ;;  %v1069_v30 = vld [vmem:[%s1212_s19 + $0xf0] sm:$0xff]   ;;  %v1073_v34 = vld [vmem:[%s1212_s19 + $0xf8] sm:$0xff]   ;;  %v943_v60 = vld [vmem:[%s1295_s2] ss:$0 sm:$0xff] (!%p942_p11) }
  0x31   : > { %v1070_v31 = vld [vmem:[%s1212_s19 + $0x30] sm:$0xff]   ;;  %v1074_v35 = vld [vmem:[%s1212_s19 + $0x38] sm:$0xff]   ;;  %v956_v61 = vld [vmem:[%s1296_s3] sm:$0xff] (!%p942_p11)  }
  0x32   : > { %964 = vmatpush3.bf16.msra.mxu0 %v1054_v15  ;;  %v1071_v32 = vld [vmem:[%s1212_s19 + $0xb0] sm:$0xff]   ;;  %v1075_v36 = vld [vmem:[%s1212_s19 + $0xb8] sm:$0xff]   ;;  %v957_v63 = vunpack.c.l.bf16 (!%p942_p11), %v956_v61  ;;  %v958_v1 = vunpack.c.h.bf16 (!%p942_p11), %v956_v61 }
  0x33   : > { %986 = vmatpush3.bf16.msra.mxu1 %v1055_v16  ;;  %965 = vmatprep.subr.bf16.mxu0 %v1056_v17  ;;  %v1076_v37 = vld [vmem:[%s1214_s20] ss:$16 sps:$4 sm:$0xff]   ;;  %v1078_v38 = vld [vmem:[%s1214_s20 + $0x4] ss:$16 sps:$4 sm:$0xff]   ;;  %v1079_v39 = vld [vmem:[%s1214_s20 + $0x8] ss:$16 sps:$4 sm:$0xff]  }
  0x34   : > { %987 = vmatprep.subr.bf16.mxu1 %v1057_v18  ;;  %v1081_v40 = vld [vmem:[%s1214_s20 + $0xc] ss:$16 sps:$4 sm:$0xff]   ;;  %664 = vmatprep.mubr.bf16.mxu0 %v1078_v38 }
  0x35   : > { %705 = vmatprep.mubr.bf16.mxu1 %v1081_v40  ;;  %v351_v55 = vld [vmem:[#allocation2 + $0x8] sm:$0xff] }
  0x36   : > { %966 = vmatpush3.bf16.msra.mxu0 %v1058_v19 }
  0x37   : > { %988 = vmatpush3.bf16.msra.mxu1 %v1059_v20  ;;  %967 = vmatprep.subr.bf16.mxu0 %v1060_v21 }
  0x38   : > { %989 = vmatprep.subr.bf16.mxu1 %v1061_v22 }
  0x3a   : > { %968 = vmatpush3.bf16.msra.mxu0 %v1062_v23 }
  0x3b   : > { %990 = vmatpush3.bf16.msra.mxu1 %v1063_v24  ;;  %969 = vmatprep.subr.bf16.mxu0 %v1064_v25  ;;  %v944_v24 = vld [vmem:[%s1297_s4] ss:$0 sm:$0xff] (!%p942_p11) }
  0x3c   : > { %991 = vmatprep.subr.bf16.mxu1 %v1065_v26  ;;  %v945_v26 = vld [vmem:[%s1298_s5] ss:$0 sm:$0xff] (!%p942_p11) }
  0x3e   : > { %970 = vmatpush3.bf16.msra.mxu0 %v1066_v27 }
  0x3f   : > { %992 = vmatpush3.bf16.msra.mxu1 %v1067_v28  ;;  %971 = vmatprep.subr.bf16.mxu0 %v1068_v29 }
  0x40   : > { %993 = vmatprep.subr.bf16.mxu1 %v1069_v30 }
  0x42   : > { %972 = vmatpush3.bf16.msra.mxu0 %v1070_v31 }
  0x43   : > { %994 = vmatpush3.bf16.msra.mxu1 %v1071_v32  ;;  %973 = vmatprep.subr.bf16.mxu0 %v1072_v33 }
  0x44   : > { %995 = vmatprep.subr.bf16.mxu1 %v1073_v34 }
  0x46   : > { %974 = vmatpush3.bf16.msra.mxu0 %v1074_v35 }
  0x47   : > { %996 = vmatpush3.bf16.msra.mxu1 %v1075_v36 }
  0x49   : > { %665 = vmatmul.mubr.bf16.vlgmr.msra.gmra.mrb[0].mxu0 %v1076_v37 }
  0x4a   : > { %706 = vmatmul.mubr.bf16.vlgmr.msra.gmra.mrb[0].mxu1 %v1079_v39 }
 0x11c   : > { %v975_v41 = vpop.f32.mrb[0].mxu0 }
 0x11d   : > { %v997_v42 = vpop.f32.mrb[0].mxu1  ;;  %v976_v43 = vpop.f32.mrb[1].mxu0 }
 0x11e   : > { %v977_v44 = vadd.f32 %v976_v43, %v975_v41  ;;  %v998_v45 = vpop.f32.mrb[1].mxu1  ;;  %v978_v46 = vpop.f32.mrb[2].mxu0 }
 0x11f   : > { %v999_v47 = vadd.f32 %v998_v45, %v997_v42  ;;  %v1000_v48 = vpop.f32.mrb[2].mxu1  ;;  %v979_v49 = vpop.f32.mrb[3].mxu0 }
 0x120   : > { %v980_v51 = vadd.f32 %v979_v49, %v978_v46  ;;  %v1001_v52 = vpop.f32.mrb[3].mxu1 }
 0x121   : > { %v708_v53 = vadd.f32 %v999_v47, %v977_v44  ;;  %v1002_v54 = vadd.f32 %v1001_v52, %v1000_v48  ;;  %722 = sbr.rel (%p942_p11) target bundleno = 625 (0x271), region = 75 }
 0x123   : > { %v714_v56 = vadd.f32 %v708_v53, %v350_v50  ;;  %v711_v57 = vadd.f32 %v1002_v54, %v980_v51 }
 0x125   : > { %717 = vst.msk [vmem:[#allocation2] sm:$0xff] %vm716_vm1, %v714_v56  ;;  %v715_v58 = vadd.f32 %v711_v57, %v351_v55 }
 0x127   : > { %718 = vst.msk [vmem:[#allocation2 + $0x8] sm:$0xff] %vm716_vm1, %v715_v58 }
 0x12c   : > { %v723_v59 = vld [vmem:[#allocation2] sm:$0xff] }
 0x12d   : > { %v732_v62 = vadd.f32 %v943_v60, %v723_v59 }
 0x12e   : > { %v724_v0 = vld [vmem:[#allocation2 + $0x8] sm:$0xff] }
 0x12f   : > { %v733_v2 = vadd.f32 %v943_v60, %v724_v0  ;;  %v738_v3 = vadd.f32 %v957_v63, %v732_v62 }
 0x131   : > { %v739_v4 = vadd.f32 %v958_v1, %v733_v2  ;;  %v742_v5 = vsel %vm716_vm1, %v738_v3, 0.0 }
 0x132   : > { %743 = vadd.xlane.f32.xlu0 %v742_v5 }
 0x133   : > { %v745_v6 = vsel %vm716_vm1, %v739_v4, 0.0 }
 0x136   : > { %746 = vadd.xlane.f32.xlu0 %v745_v6 }
 0x1bf   : > { %v744_v7 = vpop.xlane.xlu0 %743 }
 0x1c0   : > { %v749_v8 = vmul.f32 0.03125, %v744_v7 }
 0x1c2   : > { %v751_v9 = vsub.f32 %v738_v3, %v749_v8 }
 0x1c3   : > { %v747_v10 = vpop.xlane.xlu0 %746 }
 0x1c4   : > { %v750_v11 = vmul.f32 0.03125, %v747_v10  ;;  %v753_v12 = vmul.f32 %v751_v9, %v751_v9 }
 0x1c6   : > { %v752_v13 = vsub.f32 %v739_v4, %v750_v11  ;;  %v755_v14 = vsel %vm716_vm1, %v753_v12, 0.0 }
 0x1c7   : > { %756 = vadd.xlane.f32.xlu1 %v755_v14 }
 0x1c8   : > { %v754_v15 = vmul.f32 %v752_v13, %v752_v13 }
 0x1ca   : > { %v758_v16 = vsel %vm716_vm1, %v754_v15, 0.0 }
 0x1cb   : > { %759 = vadd.xlane.f32.xlu1 %v758_v16 }
 0x254   : > { %v757_v17 = vpop.xlane.xlu1 %756 }
 0x255   : > { %v761_v18 = vmul.f32 0.03125, %v757_v17 }
 0x257   : > { %v763_v19 = vadd.f32 1e-05, %v761_v18 }
 0x258   : > { %v760_v20 = vpop.xlane.xlu1 %759 }
 0x259   : > { %1082 = vrsqrt.f32 %v763_v19  ;;  %v762_v21 = vmul.f32 0.03125, %v760_v20 }
 0x25b   : > { %v764_v22 = vadd.f32 1e-05, %v762_v21 }
 0x25d   : > { %1084 = vrsqrt.f32 %v764_v22 }
 0x263   : > { %v1083_v23 = vpop.eup %1082 }
 0x264   : > { %v767_v25 = vmul.f32 %v1083_v23, %v751_v9 }
 0x266   : > { %v775_v27 = vmul.f32 %v944_v24, %v767_v25 }
 0x267   : > { %v1085_v28 = vpop.eup %1084 }
 0x268   : > { %v783_v29 = vadd.f32 %v945_v26, %v775_v27  ;;  %v768_v30 = vmul.f32 %v1085_v28, %v752_v13 }
 0x26a   : > { %v953_v31 = vpack.c.bf16 %v783_v29, %v783_v29  ;;  %v776_v32 = vmul.f32 %v944_v24, %v768_v30 }
 0x26c   : > { %794 = vst.msk [vmem:[%s1299_s6] sm:$0xf] %vm793_vm2, %v953_v31  ;;  %v784_v33 = vadd.f32 %v945_v26, %v776_v32 }
 0x26e   : > { %v954_v34 = vpack.c.bf16 %v784_v33, %v784_v33 }
 0x270   : > { %795 = vst.msk [vmem:[%s1299_s6 + $0x4] sm:$0xf] %vm793_vm2, %v954_v34 }
 0x271 PF: > { %s16_s25 = sadd.s32 1, %s1124_s25   ;;  %s1300_s21 = smov %s1112_s22 }
 0x272   : > { %p13_p12 = scmp.ge.s32.totalorder %s16_s25, 6   ;;  %s1301_s22 = smov %s1197_s29 }
 0x273   : > { %s1302_s23 = smov %s1120_s24  ;;  %s1303_s24 = smov %s1305_s26 }
 0x274   :  { %15 = sbr.rel (!%p13_p12) target bundleno = 3 (0x3), region = 116 }

// kernel: _lambda_.22
= control target key start
LH: loop header
LB: loop body
LE: loop exit
PB: predicated region body
PF: predicated region fallthrough
CT: control target
= control target key end

     0   :  { %s1154_s18 = smov 0   ;;  %s1326_s0 = inlined_call_operand.vmem [shape: f32[2,8,32], index: 0, kind: input, shape index: {}]   ;;  %s1327_s1 = inlined_call_operand.vmem [shape: f32[7,32,8], index: 1, kind: input, shape index: {}]   ;;  %s1328_s2 = inlined_call_operand.vmem [shape: f32[1,8], index: 2, kind: input, shape index: {}, may-alias: {2,4}]   ;;  %s1329_s3 = inlined_call_operand.vmem [shape: f32[1,8], index: 3, kind: input, shape index: {}]   ;;  %s1330_s4 = inlined_call_operand.vmem [shape: f32[1,8], index: 4, kind: input, shape index: {}, may-alias: {2,4}]   ;;  %s1331_s5 = inlined_call_operand.vmem [shape: f32[2,8,8], index: 5, kind: output, shape index: {}]  }
   0x1 LB: > { %s903_s19 = sadd.s32 4294967295, %s1119_s18   ;;  %p907_p0 = scmp.ge.s32.totalorder %s1119_s18, 1  ;;  %s1119_s18 = sphi %s1154_s18, %s15_s18  }
   0x2   : > { %p186_p1 = scmp.lt.s32.totalorder %s1119_s18, 3 }
   0x4   : > { %p187_p2 = pnand %p907_p0, %p186_p1 }
   0x5   : > { %v234_v0 = vld [vmem:[%s1327_s1] sm:$0xff] (!%p187_p2)  ;;  %v235_v1 = vld [vmem:[%s1327_s1 + $0x8] sm:$0xff] (!%p187_p2)  ;;  %v221_v3 = vlaneseq (!%p187_p2)  ;;  %v1121_v4 = vmov (!%p187_p2), 0.0|0.0   ;;  %v236_v7 = vld [vmem:[%s1327_s1 + $0x10] sm:$0xff] (!%p187_p2)  ;;  %p212_p3 = scmp.lt.s32.totalorder (!%p187_p2), %s903_s19, 1  ;;  %vm1122_vm0 = vmmov (!%p187_p2), 0  }
   0x6   : > { %190 = sbr.rel (%p187_p2) target bundleno = 574 (0x23e), region = 40  ;;  %v910_v2 = vld [vmem:[%s1327_s1 + $0x60] sm:$0xff] (!%p187_p2)  ;;  %1058 = vmatprep.subr.bf16.mxu0 (!%p187_p2), %v1121_v4  ;;  %v1059_v5 = vpack.c.bf16 (!%p187_p2), %v235_v1, %v234_v0  ;;  %1064 = vmatprep.subr.bf16.mxu1 (!%p187_p2), %v1121_v4  ;;  %v911_v6 = vld [vmem:[%s1327_s1 + $0x68] sm:$0xff] (!%p187_p2)  ;;  %v237_v8 = vld [vmem:[%s1327_s1 + $0x18] sm:$0xff] (!%p187_p2)  ;;  %v1123_v12 = vmov (!%p187_p2), 0.0   ;;  %vm238_vm2 = vcmask (!%p187_p2), 261120  }
   0x7   : > { %v1065_v9 = vpack.c.bf16 (!%p187_p2), %v911_v6, %v910_v2  ;;  %v912_v10 = vld [vmem:[%s1327_s1 + $0x70] sm:$0xff] (!%p187_p2)  ;;  %v913_v11 = vld [vmem:[%s1327_s1 + $0x78] sm:$0xff] (!%p187_p2)  ;;  %989 = vmatprep.mubr.msk.f32.mxu0 (!%p187_p2), %vm1122_vm0, %v1123_v12  ;;  %v1190_v13 = vshrl.u32 (!%p187_p2), %v221_v3, 7  ;;  %1000 = vmatprep.mubr.msk.f32.mxu1 (!%p187_p2), %vm1122_vm0, %v1123_v12  ;;  %v1062_v14 = vpack.c.bf16 (!%p187_p2), %v237_v8, %v236_v7  ;;  %v916_v17 = vld [vmem:[%s1327_s1 + $0x20] sm:$0xff] (!%p187_p2)  ;;  %vm820_vm8 = vcmask (!%p187_p2), 64512  }
   0x8   : > { %1060 = vmatpush3.bf16.msra.mxu0 (!%p187_p2), %v1059_v5  ;;  %v1068_v15 = vpack.c.bf16 (!%p187_p2), %v913_v11, %v912_v10  ;;  %v917_v18 = vld [vmem:[%s1327_s1 + $0x28] sm:$0xff] (!%p187_p2)  ;;  %v921_v19 = vld [vmem:[%s1327_s1 + $0x40] sm:$0xff] (!%p187_p2)  ;;  %v918_v25 = vld [vmem:[%s1327_s1 + $0x30] sm:$0xff] (!%p187_p2) }
   0x9   : > { %1066 = vmatpush3.bf16.msra.mxu1 (!%p187_p2), %v1065_v9  ;;  %1061 = vmatprep.subr.bf16.mxu0 (!%p187_p2), %v1121_v4  ;;  %v229_v16 = vadd.s32 (!%p187_p2), 4294967293, %v1190_v13  ;;  %v922_v20 = vld [vmem:[%s1327_s1 + $0x48] sm:$0xff] (!%p187_p2)  ;;  %v1071_v23 = vpack.c.bf16 (!%p187_p2), %v917_v18, %v916_v17  ;;  %v919_v26 = vld [vmem:[%s1327_s1 + $0x38] sm:$0xff] (!%p187_p2)  ;;  %v923_v27 = vld [vmem:[%s1327_s1 + $0x50] sm:$0xff] (!%p187_p2)  ;;  %v386_v29 = vadd.s32 (!%p187_p2), 4294967294, %v1190_v13  ;;  %v471_v30 = vadd.s32 (!%p187_p2), 4294967295, %v1190_v13 }
   0xa   : > { %1067 = vmatprep.subr.bf16.mxu1 (!%p187_p2), %v1121_v4  ;;  %v1077_v24 = vpack.c.bf16 (!%p187_p2), %v922_v20, %v921_v19  ;;  %v924_v28 = vld [vmem:[%s1327_s1 + $0x58] sm:$0xff] (!%p187_p2)  ;;  %v1074_v32 = vpack.c.bf16 (!%p187_p2), %v919_v26, %v918_v25  ;;  %v926_v35 = vld [vmem:[%s1327_s1 + $0x80] sm:$0xff] (!%p187_p2)  ;;  %v927_v37 = vld [vmem:[%s1327_s1 + $0x88] sm:$0xff] (!%p187_p2)  ;;  %v556_v48 = vadd.s32 (!%p187_p2), 1, %v1190_v13  ;;  %v641_v49 = vadd.s32 (!%p187_p2), 2, %v1190_v13 }
   0xb   : > { %vm230_vm1 = vcmp.ge.s32.totalorder (!%p187_p2), %v229_v16, 0  ;;  %v1080_v33 = vpack.c.bf16 (!%p187_p2), %v924_v28, %v923_v27  ;;  %vm387_vm3 = vcmp.ge.s32.totalorder (!%p187_p2), %v386_v29, 0  ;;  %vm472_vm4 = vcmp.ge.s32.totalorder (!%p187_p2), %v471_v30, 0  ;;  %v931_v38 = vld [vmem:[%s1327_s1 + $0xa0] sm:$0xff] (!%p187_p2)  ;;  %v932_v39 = vld [vmem:[%s1327_s1 + $0xa8] sm:$0xff] (!%p187_p2)  ;;  %v928_v44 = vld [vmem:[%s1327_s1 + $0x90] sm:$0xff] (!%p187_p2) }
   0xc   : > { %1063 = vmatpush3.bf16.msra.mxu0 (!%p187_p2), %v1062_v14  ;;  %v1083_v41 = vpack.c.bf16 (!%p187_p2), %v927_v37, %v926_v35  ;;  %v1089_v43 = vpack.c.bf16 (!%p187_p2), %v932_v39, %v931_v38  ;;  %v929_v45 = vld [vmem:[%s1327_s1 + $0x98] sm:$0xff] (!%p187_p2)  ;;  %v933_v46 = vld [vmem:[%s1327_s1 + $0xb0] sm:$0xff] (!%p187_p2)  ;;  %vm558_vm5 = vcmp.lt.s32.totalorder (!%p187_p2), %v556_v48, 8  ;;  %v936_v54 = vld [vmem:[%s1327_s1 + $0xc0] sm:$0xff] (!%p187_p2)  ;;  %vm643_vm6 = vcmp.lt.s32.totalorder (!%p187_p2), %v641_v49, 8 }
   0xd   : > { %s1333_s19 = smov (!%p212_p3, %s903_s19), 1  ;;  %1069 = vmatpush3.bf16.msra.mxu1 %v1068_v15  ;;  %1070 = vmatprep.subr.bf16.mxu0 %v1121_v4  ;;  %v934_v47 = vld [vmem:[%s1327_s1 + $0xb8] sm:$0xff]  ;;  %v1086_v50 = vpack.c.bf16 %v929_v45, %v928_v44  ;;  %v937_v55 = vld [vmem:[%s1327_s1 + $0xc8] sm:$0xff]  ;;  %v938_v59 = vld [vmem:[%s1327_s1 + $0xd0] sm:$0xff]  ;;  %v726_v61 = vadd.s32 3, %v1190_v13 }
   0xe   : > { %s908_s13 = sshll.u32 %s1333_s19, 3  ;;  %1076 = vmatprep.subr.bf16.mxu1 %v1121_v4  ;;  %v1092_v51 = vpack.c.bf16 %v934_v47, %v933_v46  ;;  %v1095_v57 = vpack.c.bf16 %v937_v55, %v936_v54  ;;  %v939_v60 = vld [vmem:[%s1327_s1 + $0xd8] sm:$0xff]  ;;  %v941_v19 = vld [vmem:[%s1328_s2] ss:$0 sm:$0xff] }
   0xf   : > { %s215_s24 = scalar_lea.vmem %s1326_s0, %s908_s13  ;;  %v1098_v62 = vpack.c.bf16 %v939_v60, %v938_v59  ;;  %vm728_vm7 = vcmp.lt.s32.totalorder %v726_v61, 8  ;;  %v943_v35 = vld [vmem:[%s1330_s4] ss:$0 sm:$0xff]  ;;  %s219_s21 = scalar_lea.vmem %s1331_s5, %s908_s13 }
  0x10   : > { %v1217_v21 = vld [vmem:[%s215_s24] sm:$0xff] }
  0x11   : > { %v228_v22 = vrot.slane %v1217_v21, 5  ;;  %1001 = vmatmul.mubr.msk.f32.vlgmr.msra.gmra.mrb[0].mxu1 %vm238_vm2, %v1217_v21  ;;  %v385_v34 = vrot.slane %v1217_v21, 6  ;;  %v470_v36 = vrot.slane %v1217_v21, 7  ;;  %v555_v52 = vrot.slane %v1217_v21, 1 }
  0x12   : > { %1078 = vmatpush3.bf16.msra.mxu1 %v1077_v24  ;;  %1022 = vmatprep.mubr.msk.f32.mxu1 %vm1122_vm0, %v1123_v12  ;;  %v640_v53 = vrot.slane %v1217_v21, 2  ;;  %v725_v63 = vrot.slane %v1217_v21, 3 }
  0x13   : > { %v233_v31 = vsel %vm230_vm1, %v228_v22, 0.0  ;;  %1079 = vmatprep.subr.bf16.mxu1 %v1121_v4  ;;  %v390_v40 = vsel %vm387_vm3, %v385_v34, 0.0  ;;  %v475_v42 = vsel %vm472_vm4, %v470_v36, 0.0  ;;  %v560_v56 = vsel %vm558_vm5, %v555_v52, 0.0 }
  0x14   : > { %990 = vmatmul.mubr.msk.f32.vlgmr.msra.gmra.mrb[0].mxu0 %vm238_vm2, %v233_v31  ;;  %v645_v58 = vsel %vm643_vm6, %v640_v53, 0.0  ;;  %v730_v0 = vsel %vm728_vm7, %v725_v63, 0.0 }
  0x15   : > { %1072 = vmatpush3.bf16.msra.mxu0 %v1071_v23  ;;  %1011 = vmatprep.mubr.msk.f32.mxu0 %vm1122_vm0, %v1123_v12 }
  0x16   : > { %1073 = vmatprep.subr.bf16.mxu0 %v1121_v4  ;;  %1081 = vmatpush3.bf16.msra.mxu1 %v1080_v33  ;;  %v942_v33 = vld [vmem:[%s1329_s3] ss:$0 sm:$0xff] }
  0x17   : > { %1088 = vmatprep.subr.bf16.mxu1 %v1121_v4 }
  0x19   : > { %1075 = vmatpush3.bf16.msra.mxu0 %v1074_v32  ;;  %1023 = vmatmul.mubr.msk.f32.vlgmr.msra.gmra.mrb[2].mxu1 %vm238_vm2, %v475_v42 }
  0x1a   : > { %1082 = vmatprep.subr.bf16.mxu0 %v1121_v4  ;;  %1090 = vmatpush3.bf16.msra.mxu1 %v1089_v43 }
  0x1b   : > { %1091 = vmatprep.subr.bf16.mxu1 %v1121_v4  ;;  %1044 = vmatprep.mubr.msk.f32.mxu1 %vm1122_vm0, %v1123_v12 }
  0x1c   : > { %1012 = vmatmul.mubr.msk.f32.vlgmr.msra.gmra.mrb[2].mxu0 %vm238_vm2, %v390_v40 }
  0x1d   : > { %1084 = vmatpush3.bf16.msra.mxu0 %v1083_v41  ;;  %1033 = vmatprep.mubr.msk.f32.mxu0 %vm1122_vm0, %v1123_v12 }
  0x1e   : > { %1085 = vmatprep.subr.bf16.mxu0 %v1121_v4  ;;  %1093 = vmatpush3.bf16.msra.mxu1 %v1092_v51 }
  0x21   : > { %1087 = vmatpush3.bf16.msra.mxu0 %v1086_v50  ;;  %1045 = vmatmul.mubr.msk.f32.vlgmr.msra.gmra.mrb[4].mxu1 %vm238_vm2, %v645_v58 }
  0x22   : > { %1094 = vmatprep.subr.bf16.mxu0 %v1121_v4 }
  0x24   : > { %1034 = vmatmul.mubr.msk.f32.vlgmr.msra.gmra.mrb[4].mxu0 %vm238_vm2, %v560_v56 }
  0x25   : > { %1096 = vmatpush3.bf16.msra.mxu0 %v1095_v57  ;;  %1055 = vmatprep.mubr.msk.f32.mxu0 %vm1122_vm0, %v1123_v12 }
  0x26   : > { %1097 = vmatprep.subr.bf16.mxu0 %v1121_v4 }
  0x29   : > { %1099 = vmatpush3.bf16.msra.mxu0 %v1098_v62 }
  0x2c   : > { %1056 = vmatmul.mubr.msk.f32.vlgmr.msra.gmra.mrb[6].mxu0 %vm238_vm2, %v730_v0 }
  0xe4   : > { %v381_v2 = vpop.f32.mrb[0].mxu1 }
  0xe5   : > { %v1002_v6 = vpop.f32.mrb[1].mxu1 }
  0xe7   : > { %v308_v1 = vpop.f32.mrb[0].mxu0 }
  0xe8   : > { %v991_v3 = vpop.f32.mrb[1].mxu0  ;;  %v382_v5 = vadd.f32 %v381_v2, %v308_v1 }
  0xec   : > { %v550_v8 = vpop.f32.mrb[2].mxu1 }
  0xed   : > { %v1024_v11 = vpop.f32.mrb[3].mxu1 }
  0xef   : > { %v465_v7 = vpop.f32.mrb[2].mxu0 }
  0xf0   : > { %v469_v9 = vadd.f32 %v465_v7, %v382_v5  ;;  %v1013_v10 = vpop.f32.mrb[3].mxu0 }
  0xf2   : > { %v554_v12 = vadd.f32 %v550_v8, %v469_v9 }
  0xf4   : > { %v720_v14 = vpop.f32.mrb[4].mxu1 }
  0xf5   : > { %v1046_v16 = vpop.f32.mrb[5].mxu1 }
  0xf7   : > { %v635_v13 = vpop.f32.mrb[4].mxu0 }
  0xf8   : > { %v639_v15 = vadd.f32 %v635_v13, %v554_v12  ;;  %v1035_v4 = vpop.f32.mrb[5].mxu0 }
  0xfa   : > { %v724_v17 = vadd.f32 %v720_v14, %v639_v15 }
  0xff   : > { %v805_v18 = vpop.f32.mrb[6].mxu0 }
 0x100   : > { %v809_v20 = vadd.f32 %v805_v18, %v724_v17  ;;  %v1057_v21 = vpop.f32.mrb[7].mxu0 }
 0x102   : > { %v817_v22 = vadd.f32 %v941_v19, %v809_v20 }
 0x104   : > { %v821_v23 = vsel %vm820_vm8, %v817_v22, 0.0 }
 0x105   : > { %822 = vadd.xlane.f32.xlu0 %v821_v23 }
 0x192   : > { %v823_v24 = vpop.xlane.xlu0 %822 }
 0x193   : > { %v825_v25 = vmul.f32 0.125, %v823_v24 }
 0x195   : > { %v826_v26 = vsub.f32 %v817_v22, %v825_v25 }
 0x197   : > { %v827_v27 = vmul.f32 %v826_v26, %v826_v26 }
 0x199   : > { %v828_v28 = vsel %vm820_vm8, %v827_v27, 0.0 }
 0x19a   : > { %829 = vadd.xlane.f32.xlu0 %v828_v28 }
 0x227   : > { %v830_v29 = vpop.xlane.xlu0 %829 }
 0x228   : > { %v831_v30 = vmul.f32 0.125, %v830_v29 }
 0x22a   : > { %v832_v31 = vadd.f32 1e-05, %v831_v30 }
 0x22c   : > { %1111 = vrsqrt.f32 %v832_v31 }
 0x236   : > { %v1112_v32 = vpop.eup %1111 }
 0x237   : > { %v834_v34 = vmul.f32 %v1112_v32, %v826_v26 }
 0x239   : > { %v841_v36 = vmul.f32 %v942_v33, %v834_v34 }
 0x23b   : > { %v848_v37 = vadd.f32 %v943_v35, %v841_v36 }
 0x23d   : > { %849 = vst.msk [vmem:[%s219_s21] sm:$0xff] %vm820_vm8, %v848_v37 }
 0x23e PF: > { %s15_s18 = sadd.s32 1, %s1119_s18  }
 0x23f   : > { %p12_p4 = scmp.ge.s32.totalorder %s15_s18, 4  }
 0x241   :  { %14 = sbr.rel (!%p12_p4) target bundleno = 1 (0x1), region = 76 }

</bundles_post_ra>
